<compile_context>
chip_gen: v5e
topology: v5e:2x2
jax: 0.10.0
libtpu: 0.0.40
codegen_flags: <defaults>
</compile_context>

<pallas_src>
import functools
import math

import jax
import jax.numpy as jnp
from jax.experimental import pallas as pl
from jax.experimental.pallas import tpu as pltpu

NEG = -1e30          # additive mask value (acts like -inf for softmax)
LN_EPS = 1e-5        # nn.LayerNorm default


# ----------------------------------------------------------------------------
# In-kernel helpers (operate on values, not refs)
# ----------------------------------------------------------------------------
def _layer_norm(x, g, b):
    mu = jnp.mean(x, axis=-1, keepdims=True)
    xc = x - mu
    var = jnp.mean(xc * xc, axis=-1, keepdims=True)
    return xc * jax.lax.rsqrt(var + LN_EPS) * g + b


def _gelu_exact(x):
    # erf-based GELU (matches torch.nn.functional.gelu) via Abramowitz&Stegun
    # 7.1.26 polynomial (|err| <= 1.5e-7) -- only exp/mul/where, Mosaic-safe.
    z = x * (1.0 / math.sqrt(2.0))
    az = jnp.abs(z)
    t = 1.0 / (1.0 + 0.3275911 * az)
    poly = ((((1.061405429 * t - 1.453152027) * t + 1.421413741) * t
             - 0.284496736) * t + 0.254829592) * t
    erf_abs = 1.0 - poly * jnp.exp(-az * az)
    erf_z = jnp.where(z >= 0.0, erf_abs, -erf_abs)
    return x * 0.5 * (1.0 + erf_z)


def _attention(x_q, x_kv, w_ref, b_ref, wo_ref, bo_ref, bias, n_heads, dh):
    """Fused MHA for one batch element.

    w_ref : [3H, D, dh] bf16  (q heads, then k heads, then v heads)
    b_ref : [3H, 1, dh] f32
    wo_ref: [H, dh, D]  bf16  (per-head rows of the output projection)
    bo_ref: [1, D]      f32
    bias  : [1 or Sq, Skv] additive f32 mask
    """
    scale = 1.0 / math.sqrt(dh)
    xq = x_q.astype(jnp.bfloat16)
    xkv = x_kv.astype(jnp.bfloat16)
    out = None
    for h in range(n_heads):
        q = jnp.dot(xq, w_ref[h], preferred_element_type=jnp.float32) + b_ref[h]
        k = jnp.dot(xkv, w_ref[n_heads + h],
                    preferred_element_type=jnp.float32) + b_ref[n_heads + h]
        v = jnp.dot(xkv, w_ref[2 * n_heads + h],
                    preferred_element_type=jnp.float32) + b_ref[2 * n_heads + h]
        q = q * scale                                   # fold scale into q
        s = jax.lax.dot_general(
            q.astype(jnp.bfloat16), k.astype(jnp.bfloat16),
            dimension_numbers=(((1,), (1,)), ((), ())),
            preferred_element_type=jnp.float32) + bias
        m = jnp.max(s, axis=-1, keepdims=True)
        p = jnp.exp(s - m)
        l = jnp.sum(p, axis=-1, keepdims=True)
        p = p * pl.reciprocal(l, approx=True)           # EUP, ~free
        o = jnp.dot(p.astype(jnp.bfloat16), v.astype(jnp.bfloat16),
                    preferred_element_type=jnp.float32)
        proj = jnp.dot(o.astype(jnp.bfloat16), wo_ref[h],
                       preferred_element_type=jnp.float32)
        out = proj if out is None else out + proj
    return out + bo_ref[...]


def _ffn(x, w1_ref, b1_ref, w2_ref, b2_ref, activation):
    h = jnp.dot(x.astype(jnp.bfloat16), w1_ref[...],
                preferred_element_type=jnp.float32) + b1_ref[...]
    h = _gelu_exact(h) if activation == "gelu" else jnp.maximum(h, 0.0)
    return jnp.dot(h.astype(jnp.bfloat16), w2_ref[...],
                   preferred_element_type=jnp.float32) + b2_ref[...]


# ----------------------------------------------------------------------------
# Fused whole-stack kernels (grid = (batch, layer); output block = layer carry)
# ----------------------------------------------------------------------------
def _encoder_stack_kernel(x_ref, bias_ref,
                          aw_ref, ab_ref, awo_ref, abo_ref,
                          n1g_ref, n1b_ref,
                          w1_ref, b1_ref, w2_ref, b2_ref,
                          n2g_ref, n2b_ref,
                          o_ref, *, n_heads, dh):
    @pl.when(pl.program_id(1) == 0)          # layer 0: seed the carry
    def _():
        o_ref[0] = x_ref[0]
    x = o_ref[0]                             # [S, D] f32, resident across layers
    sa = _attention(x, x, aw_ref, ab_ref, awo_ref, abo_ref,
                    bias_ref[0], n_heads, dh)       # key-padding bias [1, S]
    x = _layer_norm(x + sa, n1g_ref[...], n1b_ref[...])
    ff = _ffn(x, w1_ref, b1_ref, w2_ref, b2_ref, "gelu")
    o_ref[0] = _layer_norm(x + ff, n2g_ref[...], n2b_ref[...])


def _decoder_stack_kernel(x_ref, mem_ref, ebias_ref,
                          sw_ref, sb_ref, swo_ref, sbo_ref,
                          n1g_ref, n1b_ref,
                          cw_ref, cb_ref, cwo_ref, cbo_ref,
                          n2g_ref, n2b_ref,
                          w1_ref, b1_ref, w2_ref, b2_ref,
                          n3g_ref, n3b_ref,
                          o_ref, *, n_heads, dh):
    @pl.when(pl.program_id(1) == 0)
    def _():
        o_ref[0] = x_ref[0]
    x = o_ref[0]                              # [Sy, D]
    mem = mem_ref[0]                          # [Sx, D]
    sy = x.shape[0]
    # causal additive mask generated in-kernel (no HBM mask traffic)
    row = jax.lax.broadcasted_iota(jnp.int32, (sy, sy), 0)
    col = jax.lax.broadcasted_iota(jnp.int32, (sy, sy), 1)
    causal = jnp.where(col > row, NEG, 0.0).astype(jnp.float32)
    sa = _attention(x, x, sw_ref, sb_ref, swo_ref, sbo_ref, causal, n_heads, dh)
    x = _layer_norm(x + sa, n1g_ref[...], n1b_ref[...])
    ca = _attention(x, mem, cw_ref, cb_ref, cwo_ref, cbo_ref,
                    ebias_ref[0], n_heads, dh)       # memory key-padding bias
    x = _layer_norm(x + ca, n2g_ref[...], n2b_ref[...])
    ff = _ffn(x, w1_ref, b1_ref, w2_ref, b2_ref, "relu")
    o_ref[0] = _layer_norm(x + ff, n3g_ref[...], n3b_ref[...])


def _generator_ce_kernel(x_ref, w_ref, b_ref, label_ref, logit_ref, nll_ref):
    logits = jnp.dot(x_ref[...].astype(jnp.bfloat16), w_ref[...],
                     preferred_element_type=jnp.float32) + b_ref[...]
    logit_ref[...] = logits
    m = jnp.max(logits, axis=-1, keepdims=True)
    lse = jnp.log(jnp.sum(jnp.exp(logits - m), axis=-1, keepdims=True)) + m
    ids = jax.lax.broadcasted_iota(jnp.int32, logits.shape, 1)
    tgt = jnp.sum(jnp.where(ids == label_ref[...], logits, 0.0),
                  axis=-1, keepdims=True)
    nll_ref[...] = lse - tgt


# ----------------------------------------------------------------------------
# pallas_call wrappers
# ----------------------------------------------------------------------------
def _batch_spec(shape):
    nd = len(shape)
    return pl.BlockSpec((1,) + tuple(shape[1:]),
                        lambda b, l: (b,) + (0,) * (nd - 1))


def _layer_spec(shape):
    nd = len(shape)
    return pl.BlockSpec((None,) + tuple(shape[1:]),     # layer dim squeezed
                        lambda b, l: (l,) + (0,) * (nd - 1))


_ENC_ORDER = ("aw", "ab", "awo", "abo", "n1g", "n1b",
              "w1", "b1", "w2", "b2", "n2g", "n2b")
_DEC_ORDER = ("sw", "sb", "swo", "sbo", "n1g", "n1b",
              "cw", "cb", "cwo", "cbo", "n2g", "n2b",
              "w1", "b1", "w2", "b2", "n3g", "n3b")


def encoder_stack_pallas(x, kp_bias, ep, n_heads, dh, n_layers):
    B, S, D = x.shape
    w_args = [ep[k] for k in _ENC_ORDER]
    in_specs = ([_batch_spec(x.shape), _batch_spec(kp_bias.shape)]
                + [_layer_spec(a.shape) for a in w_args])
    return pl.pallas_call(
        functools.partial(_encoder_stack_kernel, n_heads=n_heads, dh=dh),
        out_shape=jax.ShapeDtypeStruct((B, S, D), jnp.float32),
        grid=(B, n_layers),
        in_specs=in_specs,
        out_specs=_batch_spec((B, S, D)),
        compiler_params=pltpu.CompilerParams(
            dimension_semantics=("parallel", "arbitrary")),
    )(x, kp_bias, *w_args)


def decoder_stack_pallas(x, memory, kp_bias, dp, n_heads, dh, n_layers):
    B, Sy, D = x.shape
    w_args = [dp[k] for k in _DEC_ORDER]
    in_specs = ([_batch_spec(x.shape), _batch_spec(memory.shape),
                 _batch_spec(kp_bias.shape)]
                + [_layer_spec(a.shape) for a in w_args])
    return pl.pallas_call(
        functools.partial(_decoder_stack_kernel, n_heads=n_heads, dh=dh),
        out_shape=jax.ShapeDtypeStruct((B, Sy, D), jnp.float32),
        grid=(B, n_layers),
        in_specs=in_specs,
        out_specs=_batch_spec((B, Sy, D)),
        compiler_params=pltpu.CompilerParams(
            dimension_semantics=("parallel", "arbitrary")),
    )(x, memory, kp_bias, *w_args)


def generator_ce_pallas(x2d, gen_w_t, gen_b, labels):
    N, _ = x2d.shape
    V = gen_w_t.shape[1]
    return pl.pallas_call(          # single-shot: whole problem fits VMEM here
        _generator_ce_kernel,
        out_shape=(jax.ShapeDtypeStruct((N, V), jnp.float32),
                   jax.ShapeDtypeStruct((N, 1), jnp.float32)),
    )(x2d, gen_w_t, gen_b, labels.reshape(N, 1).astype(jnp.int32))


# ----------------------------------------------------------------------------
# Forward pass glue (plain JAX only for the token-embedding gather + loss mean)
# ----------------------------------------------------------------------------
def make_forward(cfg):
    pad_id = cfg["pad_id"]
    H, D, V, L = cfg["n_heads"], cfg["hidden_dim"], cfg["vocab_size"], cfg["n_layers"]
    dh = D // H
    emb_scale = math.sqrt(cfg["emb_dim"])

    def fwd(params, x_tok, y_tok):
        y_in, label = y_tok[:, :-1], y_tok[:, 1:]          # shift_y
        B, Sx = x_tok.shape
        Sy = y_in.shape[1]
        # key-padding additive bias, kept as tiny [B, 1, Sx] (no broadcast)
        kp_bias = jnp.where(x_tok == pad_id, NEG, 0.0).astype(jnp.float32)[:, None, :]
        # TODO(synk): token-embedding gather stays in plain JAX (data-dependent gather).
        h = jnp.take(params["enc_emb"], x_tok, axis=0) * emb_scale
        h = h + params["pe"][None, :Sx, :]
        memory = encoder_stack_pallas(h, kp_bias, params["enc_stack"], H, dh, L)
        d = jnp.take(params["dec_emb"], y_in, axis=0) * emb_scale
        d = d + params["pe"][None, :Sy, :]
        d = decoder_stack_pallas(d, memory, kp_bias, params["dec_stack"], H, dh, L)
        logits2d, nll = generator_ce_pallas(
            d.reshape(B * Sy, D), params["gen_w_t"], params["gen_b"],
            label.reshape(-1))
        logit = logits2d.reshape(B, Sy, V)
        loss = jnp.mean(nll)                                # CrossEntropyLoss(mean)
        return logit, loss

    return jax.jit(fwd)


# ----------------------------------------------------------------------------
# Deterministic parameter init (PyTorch-style layouts) + kernel-layout prep
# ----------------------------------------------------------------------------
def _w(key, shape, s=0.05):
    return jax.random.normal(key, shape, dtype=jnp.float32) * s


def init_mha(key, D):
    k1, k2 = jax.random.split(key)
    return {"in_w": _w(k1, (3 * D, D)), "in_b": jnp.zeros((3 * D,), jnp.float32),
            "out_w": _w(k2, (D, D)), "out_b": jnp.zeros((D,), jnp.float32)}


def init_ffn(key, D, F):
    k1, k2 = jax.random.split(key)
    return {"w1": _w(k1, (F, D)), "b1": jnp.zeros((F,), jnp.float32),
            "w2": _w(k2, (D, F)), "b2": jnp.zeros((D,), jnp.float32)}


def init_params(key, cfg):
    D, F, V, E, L = (cfg["hidden_dim"], cfg["pff_dim"], cfg["vocab_size"],
                     cfg["emb_dim"], cfg["n_layers"])
    keys = jax.random.split(key, 4 + 2 * L)
    pos = jnp.arange(cfg["max_len"], dtype=jnp.float32)[:, None]
    div = jnp.exp(jnp.arange(0, E, 2, dtype=jnp.float32) * (-math.log(10000.0) / E))
    pe = jnp.zeros((cfg["max_len"], E), jnp.float32)
    pe = pe.at[:, 0::2].set(jnp.sin(pos * div))
    pe = pe.at[:, 1::2].set(jnp.cos(pos * div))

    enc_layers, dec_layers = [], []
    for i in range(L):
        ek = jax.random.split(keys[4 + i], 3)
        enc_layers.append({
            "self_attn": init_mha(ek[0], D), "ffn": init_ffn(ek[1], D, F),
            "n1_g": jnp.ones((D,), jnp.float32), "n1_b": jnp.zeros((D,), jnp.float32),
            "n2_g": jnp.ones((D,), jnp.float32), "n2_b": jnp.zeros((D,), jnp.float32),
        })
        dk = jax.random.split(keys[4 + L + i], 4)
        dec_layers.append({
            "self_attn": init_mha(dk[0], D), "cross_attn": init_mha(dk[1], D),
            "ffn": init_ffn(dk[2], D, F),
            "n1_g": jnp.ones((D,), jnp.float32), "n1_b": jnp.zeros((D,), jnp.float32),
            "n2_g": jnp.ones((D,), jnp.float32), "n2_b": jnp.zeros((D,), jnp.float32),
            "n3_g": jnp.ones((D,), jnp.float32), "n3_b": jnp.zeros((D,), jnp.float32),
        })
    return {"pe": pe,
            "enc_emb": _w(keys[0], (V, E), 1.0), "dec_emb": _w(keys[1], (V, E), 1.0),
            "gen_w": _w(keys[2], (V, D)), "gen_b": jnp.zeros((V,), jnp.float32),
            "enc_layers": enc_layers, "dec_layers": dec_layers}


def _prep_mha(p, H, dh):
    """[3D,D] in_proj (out,in) -> per-(q/k/v,head) stacked [3H, D, dh] bf16."""
    D = H * dh
    w = p["in_w"].reshape(3, H, dh, D).transpose(0, 1, 3, 2).reshape(3 * H, D, dh)
    b = p["in_b"].reshape(3 * H, 1, dh)
    wo = p["out_w"].T.reshape(H, dh, D)        # concat-head rows split per head
    return (w.astype(jnp.bfloat16), b.astype(jnp.float32),
            wo.astype(jnp.bfloat16), p["out_b"].reshape(1, D).astype(jnp.float32))


def _stack_layers(layer_dicts):
    keys = layer_dicts[0].keys()
    return {k: jnp.stack([d[k] for d in layer_dicts], axis=0) for k in keys}


def prep_params(params, cfg):
    H, D = cfg["n_heads"], cfg["hidden_dim"]
    dh = D // H

    def enc_flat(lp):
        aw, ab, awo, abo = _prep_mha(lp["self_attn"], H, dh)
        f = lp["ffn"]
        return dict(aw=aw, ab=ab, awo=awo, abo=abo,
                    n1g=lp["n1_g"].reshape(1, D), n1b=lp["n1_b"].reshape(1, D),
                    w1=f["w1"].T.astype(jnp.bfloat16), b1=f["b1"].reshape(1, -1),
                    w2=f["w2"].T.astype(jnp.bfloat16), b2=f["b2"].reshape(1, -1),
                    n2g=lp["n2_g"].reshape(1, D), n2b=lp["n2_b"].reshape(1, D))

    def dec_flat(lp):
        sw, sb, swo, sbo = _prep_mha(lp["self_attn"], H, dh)
        cw, cb, cwo, cbo = _prep_mha(lp["cross_attn"], H, dh)
        f = lp["ffn"]
        return dict(sw=sw, sb=sb, swo=swo, sbo=sbo,
                    n1g=lp["n1_g"].reshape(1, D), n1b=lp["n1_b"].reshape(1, D),
                    cw=cw, cb=cb, cwo=cwo, cbo=cbo,
                    n2g=lp["n2_g"].reshape(1, D), n2b=lp["n2_b"].reshape(1, D),
                    w1=f["w1"].T.astype(jnp.bfloat16), b1=f["b1"].reshape(1, -1),
                    w2=f["w2"].T.astype(jnp.bfloat16), b2=f["b2"].reshape(1, -1),
                    n3g=lp["n3_g"].reshape(1, D), n3b=lp["n3_b"].reshape(1, D))

    return {"pe": params["pe"],
            "enc_emb": params["enc_emb"], "dec_emb": params["dec_emb"],
            "gen_w_t": params["gen_w"].T.astype(jnp.bfloat16),
            "gen_b": params["gen_b"].reshape(1, -1),
            "enc_stack": _stack_layers([enc_flat(lp) for lp in params["enc_layers"]]),
            "dec_stack": _stack_layers([dec_flat(lp) for lp in params["dec_layers"]])}


# ----------------------------------------------------------------------------
if __name__ == "__main__":
    cfg = dict(vocab_size=32, emb_dim=32, hidden_dim=32, n_heads=2,
               pff_dim=64, n_layers=2, max_len=16, pad_id=0, bos_id=1, eos_id=2)

    key = jax.random.PRNGKey(0)
    kp, kx, ky = jax.random.split(key, 3)
    params = prep_params(init_params(kp, cfg), cfg)

    B, Sx, Sy_tot = 2, 8, 9
    x = jax.random.randint(kx, (B, Sx), 3, cfg["vocab_size"], dtype=jnp.int32)
    x = x.at[:, -2:].set(cfg["pad_id"])            # some padded source positions
    y = jax.random.randint(ky, (B, Sy_tot), 3, cfg["vocab_size"], dtype=jnp.int32)
    y = y.at[:, 0].set(cfg["bos_id"])

    fwd = make_forward(cfg)
    logit, loss = fwd(params, x, y)
    jax.block_until_ready((logit, loss))
    assert logit.shape == (B, Sy_tot - 1, cfg["vocab_size"])
    assert bool(jnp.isfinite(loss))
    print("KERNEL_OK")
</pallas_src>

<mosaic_0001>
module attributes {stable_mosaic.version = 11 : i64} {
  func.func @_encoder_stack_kernel(%arg0: i32, %arg1: i32, %arg2: memref<1x8x32xf32, #tpu.memory_space<vmem>>, %arg3: memref<1x1x8xf32, #tpu.memory_space<vmem>>, %arg4: memref<1x6x32x16xbf16, #tpu.memory_space<vmem>>, %arg5: memref<1x6x1x16xf32, #tpu.memory_space<vmem>>, %arg6: memref<1x2x16x32xbf16, #tpu.memory_space<vmem>>, %arg7: memref<1x1x32xf32, #tpu.memory_space<vmem>>, %arg8: memref<1x1x32xf32, #tpu.memory_space<vmem>>, %arg9: memref<1x1x32xf32, #tpu.memory_space<vmem>>, %arg10: memref<1x32x64xbf16, #tpu.memory_space<vmem>>, %arg11: memref<1x1x64xf32, #tpu.memory_space<vmem>>, %arg12: memref<1x64x32xbf16, #tpu.memory_space<vmem>>, %arg13: memref<1x1x32xf32, #tpu.memory_space<vmem>>, %arg14: memref<1x1x32xf32, #tpu.memory_space<vmem>>, %arg15: memref<1x1x32xf32, #tpu.memory_space<vmem>>, %arg16: memref<1x8x32xf32, #tpu.memory_space<vmem>>) attributes {dimension_semantics = [#tpu.dimension_semantics<parallel>, #tpu.dimension_semantics<arbitrary>], iteration_bounds = array<i64: 2, 2>, scalar_prefetch = 0 : i64, scratch_operands = 0 : i64, tpu.core_type = #tpu.core_type<tc>, window_params = [{transform_indices = @transform_0, window_bounds = array<i64: 1, 8, 32>}, {transform_indices = @transform_1, window_bounds = array<i64: 1, 1, 8>}, {transform_indices = @transform_2, window_bounds = array<i64: 1, 6, 32, 16>}, {transform_indices = @transform_3, window_bounds = array<i64: 1, 6, 1, 16>}, {transform_indices = @transform_4, window_bounds = array<i64: 1, 2, 16, 32>}, {transform_indices = @transform_5, window_bounds = array<i64: 1, 1, 32>}, {transform_indices = @transform_6, window_bounds = array<i64: 1, 1, 32>}, {transform_indices = @transform_7, window_bounds = array<i64: 1, 1, 32>}, {transform_indices = @transform_8, window_bounds = array<i64: 1, 32, 64>}, {transform_indices = @transform_9, window_bounds = array<i64: 1, 1, 64>}, {transform_indices = @transform_10, window_bounds = array<i64: 1, 64, 32>}, {transform_indices = @transform_11, window_bounds = array<i64: 1, 1, 32>}, {transform_indices = @transform_12, window_bounds = array<i64: 1, 1, 32>}, {transform_indices = @transform_13, window_bounds = array<i64: 1, 1, 32>}, {transform_indices = @transform_14, window_bounds = array<i64: 1, 8, 32>}]} {
    %c0_i32 = arith.constant 0 : i32
    %0 = arith.cmpi eq, %arg1, %c0_i32 : i32
    %1 = arith.extui %0 : i1 to i32
    %c0_i32_0 = arith.constant 0 : i32
    %2 = arith.cmpi ne, %1, %c0_i32_0 : i32
    scf.if %2 {
      %c0_131 = arith.constant 0 : index
      %c0_132 = arith.constant 0 : index
      %c0_133 = arith.constant 0 : index
      %213 = vector.load %arg2[%c0_131, %c0_132, %c0_133] : memref<1x8x32xf32, #tpu.memory_space<vmem>>, vector<1x8x32xf32>
      %214 = vector.shape_cast %213 : vector<1x8x32xf32> to vector<8x32xf32>
      %c0_134 = arith.constant 0 : index
      %c0_135 = arith.constant 0 : index
      %c0_136 = arith.constant 0 : index
      %215 = vector.load %arg16[%c0_134, %c0_135, %c0_136] : memref<1x8x32xf32, #tpu.memory_space<vmem>>, vector<1x8x32xf32>
      %216 = vector.shape_cast %215 : vector<1x8x32xf32> to vector<8x32xf32>
      %217 = vector.shape_cast %214 : vector<8x32xf32> to vector<1x8x32xf32>
      tpu.vector_store %arg16[%c0_134, %c0_135, %c0_136], %217 {strides = array<i32>} : memref<1x8x32xf32, #tpu.memory_space<vmem>>, vector<1x8x32xf32>,
    } else {
    }
    %c0 = arith.constant 0 : index
    %c0_1 = arith.constant 0 : index
    %c0_2 = arith.constant 0 : index
    %3 = vector.load %arg16[%c0, %c0_1, %c0_2] : memref<1x8x32xf32, #tpu.memory_space<vmem>>, vector<1x8x32xf32>
    %4 = vector.shape_cast %3 : vector<1x8x32xf32> to vector<8x32xf32>
    %c0_3 = arith.constant 0 : index
    %c0_4 = arith.constant 0 : index
    %c0_5 = arith.constant 0 : index
    %5 = vector.load %arg3[%c0_3, %c0_4, %c0_5] : memref<1x1x8xf32, #tpu.memory_space<vmem>>, vector<1x1x8xf32>
    %6 = vector.shape_cast %5 : vector<1x1x8xf32> to vector<1x8xf32>
    %7 = arith.truncf %4 : vector<8x32xf32> to vector<8x32xbf16>
    %8 = arith.truncf %4 : vector<8x32xf32> to vector<8x32xbf16>
    %c0_6 = arith.constant 0 : index
    %c0_7 = arith.constant 0 : index
    %c0_8 = arith.constant 0 : index
    %c0_9 = arith.constant 0 : index
    %9 = vector.load %arg4[%c0_6, %c0_7, %c0_8, %c0_9] : memref<1x6x32x16xbf16, #tpu.memory_space<vmem>>, vector<1x1x32x16xbf16>
    %10 = vector.shape_cast %9 : vector<1x1x32x16xbf16> to vector<32x16xbf16>
    %cst = arith.constant dense<0.000000e+00> : vector<8x16xf32>
    %11 = tpu.matmul %7, %10, %cst {dimension_numbers = #tpu.dot_dimension_numbers<[1], [0], [0], [1], [0, 0, 1, 1], [], []>} : vector<8x32xbf16>, vector<32x16xbf16>, vector<8x16xf32> -> vector<8x16xf32>
    %c0_10 = arith.constant 0 : index
    %c0_11 = arith.constant 0 : index
    %c0_12 = arith.constant 0 : index
    %c0_13 = arith.constant 0 : index
    %12 = vector.load %arg5[%c0_10, %c0_11, %c0_12, %c0_13] : memref<1x6x1x16xf32, #tpu.memory_space<vmem>>, vector<1x1x1x16xf32>
    %13 = vector.shape_cast %12 : vector<1x1x1x16xf32> to vector<1x16xf32>
    %14 = vector.broadcast %13 : vector<1x16xf32> to vector<8x16xf32>
    %15 = arith.addf %11, %14 : vector<8x16xf32>
    %c0_14 = arith.constant 0 : index
    %c2 = arith.constant 2 : index
    %c0_15 = arith.constant 0 : index
    %c0_16 = arith.constant 0 : index
    %16 = vector.load %arg4[%c0_14, %c2, %c0_15, %c0_16] : memref<1x6x32x16xbf16, #tpu.memory_space<vmem>>, vector<1x1x32x16xbf16>
    %17 = vector.shape_cast %16 : vector<1x1x32x16xbf16> to vector<32x16xbf16>
    %cst_17 = arith.constant dense<0.000000e+00> : vector<8x16xf32>
    %18 = tpu.matmul %8, %17, %cst_17 {dimension_numbers = #tpu.dot_dimension_numbers<[1], [0], [0], [1], [0, 0, 1, 1], [], []>} : vector<8x32xbf16>, vector<32x16xbf16>, vector<8x16xf32> -> vector<8x16xf32>
    %c0_18 = arith.constant 0 : index
    %c2_19 = arith.constant 2 : index
    %c0_20 = arith.constant 0 : index
    %c0_21 = arith.constant 0 : index
    %19 = vector.load %arg5[%c0_18, %c2_19, %c0_20, %c0_21] : memref<1x6x1x16xf32, #tpu.memory_space<vmem>>, vector<1x1x1x16xf32>
    %20 = vector.shape_cast %19 : vector<1x1x1x16xf32> to vector<1x16xf32>
    %21 = vector.broadcast %20 : vector<1x16xf32> to vector<8x16xf32>
    %22 = arith.addf %18, %21 : vector<8x16xf32>
    %c0_22 = arith.constant 0 : index
    %c4 = arith.constant 4 : index
    %c0_23 = arith.constant 0 : index
    %c0_24 = arith.constant 0 : index
    %23 = vector.load %arg4[%c0_22, %c4, %c0_23, %c0_24] : memref<1x6x32x16xbf16, #tpu.memory_space<vmem>>, vector<1x1x32x16xbf16>
    %24 = vector.shape_cast %23 : vector<1x1x32x16xbf16> to vector<32x16xbf16>
    %cst_25 = arith.constant dense<0.000000e+00> : vector<8x16xf32>
    %25 = tpu.matmul %8, %24, %cst_25 {dimension_numbers = #tpu.dot_dimension_numbers<[1], [0], [0], [1], [0, 0, 1, 1], [], []>} : vector<8x32xbf16>, vector<32x16xbf16>, vector<8x16xf32> -> vector<8x16xf32>
    %c0_26 = arith.constant 0 : index
    %c4_27 = arith.constant 4 : index
    %c0_28 = arith.constant 0 : index
    %c0_29 = arith.constant 0 : index
    %26 = vector.load %arg5[%c0_26, %c4_27, %c0_28, %c0_29] : memref<1x6x1x16xf32, #tpu.memory_space<vmem>>, vector<1x1x1x16xf32>
    %27 = vector.shape_cast %26 : vector<1x1x1x16xf32> to vector<1x16xf32>
    %28 = vector.broadcast %27 : vector<1x16xf32> to vector<8x16xf32>
    %29 = arith.addf %25, %28 : vector<8x16xf32>
    %cst_30 = arith.constant 2.500000e-01 : f32
    %30 = vector.broadcast %cst_30 : f32 to vector<8x16xf32>
    %31 = arith.mulf %15, %30 : vector<8x16xf32>
    %32 = arith.truncf %31 : vector<8x16xf32> to vector<8x16xbf16>
    %33 = arith.truncf %22 : vector<8x16xf32> to vector<8x16xbf16>
    %cst_31 = arith.constant dense<0.000000e+00> : vector<8x8xf32>
    %34 = tpu.matmul %32, %33, %cst_31 {dimension_numbers = #tpu.dot_dimension_numbers<[1], [1], [0], [0], [0, 0, 1, 0], [], []>} : vector<8x16xbf16>, vector<8x16xbf16>, vector<8x8xf32> -> vector<8x8xf32>
    %35 = vector.broadcast %6 : vector<1x8xf32> to vector<8x8xf32>
    %36 = arith.addf %34, %35 : vector<8x8xf32>
    %cst_32 = arith.constant dense<0xFF800000> : vector<8xf32>
    %37 = vector.multi_reduction <maximumf>, %36, %cst_32 [1] : vector<8x8xf32> to vector<8xf32>
    %38 = vector.shape_cast %37 : vector<8xf32> to vector<8x1xf32>
    %39 = vector.broadcast %38 : vector<8x1xf32> to vector<8x8xf32>
    %40 = arith.subf %36, %39 : vector<8x8xf32>
    %41 = math.exp %40 : vector<8x8xf32>
    %cst_33 = arith.constant dense<0.000000e+00> : vector<8xf32>
    %42 = vector.multi_reduction <add>, %41, %cst_33 [1] : vector<8x8xf32> to vector<8xf32>
    %43 = vector.shape_cast %42 : vector<8xf32> to vector<8x1xf32>
    %44 = tpu.reciprocal %43 {approx = true} : vector<8x1xf32> -> vector<8x1xf32>
    %45 = vector.broadcast %44 : vector<8x1xf32> to vector<8x8xf32>
    %46 = arith.mulf %41, %45 : vector<8x8xf32>
    %47 = arith.truncf %46 : vector<8x8xf32> to vector<8x8xbf16>
    %48 = arith.truncf %29 : vector<8x16xf32> to vector<8x16xbf16>
    %cst_34 = arith.constant dense<0.000000e+00> : vector<8x16xf32>
    %49 = tpu.matmul %47, %48, %cst_34 {dimension_numbers = #tpu.dot_dimension_numbers<[1], [0], [0], [1], [0, 0, 1, 1], [], []>} : vector<8x8xbf16>, vector<8x16xbf16>, vector<8x16xf32> -> vector<8x16xf32>
    %50 = arith.truncf %49 : vector<8x16xf32> to vector<8x16xbf16>
    %c0_35 = arith.constant 0 : index
    %c0_36 = arith.constant 0 : index
    %c0_37 = arith.constant 0 : index
    %c0_38 = arith.constant 0 : index
    %51 = vector.load %arg6[%c0_35, %c0_36, %c0_37, %c0_38] : memref<1x2x16x32xbf16, #tpu.memory_space<vmem>>, vector<1x1x16x32xbf16>
    %52 = vector.shape_cast %51 : vector<1x1x16x32xbf16> to vector<16x32xbf16>
    %cst_39 = arith.constant dense<0.000000e+00> : vector<8x32xf32>
    %53 = tpu.matmul %50, %52, %cst_39 {dimension_numbers = #tpu.dot_dimension_numbers<[1], [0], [0], [1], [0, 0, 1, 1], [], []>} : vector<8x16xbf16>, vector<16x32xbf16>, vector<8x32xf32> -> vector<8x32xf32>
    %c0_40 = arith.constant 0 : index
    %c1 = arith.constant 1 : index
    %c0_41 = arith.constant 0 : index
    %c0_42 = arith.constant 0 : index
    %54 = vector.load %arg4[%c0_40, %c1, %c0_41, %c0_42] : memref<1x6x32x16xbf16, #tpu.memory_space<vmem>>, vector<1x1x32x16xbf16>
    %55 = vector.shape_cast %54 : vector<1x1x32x16xbf16> to vector<32x16xbf16>
    %cst_43 = arith.constant dense<0.000000e+00> : vector<8x16xf32>
    %56 = tpu.matmul %7, %55, %cst_43 {dimension_numbers = #tpu.dot_dimension_numbers<[1], [0], [0], [1], [0, 0, 1, 1], [], []>} : vector<8x32xbf16>, vector<32x16xbf16>, vector<8x16xf32> -> vector<8x16xf32>
    %c0_44 = arith.constant 0 : index
    %c1_45 = arith.constant 1 : index
    %c0_46 = arith.constant 0 : index
    %c0_47 = arith.constant 0 : index
    %57 = vector.load %arg5[%c0_44, %c1_45, %c0_46, %c0_47] : memref<1x6x1x16xf32, #tpu.memory_space<vmem>>, vector<1x1x1x16xf32>
    %58 = vector.shape_cast %57 : vector<1x1x1x16xf32> to vector<1x16xf32>
    %59 = vector.broadcast %58 : vector<1x16xf32> to vector<8x16xf32>
    %60 = arith.addf %56, %59 : vector<8x16xf32>
    %c0_48 = arith.constant 0 : index
    %c3 = arith.constant 3 : index
    %c0_49 = arith.constant 0 : index
    %c0_50 = arith.constant 0 : index
    %61 = vector.load %arg4[%c0_48, %c3, %c0_49, %c0_50] : memref<1x6x32x16xbf16, #tpu.memory_space<vmem>>, vector<1x1x32x16xbf16>
    %62 = vector.shape_cast %61 : vector<1x1x32x16xbf16> to vector<32x16xbf16>
    %cst_51 = arith.constant dense<0.000000e+00> : vector<8x16xf32>
    %63 = tpu.matmul %8, %62, %cst_51 {dimension_numbers = #tpu.dot_dimension_numbers<[1], [0], [0], [1], [0, 0, 1, 1], [], []>} : vector<8x32xbf16>, vector<32x16xbf16>, vector<8x16xf32> -> vector<8x16xf32>
    %c0_52 = arith.constant 0 : index
    %c3_53 = arith.constant 3 : index
    %c0_54 = arith.constant 0 : index
    %c0_55 = arith.constant 0 : index
    %64 = vector.load %arg5[%c0_52, %c3_53, %c0_54, %c0_55] : memref<1x6x1x16xf32, #tpu.memory_space<vmem>>, vector<1x1x1x16xf32>
    %65 = vector.shape_cast %64 : vector<1x1x1x16xf32> to vector<1x16xf32>
    %66 = vector.broadcast %65 : vector<1x16xf32> to vector<8x16xf32>
    %67 = arith.addf %63, %66 : vector<8x16xf32>
    %c0_56 = arith.constant 0 : index
    %c5 = arith.constant 5 : index
    %c0_57 = arith.constant 0 : index
    %c0_58 = arith.constant 0 : index
    %68 = vector.load %arg4[%c0_56, %c5, %c0_57, %c0_58] : memref<1x6x32x16xbf16, #tpu.memory_space<vmem>>, vector<1x1x32x16xbf16>
    %69 = vector.shape_cast %68 : vector<1x1x32x16xbf16> to vector<32x16xbf16>
    %cst_59 = arith.constant dense<0.000000e+00> : vector<8x16xf32>
    %70 = tpu.matmul %8, %69, %cst_59 {dimension_numbers = #tpu.dot_dimension_numbers<[1], [0], [0], [1], [0, 0, 1, 1], [], []>} : vector<8x32xbf16>, vector<32x16xbf16>, vector<8x16xf32> -> vector<8x16xf32>
    %c0_60 = arith.constant 0 : index
    %c5_61 = arith.constant 5 : index
    %c0_62 = arith.constant 0 : index
    %c0_63 = arith.constant 0 : index
    %71 = vector.load %arg5[%c0_60, %c5_61, %c0_62, %c0_63] : memref<1x6x1x16xf32, #tpu.memory_space<vmem>>, vector<1x1x1x16xf32>
    %72 = vector.shape_cast %71 : vector<1x1x1x16xf32> to vector<1x16xf32>
    %73 = vector.broadcast %72 : vector<1x16xf32> to vector<8x16xf32>
    %74 = arith.addf %70, %73 : vector<8x16xf32>
    %cst_64 = arith.constant 2.500000e-01 : f32
    %75 = vector.broadcast %cst_64 : f32 to vector<8x16xf32>
    %76 = arith.mulf %60, %75 : vector<8x16xf32>
    %77 = arith.truncf %76 : vector<8x16xf32> to vector<8x16xbf16>
    %78 = arith.truncf %67 : vector<8x16xf32> to vector<8x16xbf16>
    %cst_65 = arith.constant dense<0.000000e+00> : vector<8x8xf32>
    %79 = tpu.matmul %77, %78, %cst_65 {dimension_numbers = #tpu.dot_dimension_numbers<[1], [1], [0], [0], [0, 0, 1, 0], [], []>} : vector<8x16xbf16>, vector<8x16xbf16>, vector<8x8xf32> -> vector<8x8xf32>
    %80 = vector.broadcast %6 : vector<1x8xf32> to vector<8x8xf32>
    %81 = arith.addf %79, %80 : vector<8x8xf32>
    %cst_66 = arith.constant dense<0xFF800000> : vector<8xf32>
    %82 = vector.multi_reduction <maximumf>, %81, %cst_66 [1] : vector<8x8xf32> to vector<8xf32>
    %83 = vector.shape_cast %82 : vector<8xf32> to vector<8x1xf32>
    %84 = vector.broadcast %83 : vector<8x1xf32> to vector<8x8xf32>
    %85 = arith.subf %81, %84 : vector<8x8xf32>
    %86 = math.exp %85 : vector<8x8xf32>
    %cst_67 = arith.constant dense<0.000000e+00> : vector<8xf32>
    %87 = vector.multi_reduction <add>, %86, %cst_67 [1] : vector<8x8xf32> to vector<8xf32>
    %88 = vector.shape_cast %87 : vector<8xf32> to vector<8x1xf32>
    %89 = tpu.reciprocal %88 {approx = true} : vector<8x1xf32> -> vector<8x1xf32>
    %90 = vector.broadcast %89 : vector<8x1xf32> to vector<8x8xf32>
    %91 = arith.mulf %86, %90 : vector<8x8xf32>
    %92 = arith.truncf %91 : vector<8x8xf32> to vector<8x8xbf16>
    %93 = arith.truncf %74 : vector<8x16xf32> to vector<8x16xbf16>
    %cst_68 = arith.constant dense<0.000000e+00> : vector<8x16xf32>
    %94 = tpu.matmul %92, %93, %cst_68 {dimension_numbers = #tpu.dot_dimension_numbers<[1], [0], [0], [1], [0, 0, 1, 1], [], []>} : vector<8x8xbf16>, vector<8x16xbf16>, vector<8x16xf32> -> vector<8x16xf32>
    %95 = arith.truncf %94 : vector<8x16xf32> to vector<8x16xbf16>
    %c0_69 = arith.constant 0 : index
    %c1_70 = arith.constant 1 : index
    %c0_71 = arith.constant 0 : index
    %c0_72 = arith.constant 0 : index
    %96 = vector.load %arg6[%c0_69, %c1_70, %c0_71, %c0_72] : memref<1x2x16x32xbf16, #tpu.memory_space<vmem>>, vector<1x1x16x32xbf16>
    %97 = vector.shape_cast %96 : vector<1x1x16x32xbf16> to vector<16x32xbf16>
    %cst_73 = arith.constant dense<0.000000e+00> : vector<8x32xf32>
    %98 = tpu.matmul %95, %97, %cst_73 {dimension_numbers = #tpu.dot_dimension_numbers<[1], [0], [0], [1], [0, 0, 1, 1], [], []>} : vector<8x16xbf16>, vector<16x32xbf16>, vector<8x32xf32> -> vector<8x32xf32>
    %99 = arith.addf %53, %98 : vector<8x32xf32>
    %c0_74 = arith.constant 0 : index
    %c0_75 = arith.constant 0 : index
    %c0_76 = arith.constant 0 : index
    %100 = vector.load %arg7[%c0_74, %c0_75, %c0_76] : memref<1x1x32xf32, #tpu.memory_space<vmem>>, vector<1x1x32xf32>
    %101 = vector.shape_cast %100 : vector<1x1x32xf32> to vector<1x32xf32>
    %102 = vector.broadcast %101 : vector<1x32xf32> to vector<8x32xf32>
    %103 = arith.addf %99, %102 : vector<8x32xf32>
    %104 = arith.addf %4, %103 : vector<8x32xf32>
    %c0_77 = arith.constant 0 : index
    %c0_78 = arith.constant 0 : index
    %c0_79 = arith.constant 0 : index
    %105 = vector.load %arg8[%c0_77, %c0_78, %c0_79] : memref<1x1x32xf32, #tpu.memory_space<vmem>>, vector<1x1x32xf32>
    %106 = vector.shape_cast %105 : vector<1x1x32xf32> to vector<1x32xf32>
    %c0_80 = arith.constant 0 : index
    %c0_81 = arith.constant 0 : index
    %c0_82 = arith.constant 0 : index
    %107 = vector.load %arg9[%c0_80, %c0_81, %c0_82] : memref<1x1x32xf32, #tpu.memory_space<vmem>>, vector<1x1x32xf32>
    %108 = vector.shape_cast %107 : vector<1x1x32xf32> to vector<1x32xf32>
    %cst_83 = arith.constant dense<0.000000e+00> : vector<8xf32>
    %109 = vector.multi_reduction <add>, %104, %cst_83 [1] : vector<8x32xf32> to vector<8xf32>
    %110 = vector.shape_cast %109 : vector<8xf32> to vector<8x1xf32>
    %cst_84 = arith.constant 3.200000e+01 : f32
    %111 = vector.broadcast %cst_84 : f32 to vector<8x1xf32>
    %112 = arith.divf %110, %111 : vector<8x1xf32>
    %113 = vector.broadcast %112 : vector<8x1xf32> to vector<8x32xf32>
    %114 = arith.subf %104, %113 : vector<8x32xf32>
    %115 = arith.mulf %114, %114 : vector<8x32xf32>
    %cst_85 = arith.constant dense<0.000000e+00> : vector<8xf32>
    %116 = vector.multi_reduction <add>, %115, %cst_85 [1] : vector<8x32xf32> to vector<8xf32>
    %117 = vector.shape_cast %116 : vector<8xf32> to vector<8x1xf32>
    %cst_86 = arith.constant 3.200000e+01 : f32
    %118 = vector.broadcast %cst_86 : f32 to vector<8x1xf32>
    %119 = arith.divf %117, %118 : vector<8x1xf32>
    %cst_87 = arith.constant 9.99999974E-6 : f32
    %120 = vector.broadcast %cst_87 : f32 to vector<8x1xf32>
    %121 = arith.addf %119, %120 : vector<8x1xf32>
    %122 = math.rsqrt %121 : vector<8x1xf32>
    %123 = vector.broadcast %122 : vector<8x1xf32> to vector<8x32xf32>
    %124 = arith.mulf %114, %123 : vector<8x32xf32>
    %125 = vector.broadcast %106 : vector<1x32xf32> to vector<8x32xf32>
    %126 = arith.mulf %124, %125 : vector<8x32xf32>
    %127 = vector.broadcast %108 : vector<1x32xf32> to vector<8x32xf32>
    %128 = arith.addf %126, %127 : vector<8x32xf32>
    %129 = arith.truncf %128 : vector<8x32xf32> to vector<8x32xbf16>
    %c0_88 = arith.constant 0 : index
    %c0_89 = arith.constant 0 : index
    %c0_90 = arith.constant 0 : index
    %130 = vector.load %arg10[%c0_88, %c0_89, %c0_90] : memref<1x32x64xbf16, #tpu.memory_space<vmem>>, vector<1x32x64xbf16>
    %131 = vector.shape_cast %130 : vector<1x32x64xbf16> to vector<32x64xbf16>
    %cst_91 = arith.constant dense<0.000000e+00> : vector<8x64xf32>
    %132 = tpu.matmul %129, %131, %cst_91 {dimension_numbers = #tpu.dot_dimension_numbers<[1], [0], [0], [1], [0, 0, 1, 1], [], []>} : vector<8x32xbf16>, vector<32x64xbf16>, vector<8x64xf32> -> vector<8x64xf32>
    %c0_92 = arith.constant 0 : index
    %c0_93 = arith.constant 0 : index
    %c0_94 = arith.constant 0 : index
    %133 = vector.load %arg11[%c0_92, %c0_93, %c0_94] : memref<1x1x64xf32, #tpu.memory_space<vmem>>, vector<1x1x64xf32>
    %134 = vector.shape_cast %133 : vector<1x1x64xf32> to vector<1x64xf32>
    %135 = vector.broadcast %134 : vector<1x64xf32> to vector<8x64xf32>
    %136 = arith.addf %132, %135 : vector<8x64xf32>
    %cst_95 = arith.constant 0.707106769 : f32
    %137 = vector.broadcast %cst_95 : f32 to vector<8x64xf32>
    %138 = arith.mulf %136, %137 : vector<8x64xf32>
    %139 = math.absf %138 : vector<8x64xf32>
    %cst_96 = arith.constant 0.327591091 : f32
    %140 = vector.broadcast %cst_96 : f32 to vector<8x64xf32>
    %141 = arith.mulf %140, %139 : vector<8x64xf32>
    %cst_97 = arith.constant 1.000000e+00 : f32
    %142 = vector.broadcast %cst_97 : f32 to vector<8x64xf32>
    %143 = arith.addf %142, %141 : vector<8x64xf32>
    %cst_98 = arith.constant 1.000000e+00 : f32
    %144 = vector.broadcast %cst_98 : f32 to vector<8x64xf32>
    %145 = arith.divf %144, %143 : vector<8x64xf32>
    %cst_99 = arith.constant 1.06140542 : f32
    %146 = vector.broadcast %cst_99 : f32 to vector<8x64xf32>
    %147 = arith.mulf %146, %145 : vector<8x64xf32>
    %cst_100 = arith.constant 1.45315206 : f32
    %148 = vector.broadcast %cst_100 : f32 to vector<8x64xf32>
    %149 = arith.subf %147, %148 : vector<8x64xf32>
    %150 = arith.mulf %149, %145 : vector<8x64xf32>
    %cst_101 = arith.constant 1.42141378 : f32
    %151 = vector.broadcast %cst_101 : f32 to vector<8x64xf32>
    %152 = arith.addf %150, %151 : vector<8x64xf32>
    %153 = arith.mulf %152, %145 : vector<8x64xf32>
    %cst_102 = arith.constant 0.284496725 : f32
    %154 = vector.broadcast %cst_102 : f32 to vector<8x64xf32>
    %155 = arith.subf %153, %154 : vector<8x64xf32>
    %156 = arith.mulf %155, %145 : vector<8x64xf32>
    %cst_103 = arith.constant 0.254829586 : f32
    %157 = vector.broadcast %cst_103 : f32 to vector<8x64xf32>
    %158 = arith.addf %156, %157 : vector<8x64xf32>
    %159 = arith.mulf %158, %145 : vector<8x64xf32>
    %cst_104 = arith.constant 0.000000e+00 : f32
    %160 = vector.broadcast %cst_104 : f32 to vector<8x64xf32>
    %161 = arith.subf %160, %139 : vector<8x64xf32>
    %162 = arith.mulf %161, %139 : vector<8x64xf32>
    %163 = math.exp %162 : vector<8x64xf32>
    %164 = arith.mulf %159, %163 : vector<8x64xf32>
    %cst_105 = arith.constant 1.000000e+00 : f32
    %165 = vector.broadcast %cst_105 : f32 to vector<8x64xf32>
    %166 = arith.subf %165, %164 : vector<8x64xf32>
    %cst_106 = arith.constant 0.000000e+00 : f32
    %167 = vector.broadcast %cst_106 : f32 to vector<8x64xf32>
    %168 = arith.cmpf oge, %138, %167 : vector<8x64xf32>
    %cst_107 = arith.constant 0.000000e+00 : f32
    %169 = vector.broadcast %cst_107 : f32 to vector<8x64xf32>
    %170 = arith.subf %169, %166 : vector<8x64xf32>
    %171 = arith.select %168, %166, %170 : vector<8x64xi1>, vector<8x64xf32>
    %cst_108 = arith.constant 5.000000e-01 : f32
    %172 = vector.broadcast %cst_108 : f32 to vector<8x64xf32>
    %173 = arith.mulf %136, %172 : vector<8x64xf32>
    %cst_109 = arith.constant 1.000000e+00 : f32
    %174 = vector.broadcast %cst_109 : f32 to vector<8x64xf32>
    %175 = arith.addf %174, %171 : vector<8x64xf32>
    %176 = arith.mulf %173, %175 : vector<8x64xf32>
    %177 = arith.truncf %176 : vector<8x64xf32> to vector<8x64xbf16>
    %c0_110 = arith.constant 0 : index
    %c0_111 = arith.constant 0 : index
    %c0_112 = arith.constant 0 : index
    %178 = vector.load %arg12[%c0_110, %c0_111, %c0_112] : memref<1x64x32xbf16, #tpu.memory_space<vmem>>, vector<1x64x32xbf16>
    %179 = vector.shape_cast %178 : vector<1x64x32xbf16> to vector<64x32xbf16>
    %cst_113 = arith.constant dense<0.000000e+00> : vector<8x32xf32>
    %180 = tpu.matmul %177, %179, %cst_113 {dimension_numbers = #tpu.dot_dimension_numbers<[1], [0], [0], [1], [0, 0, 1, 1], [], []>} : vector<8x64xbf16>, vector<64x32xbf16>, vector<8x32xf32> -> vector<8x32xf32>
    %c0_114 = arith.constant 0 : index
    %c0_115 = arith.constant 0 : index
    %c0_116 = arith.constant 0 : index
    %181 = vector.load %arg13[%c0_114, %c0_115, %c0_116] : memref<1x1x32xf32, #tpu.memory_space<vmem>>, vector<1x1x32xf32>
    %182 = vector.shape_cast %181 : vector<1x1x32xf32> to vector<1x32xf32>
    %183 = vector.broadcast %182 : vector<1x32xf32> to vector<8x32xf32>
    %184 = arith.addf %180, %183 : vector<8x32xf32>
    %185 = arith.addf %128, %184 : vector<8x32xf32>
    %c0_117 = arith.constant 0 : index
    %c0_118 = arith.constant 0 : index
    %c0_119 = arith.constant 0 : index
    %186 = vector.load %arg14[%c0_117, %c0_118, %c0_119] : memref<1x1x32xf32, #tpu.memory_space<vmem>>, vector<1x1x32xf32>
    %187 = vector.shape_cast %186 : vector<1x1x32xf32> to vector<1x32xf32>
    %c0_120 = arith.constant 0 : index
    %c0_121 = arith.constant 0 : index
    %c0_122 = arith.constant 0 : index
    %188 = vector.load %arg15[%c0_120, %c0_121, %c0_122] : memref<1x1x32xf32, #tpu.memory_space<vmem>>, vector<1x1x32xf32>
    %189 = vector.shape_cast %188 : vector<1x1x32xf32> to vector<1x32xf32>
    %cst_123 = arith.constant dense<0.000000e+00> : vector<8xf32>
    %190 = vector.multi_reduction <add>, %185, %cst_123 [1] : vector<8x32xf32> to vector<8xf32>
    %191 = vector.shape_cast %190 : vector<8xf32> to vector<8x1xf32>
    %cst_124 = arith.constant 3.200000e+01 : f32
    %192 = vector.broadcast %cst_124 : f32 to vector<8x1xf32>
    %193 = arith.divf %191, %192 : vector<8x1xf32>
    %194 = vector.broadcast %193 : vector<8x1xf32> to vector<8x32xf32>
    %195 = arith.subf %185, %194 : vector<8x32xf32>
    %196 = arith.mulf %195, %195 : vector<8x32xf32>
    %cst_125 = arith.constant dense<0.000000e+00> : vector<8xf32>
    %197 = vector.multi_reduction <add>, %196, %cst_125 [1] : vector<8x32xf32> to vector<8xf32>
    %198 = vector.shape_cast %197 : vector<8xf32> to vector<8x1xf32>
    %cst_126 = arith.constant 3.200000e+01 : f32
    %199 = vector.broadcast %cst_126 : f32 to vector<8x1xf32>
    %200 = arith.divf %198, %199 : vector<8x1xf32>
    %cst_127 = arith.constant 9.99999974E-6 : f32
    %201 = vector.broadcast %cst_127 : f32 to vector<8x1xf32>
    %202 = arith.addf %200, %201 : vector<8x1xf32>
    %203 = math.rsqrt %202 : vector<8x1xf32>
    %204 = vector.broadcast %203 : vector<8x1xf32> to vector<8x32xf32>
    %205 = arith.mulf %195, %204 : vector<8x32xf32>
    %206 = vector.broadcast %187 : vector<1x32xf32> to vector<8x32xf32>
    %207 = arith.mulf %205, %206 : vector<8x32xf32>
    %208 = vector.broadcast %189 : vector<1x32xf32> to vector<8x32xf32>
    %209 = arith.addf %207, %208 : vector<8x32xf32>
    %c0_128 = arith.constant 0 : index
    %c0_129 = arith.constant 0 : index
    %c0_130 = arith.constant 0 : index
    %210 = vector.load %arg16[%c0_128, %c0_129, %c0_130] : memref<1x8x32xf32, #tpu.memory_space<vmem>>, vector<1x8x32xf32>
    %211 = vector.shape_cast %210 : vector<1x8x32xf32> to vector<8x32xf32>
    %212 = vector.shape_cast %209 : vector<8x32xf32> to vector<1x8x32xf32>
    tpu.vector_store %arg16[%c0_128, %c0_129, %c0_130], %212 {strides = array<i32>} : memref<1x8x32xf32, #tpu.memory_space<vmem>>, vector<1x8x32xf32>,
    return
  }
  func.func @transform_0(%arg0: i32, %arg1: i32) -> (i32, i32, i32) {
    %c0_i32 = arith.constant 0 : i32
    %c0_i32_0 = arith.constant 0 : i32
    %c0_i32_1 = arith.constant 0 : i32
    return %arg0, %c0_i32, %c0_i32_0 : i32, i32, i32
  }
  func.func @transform_1(%arg0: i32, %arg1: i32) -> (i32, i32, i32) {
    %c0_i32 = arith.constant 0 : i32
    %c0_i32_0 = arith.constant 0 : i32
    %c0_i32_1 = arith.constant 0 : i32
    return %arg0, %c0_i32, %c0_i32_0 : i32, i32, i32
  }
  func.func @transform_2(%arg0: i32, %arg1: i32) -> (i32, i32, i32, i32) {
    %c0_i32 = arith.constant 0 : i32
    %c0_i32_0 = arith.constant 0 : i32
    %c0_i32_1 = arith.constant 0 : i32
    %c0_i32_2 = arith.constant 0 : i32
    return %arg1, %c0_i32, %c0_i32_0, %c0_i32_1 : i32, i32, i32, i32
  }
  func.func @transform_3(%arg0: i32, %arg1: i32) -> (i32, i32, i32, i32) {
    %c0_i32 = arith.constant 0 : i32
    %c0_i32_0 = arith.constant 0 : i32
    %c0_i32_1 = arith.constant 0 : i32
    %c0_i32_2 = arith.constant 0 : i32
    return %arg1, %c0_i32, %c0_i32_0, %c0_i32_1 : i32, i32, i32, i32
  }
  func.func @transform_4(%arg0: i32, %arg1: i32) -> (i32, i32, i32, i32) {
    %c0_i32 = arith.constant 0 : i32
    %c0_i32_0 = arith.constant 0 : i32
    %c0_i32_1 = arith.constant 0 : i32
    %c0_i32_2 = arith.constant 0 : i32
    return %arg1, %c0_i32, %c0_i32_0, %c0_i32_1 : i32, i32, i32, i32
  }
  func.func @transform_5(%arg0: i32, %arg1: i32) -> (i32, i32, i32) {
    %c0_i32 = arith.constant 0 : i32
    %c0_i32_0 = arith.constant 0 : i32
    %c0_i32_1 = arith.constant 0 : i32
    return %arg1, %c0_i32, %c0_i32_0 : i32, i32, i32
  }
  func.func @transform_6(%arg0: i32, %arg1: i32) -> (i32, i32, i32) {
    %c0_i32 = arith.constant 0 : i32
    %c0_i32_0 = arith.constant 0 : i32
    %c0_i32_1 = arith.constant 0 : i32
    return %arg1, %c0_i32, %c0_i32_0 : i32, i32, i32
  }
  func.func @transform_7(%arg0: i32, %arg1: i32) -> (i32, i32, i32) {
    %c0_i32 = arith.constant 0 : i32
    %c0_i32_0 = arith.constant 0 : i32
    %c0_i32_1 = arith.constant 0 : i32
    return %arg1, %c0_i32, %c0_i32_0 : i32, i32, i32
  }
  func.func @transform_8(%arg0: i32, %arg1: i32) -> (i32, i32, i32) {
    %c0_i32 = arith.constant 0 : i32
    %c0_i32_0 = arith.constant 0 : i32
    %c0_i32_1 = arith.constant 0 : i32
    return %arg1, %c0_i32, %c0_i32_0 : i32, i32, i32
  }
  func.func @transform_9(%arg0: i32, %arg1: i32) -> (i32, i32, i32) {
    %c0_i32 = arith.constant 0 : i32
    %c0_i32_0 = arith.constant 0 : i32
    %c0_i32_1 = arith.constant 0 : i32
    return %arg1, %c0_i32, %c0_i32_0 : i32, i32, i32
  }
  func.func @transform_10(%arg0: i32, %arg1: i32) -> (i32, i32, i32) {
    %c0_i32 = arith.constant 0 : i32
    %c0_i32_0 = arith.constant 0 : i32
    %c0_i32_1 = arith.constant 0 : i32
    return %arg1, %c0_i32, %c0_i32_0 : i32, i32, i32
  }
  func.func @transform_11(%arg0: i32, %arg1: i32) -> (i32, i32, i32) {
    %c0_i32 = arith.constant 0 : i32
    %c0_i32_0 = arith.constant 0 : i32
    %c0_i32_1 = arith.constant 0 : i32
    return %arg1, %c0_i32, %c0_i32_0 : i32, i32, i32
  }
  func.func @transform_12(%arg0: i32, %arg1: i32) -> (i32, i32, i32) {
    %c0_i32 = arith.constant 0 : i32
    %c0_i32_0 = arith.constant 0 : i32
    %c0_i32_1 = arith.constant 0 : i32
    return %arg1, %c0_i32, %c0_i32_0 : i32, i32, i32
  }
  func.func @transform_13(%arg0: i32, %arg1: i32) -> (i32, i32, i32) {
    %c0_i32 = arith.constant 0 : i32
    %c0_i32_0 = arith.constant 0 : i32
    %c0_i32_1 = arith.constant 0 : i32
    return %arg1, %c0_i32, %c0_i32_0 : i32, i32, i32
  }
  func.func @transform_14(%arg0: i32, %arg1: i32) -> (i32, i32, i32) {
    %c0_i32 = arith.constant 0 : i32
    %c0_i32_0 = arith.constant 0 : i32
    %c0_i32_1 = arith.constant 0 : i32
    return %arg0, %c0_i32, %c0_i32_0 : i32, i32, i32
  }
}

module attributes {stable_mosaic.version = 11 : i64} {
  func.func @_generator_ce_kernel(%arg0: memref<16x32xf32, #tpu.memory_space<vmem>>, %arg1: memref<32x32xbf16, #tpu.memory_space<vmem>>, %arg2: memref<1x32xf32, #tpu.memory_space<vmem>>, %arg3: memref<16x1xi32, #tpu.memory_space<vmem>>, %arg4: memref<16x32xf32, #tpu.memory_space<vmem>>, %arg5: memref<16x1xf32, #tpu.memory_space<vmem>>) attributes {dimension_semantics = [], scalar_prefetch = 0 : i64, scratch_operands = 0 : i64, tpu.core_type = #tpu.core_type<tc>} {
    %c0 = arith.constant 0 : index
    %c0_0 = arith.constant 0 : index
    %0 = vector.load %arg0[%c0, %c0_0] : memref<16x32xf32, #tpu.memory_space<vmem>>, vector<16x32xf32>
    %1 = arith.truncf %0 : vector<16x32xf32> to vector<16x32xbf16>
    %c0_1 = arith.constant 0 : index
    %c0_2 = arith.constant 0 : index
    %2 = vector.load %arg1[%c0_1, %c0_2] : memref<32x32xbf16, #tpu.memory_space<vmem>>, vector<32x32xbf16>
    %cst = arith.constant dense<0.000000e+00> : vector<16x32xf32>
    %3 = tpu.matmul %1, %2, %cst {dimension_numbers = #tpu.dot_dimension_numbers<[1], [0], [0], [1], [0, 0, 1, 1], [], []>} : vector<16x32xbf16>, vector<32x32xbf16>, vector<16x32xf32> -> vector<16x32xf32>
    %c0_3 = arith.constant 0 : index
    %c0_4 = arith.constant 0 : index
    %4 = vector.load %arg2[%c0_3, %c0_4] : memref<1x32xf32, #tpu.memory_space<vmem>>, vector<1x32xf32>
    %5 = vector.broadcast %4 : vector<1x32xf32> to vector<16x32xf32>
    %6 = arith.addf %3, %5 : vector<16x32xf32>
    %c0_5 = arith.constant 0 : index
    %c0_6 = arith.constant 0 : index
    %7 = vector.load %arg4[%c0_5, %c0_6] : memref<16x32xf32, #tpu.memory_space<vmem>>, vector<16x32xf32>
    tpu.vector_store %arg4[%c0_5, %c0_6], %6 {strides = array<i32>} : memref<16x32xf32, #tpu.memory_space<vmem>>, vector<16x32xf32>,
    %cst_7 = arith.constant dense<0xFF800000> : vector<16xf32>
    %8 = vector.multi_reduction <maximumf>, %6, %cst_7 [1] : vector<16x32xf32> to vector<16xf32>
    %9 = vector.shape_cast %8 : vector<16xf32> to vector<16x1xf32>
    %10 = vector.broadcast %9 : vector<16x1xf32> to vector<16x32xf32>
    %11 = arith.subf %6, %10 : vector<16x32xf32>
    %12 = math.exp %11 : vector<16x32xf32>
    %cst_8 = arith.constant dense<0.000000e+00> : vector<16xf32>
    %13 = vector.multi_reduction <add>, %12, %cst_8 [1] : vector<16x32xf32> to vector<16xf32>
    %14 = vector.shape_cast %13 : vector<16xf32> to vector<16x1xf32>
    %15 = math.log %14 : vector<16x1xf32>
    %16 = arith.addf %15, %9 : vector<16x1xf32>
    %17 = tpu.iota {dimensions = array<i32: 1>} : vector<16x32xi32>
    %c0_9 = arith.constant 0 : index
    %c0_10 = arith.constant 0 : index
    %18 = vector.load %arg3[%c0_9, %c0_10] : memref<16x1xi32, #tpu.memory_space<vmem>>, vector<16x1xi32>
    %19 = vector.broadcast %18 : vector<16x1xi32> to vector<16x32xi32>
    %20 = arith.cmpi eq, %17, %19 : vector<16x32xi32>
    %cst_11 = arith.constant 0.000000e+00 : f32
    %21 = vector.broadcast %cst_11 : f32 to vector<16x32xf32>
    %22 = arith.select %20, %6, %21 : vector<16x32xi1>, vector<16x32xf32>
    %cst_12 = arith.constant dense<0.000000e+00> : vector<16xf32>
    %23 = vector.multi_reduction <add>, %22, %cst_12 [1] : vector<16x32xf32> to vector<16xf32>
    %24 = vector.shape_cast %23 : vector<16xf32> to vector<16x1xf32>
    %25 = arith.subf %16, %24 : vector<16x1xf32>
    %c0_13 = arith.constant 0 : index
    %c0_14 = arith.constant 0 : index
    %26 = vector.load %arg5[%c0_13, %c0_14] : memref<16x1xf32, #tpu.memory_space<vmem>>, vector<16x1xf32>
    tpu.vector_store %arg5[%c0_13, %c0_14], %25 {strides = array<i32>} : memref<16x1xf32, #tpu.memory_space<vmem>>, vector<16x1xf32>,
    return
  }
}

module attributes {stable_mosaic.version = 11 : i64} {
  func.func @_decoder_stack_kernel(%arg0: i32, %arg1: i32, %arg2: memref<1x8x32xf32, #tpu.memory_space<vmem>>, %arg3: memref<1x8x32xf32, #tpu.memory_space<vmem>>, %arg4: memref<1x1x8xf32, #tpu.memory_space<vmem>>, %arg5: memref<1x6x32x16xbf16, #tpu.memory_space<vmem>>, %arg6: memref<1x6x1x16xf32, #tpu.memory_space<vmem>>, %arg7: memref<1x2x16x32xbf16, #tpu.memory_space<vmem>>, %arg8: memref<1x1x32xf32, #tpu.memory_space<vmem>>, %arg9: memref<1x1x32xf32, #tpu.memory_space<vmem>>, %arg10: memref<1x1x32xf32, #tpu.memory_space<vmem>>, %arg11: memref<1x6x32x16xbf16, #tpu.memory_space<vmem>>, %arg12: memref<1x6x1x16xf32, #tpu.memory_space<vmem>>, %arg13: memref<1x2x16x32xbf16, #tpu.memory_space<vmem>>, %arg14: memref<1x1x32xf32, #tpu.memory_space<vmem>>, %arg15: memref<1x1x32xf32, #tpu.memory_space<vmem>>, %arg16: memref<1x1x32xf32, #tpu.memory_space<vmem>>, %arg17: memref<1x32x64xbf16, #tpu.memory_space<vmem>>, %arg18: memref<1x1x64xf32, #tpu.memory_space<vmem>>, %arg19: memref<1x64x32xbf16, #tpu.memory_space<vmem>>, %arg20: memref<1x1x32xf32, #tpu.memory_space<vmem>>, %arg21: memref<1x1x32xf32, #tpu.memory_space<vmem>>, %arg22: memref<1x1x32xf32, #tpu.memory_space<vmem>>, %arg23: memref<1x8x32xf32, #tpu.memory_space<vmem>>) attributes {dimension_semantics = [#tpu.dimension_semantics<parallel>, #tpu.dimension_semantics<arbitrary>], iteration_bounds = array<i64: 2, 2>, scalar_prefetch = 0 : i64, scratch_operands = 0 : i64, tpu.core_type = #tpu.core_type<tc>, window_params = [{transform_indices = @transform_0, window_bounds = array<i64: 1, 8, 32>}, {transform_indices = @transform_1, window_bounds = array<i64: 1, 8, 32>}, {transform_indices = @transform_2, window_bounds = array<i64: 1, 1, 8>}, {transform_indices = @transform_3, window_bounds = array<i64: 1, 6, 32, 16>}, {transform_indices = @transform_4, window_bounds = array<i64: 1, 6, 1, 16>}, {transform_indices = @transform_5, window_bounds = array<i64: 1, 2, 16, 32>}, {transform_indices = @transform_6, window_bounds = array<i64: 1, 1, 32>}, {transform_indices = @transform_7, window_bounds = array<i64: 1, 1, 32>}, {transform_indices = @transform_8, window_bounds = array<i64: 1, 1, 32>}, {transform_indices = @transform_9, window_bounds = array<i64: 1, 6, 32, 16>}, {transform_indices = @transform_10, window_bounds = array<i64: 1, 6, 1, 16>}, {transform_indices = @transform_11, window_bounds = array<i64: 1, 2, 16, 32>}, {transform_indices = @transform_12, window_bounds = array<i64: 1, 1, 32>}, {transform_indices = @transform_13, window_bounds = array<i64: 1, 1, 32>}, {transform_indices = @transform_14, window_bounds = array<i64: 1, 1, 32>}, {transform_indices = @transform_15, window_bounds = array<i64: 1, 32, 64>}, {transform_indices = @transform_16, window_bounds = array<i64: 1, 1, 64>}, {transform_indices = @transform_17, window_bounds = array<i64: 1, 64, 32>}, {transform_indices = @transform_18, window_bounds = array<i64: 1, 1, 32>}, {transform_indices = @transform_19, window_bounds = array<i64: 1, 1, 32>}, {transform_indices = @transform_20, window_bounds = array<i64: 1, 1, 32>}, {transform_indices = @transform_21, window_bounds = array<i64: 1, 8, 32>}]} {
    %c0_i32 = arith.constant 0 : i32
    %0 = arith.cmpi eq, %arg1, %c0_i32 : i32
    %1 = arith.extui %0 : i1 to i32
    %c0_i32_0 = arith.constant 0 : i32
    %2 = arith.cmpi ne, %1, %c0_i32_0 : i32
    scf.if %2 {
      %c0_210 = arith.constant 0 : index
      %c0_211 = arith.constant 0 : index
      %c0_212 = arith.constant 0 : index
      %303 = vector.load %arg2[%c0_210, %c0_211, %c0_212] : memref<1x8x32xf32, #tpu.memory_space<vmem>>, vector<1x8x32xf32>
      %304 = vector.shape_cast %303 : vector<1x8x32xf32> to vector<8x32xf32>
      %c0_213 = arith.constant 0 : index
      %c0_214 = arith.constant 0 : index
      %c0_215 = arith.constant 0 : index
      %305 = vector.load %arg23[%c0_213, %c0_214, %c0_215] : memref<1x8x32xf32, #tpu.memory_space<vmem>>, vector<1x8x32xf32>
      %306 = vector.shape_cast %305 : vector<1x8x32xf32> to vector<8x32xf32>
      %307 = vector.shape_cast %304 : vector<8x32xf32> to vector<1x8x32xf32>
      tpu.vector_store %arg23[%c0_213, %c0_214, %c0_215], %307 {strides = array<i32>} : memref<1x8x32xf32, #tpu.memory_space<vmem>>, vector<1x8x32xf32>,
    } else {
    }
    %c0 = arith.constant 0 : index
    %c0_1 = arith.constant 0 : index
    %c0_2 = arith.constant 0 : index
    %3 = vector.load %arg23[%c0, %c0_1, %c0_2] : memref<1x8x32xf32, #tpu.memory_space<vmem>>, vector<1x8x32xf32>
    %4 = vector.shape_cast %3 : vector<1x8x32xf32> to vector<8x32xf32>
    %c0_3 = arith.constant 0 : index
    %c0_4 = arith.constant 0 : index
    %c0_5 = arith.constant 0 : index
    %5 = vector.load %arg3[%c0_3, %c0_4, %c0_5] : memref<1x8x32xf32, #tpu.memory_space<vmem>>, vector<1x8x32xf32>
    %6 = vector.shape_cast %5 : vector<1x8x32xf32> to vector<8x32xf32>
    %7 = tpu.iota {dimensions = array<i32: 0>} : vector<8x8xi32>
    %8 = tpu.iota {dimensions = array<i32: 1>} : vector<8x8xi32>
    %9 = arith.cmpi sgt, %8, %7 : vector<8x8xi32>
    %cst = arith.constant -1.000000e+30 : f32
    %cst_6 = arith.constant 0.000000e+00 : f32
    %10 = vector.broadcast %cst : f32 to vector<8x8xf32>
    %11 = vector.broadcast %cst_6 : f32 to vector<8x8xf32>
    %12 = arith.select %9, %10, %11 : vector<8x8xi1>, vector<8x8xf32>
    %13 = arith.truncf %4 : vector<8x32xf32> to vector<8x32xbf16>
    %14 = arith.truncf %4 : vector<8x32xf32> to vector<8x32xbf16>
    %c0_7 = arith.constant 0 : index
    %c0_8 = arith.constant 0 : index
    %c0_9 = arith.constant 0 : index
    %c0_10 = arith.constant 0 : index
    %15 = vector.load %arg5[%c0_7, %c0_8, %c0_9, %c0_10] : memref<1x6x32x16xbf16, #tpu.memory_space<vmem>>, vector<1x1x32x16xbf16>
    %16 = vector.shape_cast %15 : vector<1x1x32x16xbf16> to vector<32x16xbf16>
    %cst_11 = arith.constant dense<0.000000e+00> : vector<8x16xf32>
    %17 = tpu.matmul %13, %16, %cst_11 {dimension_numbers = #tpu.dot_dimension_numbers<[1], [0], [0], [1], [0, 0, 1, 1], [], []>} : vector<8x32xbf16>, vector<32x16xbf16>, vector<8x16xf32> -> vector<8x16xf32>
    %c0_12 = arith.constant 0 : index
    %c0_13 = arith.constant 0 : index
    %c0_14 = arith.constant 0 : index
    %c0_15 = arith.constant 0 : index
    %18 = vector.load %arg6[%c0_12, %c0_13, %c0_14, %c0_15] : memref<1x6x1x16xf32, #tpu.memory_space<vmem>>, vector<1x1x1x16xf32>
    %19 = vector.shape_cast %18 : vector<1x1x1x16xf32> to vector<1x16xf32>
    %20 = vector.broadcast %19 : vector<1x16xf32> to vector<8x16xf32>
    %21 = arith.addf %17, %20 : vector<8x16xf32>
    %c0_16 = arith.constant 0 : index
    %c2 = arith.constant 2 : index
    %c0_17 = arith.constant 0 : index
    %c0_18 = arith.constant 0 : index
    %22 = vector.load %arg5[%c0_16, %c2, %c0_17, %c0_18] : memref<1x6x32x16xbf16, #tpu.memory_space<vmem>>, vector<1x1x32x16xbf16>
    %23 = vector.shape_cast %22 : vector<1x1x32x16xbf16> to vector<32x16xbf16>
    %cst_19 = arith.constant dense<0.000000e+00> : vector<8x16xf32>
    %24 = tpu.matmul %14, %23, %cst_19 {dimension_numbers = #tpu.dot_dimension_numbers<[1], [0], [0], [1], [0, 0, 1, 1], [], []>} : vector<8x32xbf16>, vector<32x16xbf16>, vector<8x16xf32> -> vector<8x16xf32>
    %c0_20 = arith.constant 0 : index
    %c2_21 = arith.constant 2 : index
    %c0_22 = arith.constant 0 : index
    %c0_23 = arith.constant 0 : index
    %25 = vector.load %arg6[%c0_20, %c2_21, %c0_22, %c0_23] : memref<1x6x1x16xf32, #tpu.memory_space<vmem>>, vector<1x1x1x16xf32>
    %26 = vector.shape_cast %25 : vector<1x1x1x16xf32> to vector<1x16xf32>
    %27 = vector.broadcast %26 : vector<1x16xf32> to vector<8x16xf32>
    %28 = arith.addf %24, %27 : vector<8x16xf32>
    %c0_24 = arith.constant 0 : index
    %c4 = arith.constant 4 : index
    %c0_25 = arith.constant 0 : index
    %c0_26 = arith.constant 0 : index
    %29 = vector.load %arg5[%c0_24, %c4, %c0_25, %c0_26] : memref<1x6x32x16xbf16, #tpu.memory_space<vmem>>, vector<1x1x32x16xbf16>
    %30 = vector.shape_cast %29 : vector<1x1x32x16xbf16> to vector<32x16xbf16>
    %cst_27 = arith.constant dense<0.000000e+00> : vector<8x16xf32>
    %31 = tpu.matmul %14, %30, %cst_27 {dimension_numbers = #tpu.dot_dimension_numbers<[1], [0], [0], [1], [0, 0, 1, 1], [], []>} : vector<8x32xbf16>, vector<32x16xbf16>, vector<8x16xf32> -> vector<8x16xf32>
    %c0_28 = arith.constant 0 : index
    %c4_29 = arith.constant 4 : index
    %c0_30 = arith.constant 0 : index
    %c0_31 = arith.constant 0 : index
    %32 = vector.load %arg6[%c0_28, %c4_29, %c0_30, %c0_31] : memref<1x6x1x16xf32, #tpu.memory_space<vmem>>, vector<1x1x1x16xf32>
    %33 = vector.shape_cast %32 : vector<1x1x1x16xf32> to vector<1x16xf32>
    %34 = vector.broadcast %33 : vector<1x16xf32> to vector<8x16xf32>
    %35 = arith.addf %31, %34 : vector<8x16xf32>
    %cst_32 = arith.constant 2.500000e-01 : f32
    %36 = vector.broadcast %cst_32 : f32 to vector<8x16xf32>
    %37 = arith.mulf %21, %36 : vector<8x16xf32>
    %38 = arith.truncf %37 : vector<8x16xf32> to vector<8x16xbf16>
    %39 = arith.truncf %28 : vector<8x16xf32> to vector<8x16xbf16>
    %cst_33 = arith.constant dense<0.000000e+00> : vector<8x8xf32>
    %40 = tpu.matmul %38, %39, %cst_33 {dimension_numbers = #tpu.dot_dimension_numbers<[1], [1], [0], [0], [0, 0, 1, 0], [], []>} : vector<8x16xbf16>, vector<8x16xbf16>, vector<8x8xf32> -> vector<8x8xf32>
    %41 = arith.addf %40, %12 : vector<8x8xf32>
    %cst_34 = arith.constant dense<0xFF800000> : vector<8xf32>
    %42 = vector.multi_reduction <maximumf>, %41, %cst_34 [1] : vector<8x8xf32> to vector<8xf32>
    %43 = vector.shape_cast %42 : vector<8xf32> to vector<8x1xf32>
    %44 = vector.broadcast %43 : vector<8x1xf32> to vector<8x8xf32>
    %45 = arith.subf %41, %44 : vector<8x8xf32>
    %46 = math.exp %45 : vector<8x8xf32>
    %cst_35 = arith.constant dense<0.000000e+00> : vector<8xf32>
    %47 = vector.multi_reduction <add>, %46, %cst_35 [1] : vector<8x8xf32> to vector<8xf32>
    %48 = vector.shape_cast %47 : vector<8xf32> to vector<8x1xf32>
    %49 = tpu.reciprocal %48 {approx = true} : vector<8x1xf32> -> vector<8x1xf32>
    %50 = vector.broadcast %49 : vector<8x1xf32> to vector<8x8xf32>
    %51 = arith.mulf %46, %50 : vector<8x8xf32>
    %52 = arith.truncf %51 : vector<8x8xf32> to vector<8x8xbf16>
    %53 = arith.truncf %35 : vector<8x16xf32> to vector<8x16xbf16>
    %cst_36 = arith.constant dense<0.000000e+00> : vector<8x16xf32>
    %54 = tpu.matmul %52, %53, %cst_36 {dimension_numbers = #tpu.dot_dimension_numbers<[1], [0], [0], [1], [0, 0, 1, 1], [], []>} : vector<8x8xbf16>, vector<8x16xbf16>, vector<8x16xf32> -> vector<8x16xf32>
    %55 = arith.truncf %54 : vector<8x16xf32> to vector<8x16xbf16>
    %c0_37 = arith.constant 0 : index
    %c0_38 = arith.constant 0 : index
    %c0_39 = arith.constant 0 : index
    %c0_40 = arith.constant 0 : index
    %56 = vector.load %arg7[%c0_37, %c0_38, %c0_39, %c0_40] : memref<1x2x16x32xbf16, #tpu.memory_space<vmem>>, vector<1x1x16x32xbf16>
    %57 = vector.shape_cast %56 : vector<1x1x16x32xbf16> to vector<16x32xbf16>
    %cst_41 = arith.constant dense<0.000000e+00> : vector<8x32xf32>
    %58 = tpu.matmul %55, %57, %cst_41 {dimension_numbers = #tpu.dot_dimension_numbers<[1], [0], [0], [1], [0, 0, 1, 1], [], []>} : vector<8x16xbf16>, vector<16x32xbf16>, vector<8x32xf32> -> vector<8x32xf32>
    %c0_42 = arith.constant 0 : index
    %c1 = arith.constant 1 : index
    %c0_43 = arith.constant 0 : index
    %c0_44 = arith.constant 0 : index
    %59 = vector.load %arg5[%c0_42, %c1, %c0_43, %c0_44] : memref<1x6x32x16xbf16, #tpu.memory_space<vmem>>, vector<1x1x32x16xbf16>
    %60 = vector.shape_cast %59 : vector<1x1x32x16xbf16> to vector<32x16xbf16>
    %cst_45 = arith.constant dense<0.000000e+00> : vector<8x16xf32>
    %61 = tpu.matmul %13, %60, %cst_45 {dimension_numbers = #tpu.dot_dimension_numbers<[1], [0], [0], [1], [0, 0, 1, 1], [], []>} : vector<8x32xbf16>, vector<32x16xbf16>, vector<8x16xf32> -> vector<8x16xf32>
    %c0_46 = arith.constant 0 : index
    %c1_47 = arith.constant 1 : index
    %c0_48 = arith.constant 0 : index
    %c0_49 = arith.constant 0 : index
    %62 = vector.load %arg6[%c0_46, %c1_47, %c0_48, %c0_49] : memref<1x6x1x16xf32, #tpu.memory_space<vmem>>, vector<1x1x1x16xf32>
    %63 = vector.shape_cast %62 : vector<1x1x1x16xf32> to vector<1x16xf32>
    %64 = vector.broadcast %63 : vector<1x16xf32> to vector<8x16xf32>
    %65 = arith.addf %61, %64 : vector<8x16xf32>
    %c0_50 = arith.constant 0 : index
    %c3 = arith.constant 3 : index
    %c0_51 = arith.constant 0 : index
    %c0_52 = arith.constant 0 : index
    %66 = vector.load %arg5[%c0_50, %c3, %c0_51, %c0_52] : memref<1x6x32x16xbf16, #tpu.memory_space<vmem>>, vector<1x1x32x16xbf16>
    %67 = vector.shape_cast %66 : vector<1x1x32x16xbf16> to vector<32x16xbf16>
    %cst_53 = arith.constant dense<0.000000e+00> : vector<8x16xf32>
    %68 = tpu.matmul %14, %67, %cst_53 {dimension_numbers = #tpu.dot_dimension_numbers<[1], [0], [0], [1], [0, 0, 1, 1], [], []>} : vector<8x32xbf16>, vector<32x16xbf16>, vector<8x16xf32> -> vector<8x16xf32>
    %c0_54 = arith.constant 0 : index
    %c3_55 = arith.constant 3 : index
    %c0_56 = arith.constant 0 : index
    %c0_57 = arith.constant 0 : index
    %69 = vector.load %arg6[%c0_54, %c3_55, %c0_56, %c0_57] : memref<1x6x1x16xf32, #tpu.memory_space<vmem>>, vector<1x1x1x16xf32>
    %70 = vector.shape_cast %69 : vector<1x1x1x16xf32> to vector<1x16xf32>
    %71 = vector.broadcast %70 : vector<1x16xf32> to vector<8x16xf32>
    %72 = arith.addf %68, %71 : vector<8x16xf32>
    %c0_58 = arith.constant 0 : index
    %c5 = arith.constant 5 : index
    %c0_59 = arith.constant 0 : index
    %c0_60 = arith.constant 0 : index
    %73 = vector.load %arg5[%c0_58, %c5, %c0_59, %c0_60] : memref<1x6x32x16xbf16, #tpu.memory_space<vmem>>, vector<1x1x32x16xbf16>
    %74 = vector.shape_cast %73 : vector<1x1x32x16xbf16> to vector<32x16xbf16>
    %cst_61 = arith.constant dense<0.000000e+00> : vector<8x16xf32>
    %75 = tpu.matmul %14, %74, %cst_61 {dimension_numbers = #tpu.dot_dimension_numbers<[1], [0], [0], [1], [0, 0, 1, 1], [], []>} : vector<8x32xbf16>, vector<32x16xbf16>, vector<8x16xf32> -> vector<8x16xf32>
    %c0_62 = arith.constant 0 : index
    %c5_63 = arith.constant 5 : index
    %c0_64 = arith.constant 0 : index
    %c0_65 = arith.constant 0 : index
    %76 = vector.load %arg6[%c0_62, %c5_63, %c0_64, %c0_65] : memref<1x6x1x16xf32, #tpu.memory_space<vmem>>, vector<1x1x1x16xf32>
    %77 = vector.shape_cast %76 : vector<1x1x1x16xf32> to vector<1x16xf32>
    %78 = vector.broadcast %77 : vector<1x16xf32> to vector<8x16xf32>
    %79 = arith.addf %75, %78 : vector<8x16xf32>
    %cst_66 = arith.constant 2.500000e-01 : f32
    %80 = vector.broadcast %cst_66 : f32 to vector<8x16xf32>
    %81 = arith.mulf %65, %80 : vector<8x16xf32>
    %82 = arith.truncf %81 : vector<8x16xf32> to vector<8x16xbf16>
    %83 = arith.truncf %72 : vector<8x16xf32> to vector<8x16xbf16>
    %cst_67 = arith.constant dense<0.000000e+00> : vector<8x8xf32>
    %84 = tpu.matmul %82, %83, %cst_67 {dimension_numbers = #tpu.dot_dimension_numbers<[1], [1], [0], [0], [0, 0, 1, 0], [], []>} : vector<8x16xbf16>, vector<8x16xbf16>, vector<8x8xf32> -> vector<8x8xf32>
    %85 = arith.addf %84, %12 : vector<8x8xf32>
    %cst_68 = arith.constant dense<0xFF800000> : vector<8xf32>
    %86 = vector.multi_reduction <maximumf>, %85, %cst_68 [1] : vector<8x8xf32> to vector<8xf32>
    %87 = vector.shape_cast %86 : vector<8xf32> to vector<8x1xf32>
    %88 = vector.broadcast %87 : vector<8x1xf32> to vector<8x8xf32>
    %89 = arith.subf %85, %88 : vector<8x8xf32>
    %90 = math.exp %89 : vector<8x8xf32>
    %cst_69 = arith.constant dense<0.000000e+00> : vector<8xf32>
    %91 = vector.multi_reduction <add>, %90, %cst_69 [1] : vector<8x8xf32> to vector<8xf32>
    %92 = vector.shape_cast %91 : vector<8xf32> to vector<8x1xf32>
    %93 = tpu.reciprocal %92 {approx = true} : vector<8x1xf32> -> vector<8x1xf32>
    %94 = vector.broadcast %93 : vector<8x1xf32> to vector<8x8xf32>
    %95 = arith.mulf %90, %94 : vector<8x8xf32>
    %96 = arith.truncf %95 : vector<8x8xf32> to vector<8x8xbf16>
    %97 = arith.truncf %79 : vector<8x16xf32> to vector<8x16xbf16>
    %cst_70 = arith.constant dense<0.000000e+00> : vector<8x16xf32>
    %98 = tpu.matmul %96, %97, %cst_70 {dimension_numbers = #tpu.dot_dimension_numbers<[1], [0], [0], [1], [0, 0, 1, 1], [], []>} : vector<8x8xbf16>, vector<8x16xbf16>, vector<8x16xf32> -> vector<8x16xf32>
    %99 = arith.truncf %98 : vector<8x16xf32> to vector<8x16xbf16>
    %c0_71 = arith.constant 0 : index
    %c1_72 = arith.constant 1 : index
    %c0_73 = arith.constant 0 : index
    %c0_74 = arith.constant 0 : index
    %100 = vector.load %arg7[%c0_71, %c1_72, %c0_73, %c0_74] : memref<1x2x16x32xbf16, #tpu.memory_space<vmem>>, vector<1x1x16x32xbf16>
    %101 = vector.shape_cast %100 : vector<1x1x16x32xbf16> to vector<16x32xbf16>
    %cst_75 = arith.constant dense<0.000000e+00> : vector<8x32xf32>
    %102 = tpu.matmul %99, %101, %cst_75 {dimension_numbers = #tpu.dot_dimension_numbers<[1], [0], [0], [1], [0, 0, 1, 1], [], []>} : vector<8x16xbf16>, vector<16x32xbf16>, vector<8x32xf32> -> vector<8x32xf32>
    %103 = arith.addf %58, %102 : vector<8x32xf32>
    %c0_76 = arith.constant 0 : index
    %c0_77 = arith.constant 0 : index
    %c0_78 = arith.constant 0 : index
    %104 = vector.load %arg8[%c0_76, %c0_77, %c0_78] : memref<1x1x32xf32, #tpu.memory_space<vmem>>, vector<1x1x32xf32>
    %105 = vector.shape_cast %104 : vector<1x1x32xf32> to vector<1x32xf32>
    %106 = vector.broadcast %105 : vector<1x32xf32> to vector<8x32xf32>
    %107 = arith.addf %103, %106 : vector<8x32xf32>
    %108 = arith.addf %4, %107 : vector<8x32xf32>
    %c0_79 = arith.constant 0 : index
    %c0_80 = arith.constant 0 : index
    %c0_81 = arith.constant 0 : index
    %109 = vector.load %arg9[%c0_79, %c0_80, %c0_81] : memref<1x1x32xf32, #tpu.memory_space<vmem>>, vector<1x1x32xf32>
    %110 = vector.shape_cast %109 : vector<1x1x32xf32> to vector<1x32xf32>
    %c0_82 = arith.constant 0 : index
    %c0_83 = arith.constant 0 : index
    %c0_84 = arith.constant 0 : index
    %111 = vector.load %arg10[%c0_82, %c0_83, %c0_84] : memref<1x1x32xf32, #tpu.memory_space<vmem>>, vector<1x1x32xf32>
    %112 = vector.shape_cast %111 : vector<1x1x32xf32> to vector<1x32xf32>
    %cst_85 = arith.constant dense<0.000000e+00> : vector<8xf32>
    %113 = vector.multi_reduction <add>, %108, %cst_85 [1] : vector<8x32xf32> to vector<8xf32>
    %114 = vector.shape_cast %113 : vector<8xf32> to vector<8x1xf32>
    %cst_86 = arith.constant 3.200000e+01 : f32
    %115 = vector.broadcast %cst_86 : f32 to vector<8x1xf32>
    %116 = arith.divf %114, %115 : vector<8x1xf32>
    %117 = vector.broadcast %116 : vector<8x1xf32> to vector<8x32xf32>
    %118 = arith.subf %108, %117 : vector<8x32xf32>
    %119 = arith.mulf %118, %118 : vector<8x32xf32>
    %cst_87 = arith.constant dense<0.000000e+00> : vector<8xf32>
    %120 = vector.multi_reduction <add>, %119, %cst_87 [1] : vector<8x32xf32> to vector<8xf32>
    %121 = vector.shape_cast %120 : vector<8xf32> to vector<8x1xf32>
    %cst_88 = arith.constant 3.200000e+01 : f32
    %122 = vector.broadcast %cst_88 : f32 to vector<8x1xf32>
    %123 = arith.divf %121, %122 : vector<8x1xf32>
    %cst_89 = arith.constant 9.99999974E-6 : f32
    %124 = vector.broadcast %cst_89 : f32 to vector<8x1xf32>
    %125 = arith.addf %123, %124 : vector<8x1xf32>
    %126 = math.rsqrt %125 : vector<8x1xf32>
    %127 = vector.broadcast %126 : vector<8x1xf32> to vector<8x32xf32>
    %128 = arith.mulf %118, %127 : vector<8x32xf32>
    %129 = vector.broadcast %110 : vector<1x32xf32> to vector<8x32xf32>
    %130 = arith.mulf %128, %129 : vector<8x32xf32>
    %131 = vector.broadcast %112 : vector<1x32xf32> to vector<8x32xf32>
    %132 = arith.addf %130, %131 : vector<8x32xf32>
    %c0_90 = arith.constant 0 : index
    %c0_91 = arith.constant 0 : index
    %c0_92 = arith.constant 0 : index
    %133 = vector.load %arg4[%c0_90, %c0_91, %c0_92] : memref<1x1x8xf32, #tpu.memory_space<vmem>>, vector<1x1x8xf32>
    %134 = vector.shape_cast %133 : vector<1x1x8xf32> to vector<1x8xf32>
    %135 = arith.truncf %132 : vector<8x32xf32> to vector<8x32xbf16>
    %136 = arith.truncf %6 : vector<8x32xf32> to vector<8x32xbf16>
    %c0_93 = arith.constant 0 : index
    %c0_94 = arith.constant 0 : index
    %c0_95 = arith.constant 0 : index
    %c0_96 = arith.constant 0 : index
    %137 = vector.load %arg11[%c0_93, %c0_94, %c0_95, %c0_96] : memref<1x6x32x16xbf16, #tpu.memory_space<vmem>>, vector<1x1x32x16xbf16>
    %138 = vector.shape_cast %137 : vector<1x1x32x16xbf16> to vector<32x16xbf16>
    %cst_97 = arith.constant dense<0.000000e+00> : vector<8x16xf32>
    %139 = tpu.matmul %135, %138, %cst_97 {dimension_numbers = #tpu.dot_dimension_numbers<[1], [0], [0], [1], [0, 0, 1, 1], [], []>} : vector<8x32xbf16>, vector<32x16xbf16>, vector<8x16xf32> -> vector<8x16xf32>
    %c0_98 = arith.constant 0 : index
    %c0_99 = arith.constant 0 : index
    %c0_100 = arith.constant 0 : index
    %c0_101 = arith.constant 0 : index
    %140 = vector.load %arg12[%c0_98, %c0_99, %c0_100, %c0_101] : memref<1x6x1x16xf32, #tpu.memory_space<vmem>>, vector<1x1x1x16xf32>
    %141 = vector.shape_cast %140 : vector<1x1x1x16xf32> to vector<1x16xf32>
    %142 = vector.broadcast %141 : vector<1x16xf32> to vector<8x16xf32>
    %143 = arith.addf %139, %142 : vector<8x16xf32>
    %c0_102 = arith.constant 0 : index
    %c2_103 = arith.constant 2 : index
    %c0_104 = arith.constant 0 : index
    %c0_105 = arith.constant 0 : index
    %144 = vector.load %arg11[%c0_102, %c2_103, %c0_104, %c0_105] : memref<1x6x32x16xbf16, #tpu.memory_space<vmem>>, vector<1x1x32x16xbf16>
    %145 = vector.shape_cast %144 : vector<1x1x32x16xbf16> to vector<32x16xbf16>
    %cst_106 = arith.constant dense<0.000000e+00> : vector<8x16xf32>
    %146 = tpu.matmul %136, %145, %cst_106 {dimension_numbers = #tpu.dot_dimension_numbers<[1], [0], [0], [1], [0, 0, 1, 1], [], []>} : vector<8x32xbf16>, vector<32x16xbf16>, vector<8x16xf32> -> vector<8x16xf32>
    %c0_107 = arith.constant 0 : index
    %c2_108 = arith.constant 2 : index
    %c0_109 = arith.constant 0 : index
    %c0_110 = arith.constant 0 : index
    %147 = vector.load %arg12[%c0_107, %c2_108, %c0_109, %c0_110] : memref<1x6x1x16xf32, #tpu.memory_space<vmem>>, vector<1x1x1x16xf32>
    %148 = vector.shape_cast %147 : vector<1x1x1x16xf32> to vector<1x16xf32>
    %149 = vector.broadcast %148 : vector<1x16xf32> to vector<8x16xf32>
    %150 = arith.addf %146, %149 : vector<8x16xf32>
    %c0_111 = arith.constant 0 : index
    %c4_112 = arith.constant 4 : index
    %c0_113 = arith.constant 0 : index
    %c0_114 = arith.constant 0 : index
    %151 = vector.load %arg11[%c0_111, %c4_112, %c0_113, %c0_114] : memref<1x6x32x16xbf16, #tpu.memory_space<vmem>>, vector<1x1x32x16xbf16>
    %152 = vector.shape_cast %151 : vector<1x1x32x16xbf16> to vector<32x16xbf16>
    %cst_115 = arith.constant dense<0.000000e+00> : vector<8x16xf32>
    %153 = tpu.matmul %136, %152, %cst_115 {dimension_numbers = #tpu.dot_dimension_numbers<[1], [0], [0], [1], [0, 0, 1, 1], [], []>} : vector<8x32xbf16>, vector<32x16xbf16>, vector<8x16xf32> -> vector<8x16xf32>
    %c0_116 = arith.constant 0 : index
    %c4_117 = arith.constant 4 : index
    %c0_118 = arith.constant 0 : index
    %c0_119 = arith.constant 0 : index
    %154 = vector.load %arg12[%c0_116, %c4_117, %c0_118, %c0_119] : memref<1x6x1x16xf32, #tpu.memory_space<vmem>>, vector<1x1x1x16xf32>
    %155 = vector.shape_cast %154 : vector<1x1x1x16xf32> to vector<1x16xf32>
    %156 = vector.broadcast %155 : vector<1x16xf32> to vector<8x16xf32>
    %157 = arith.addf %153, %156 : vector<8x16xf32>
    %cst_120 = arith.constant 2.500000e-01 : f32
    %158 = vector.broadcast %cst_120 : f32 to vector<8x16xf32>
    %159 = arith.mulf %143, %158 : vector<8x16xf32>
    %160 = arith.truncf %159 : vector<8x16xf32> to vector<8x16xbf16>
    %161 = arith.truncf %150 : vector<8x16xf32> to vector<8x16xbf16>
    %cst_121 = arith.constant dense<0.000000e+00> : vector<8x8xf32>
    %162 = tpu.matmul %160, %161, %cst_121 {dimension_numbers = #tpu.dot_dimension_numbers<[1], [1], [0], [0], [0, 0, 1, 0], [], []>} : vector<8x16xbf16>, vector<8x16xbf16>, vector<8x8xf32> -> vector<8x8xf32>
    %163 = vector.broadcast %134 : vector<1x8xf32> to vector<8x8xf32>
    %164 = arith.addf %162, %163 : vector<8x8xf32>
    %cst_122 = arith.constant dense<0xFF800000> : vector<8xf32>
    %165 = vector.multi_reduction <maximumf>, %164, %cst_122 [1] : vector<8x8xf32> to vector<8xf32>
    %166 = vector.shape_cast %165 : vector<8xf32> to vector<8x1xf32>
    %167 = vector.broadcast %166 : vector<8x1xf32> to vector<8x8xf32>
    %168 = arith.subf %164, %167 : vector<8x8xf32>
    %169 = math.exp %168 : vector<8x8xf32>
    %cst_123 = arith.constant dense<0.000000e+00> : vector<8xf32>
    %170 = vector.multi_reduction <add>, %169, %cst_123 [1] : vector<8x8xf32> to vector<8xf32>
    %171 = vector.shape_cast %170 : vector<8xf32> to vector<8x1xf32>
    %172 = tpu.reciprocal %171 {approx = true} : vector<8x1xf32> -> vector<8x1xf32>
    %173 = vector.broadcast %172 : vector<8x1xf32> to vector<8x8xf32>
    %174 = arith.mulf %169, %173 : vector<8x8xf32>
    %175 = arith.truncf %174 : vector<8x8xf32> to vector<8x8xbf16>
    %176 = arith.truncf %157 : vector<8x16xf32> to vector<8x16xbf16>
    %cst_124 = arith.constant dense<0.000000e+00> : vector<8x16xf32>
    %177 = tpu.matmul %175, %176, %cst_124 {dimension_numbers = #tpu.dot_dimension_numbers<[1], [0], [0], [1], [0, 0, 1, 1], [], []>} : vector<8x8xbf16>, vector<8x16xbf16>, vector<8x16xf32> -> vector<8x16xf32>
    %178 = arith.truncf %177 : vector<8x16xf32> to vector<8x16xbf16>
    %c0_125 = arith.constant 0 : index
    %c0_126 = arith.constant 0 : index
    %c0_127 = arith.constant 0 : index
    %c0_128 = arith.constant 0 : index
    %179 = vector.load %arg13[%c0_125, %c0_126, %c0_127, %c0_128] : memref<1x2x16x32xbf16, #tpu.memory_space<vmem>>, vector<1x1x16x32xbf16>
    %180 = vector.shape_cast %179 : vector<1x1x16x32xbf16> to vector<16x32xbf16>
    %cst_129 = arith.constant dense<0.000000e+00> : vector<8x32xf32>
    %181 = tpu.matmul %178, %180, %cst_129 {dimension_numbers = #tpu.dot_dimension_numbers<[1], [0], [0], [1], [0, 0, 1, 1], [], []>} : vector<8x16xbf16>, vector<16x32xbf16>, vector<8x32xf32> -> vector<8x32xf32>
    %c0_130 = arith.constant 0 : index
    %c1_131 = arith.constant 1 : index
    %c0_132 = arith.constant 0 : index
    %c0_133 = arith.constant 0 : index
    %182 = vector.load %arg11[%c0_130, %c1_131, %c0_132, %c0_133] : memref<1x6x32x16xbf16, #tpu.memory_space<vmem>>, vector<1x1x32x16xbf16>
    %183 = vector.shape_cast %182 : vector<1x1x32x16xbf16> to vector<32x16xbf16>
    %cst_134 = arith.constant dense<0.000000e+00> : vector<8x16xf32>
    %184 = tpu.matmul %135, %183, %cst_134 {dimension_numbers = #tpu.dot_dimension_numbers<[1], [0], [0], [1], [0, 0, 1, 1], [], []>} : vector<8x32xbf16>, vector<32x16xbf16>, vector<8x16xf32> -> vector<8x16xf32>
    %c0_135 = arith.constant 0 : index
    %c1_136 = arith.constant 1 : index
    %c0_137 = arith.constant 0 : index
    %c0_138 = arith.constant 0 : index
    %185 = vector.load %arg12[%c0_135, %c1_136, %c0_137, %c0_138] : memref<1x6x1x16xf32, #tpu.memory_space<vmem>>, vector<1x1x1x16xf32>
    %186 = vector.shape_cast %185 : vector<1x1x1x16xf32> to vector<1x16xf32>
    %187 = vector.broadcast %186 : vector<1x16xf32> to vector<8x16xf32>
    %188 = arith.addf %184, %187 : vector<8x16xf32>
    %c0_139 = arith.constant 0 : index
    %c3_140 = arith.constant 3 : index
    %c0_141 = arith.constant 0 : index
    %c0_142 = arith.constant 0 : index
    %189 = vector.load %arg11[%c0_139, %c3_140, %c0_141, %c0_142] : memref<1x6x32x16xbf16, #tpu.memory_space<vmem>>, vector<1x1x32x16xbf16>
    %190 = vector.shape_cast %189 : vector<1x1x32x16xbf16> to vector<32x16xbf16>
    %cst_143 = arith.constant dense<0.000000e+00> : vector<8x16xf32>
    %191 = tpu.matmul %136, %190, %cst_143 {dimension_numbers = #tpu.dot_dimension_numbers<[1], [0], [0], [1], [0, 0, 1, 1], [], []>} : vector<8x32xbf16>, vector<32x16xbf16>, vector<8x16xf32> -> vector<8x16xf32>
    %c0_144 = arith.constant 0 : index
    %c3_145 = arith.constant 3 : index
    %c0_146 = arith.constant 0 : index
    %c0_147 = arith.constant 0 : index
    %192 = vector.load %arg12[%c0_144, %c3_145, %c0_146, %c0_147] : memref<1x6x1x16xf32, #tpu.memory_space<vmem>>, vector<1x1x1x16xf32>
    %193 = vector.shape_cast %192 : vector<1x1x1x16xf32> to vector<1x16xf32>
    %194 = vector.broadcast %193 : vector<1x16xf32> to vector<8x16xf32>
    %195 = arith.addf %191, %194 : vector<8x16xf32>
    %c0_148 = arith.constant 0 : index
    %c5_149 = arith.constant 5 : index
    %c0_150 = arith.constant 0 : index
    %c0_151 = arith.constant 0 : index
    %196 = vector.load %arg11[%c0_148, %c5_149, %c0_150, %c0_151] : memref<1x6x32x16xbf16, #tpu.memory_space<vmem>>, vector<1x1x32x16xbf16>
    %197 = vector.shape_cast %196 : vector<1x1x32x16xbf16> to vector<32x16xbf16>
    %cst_152 = arith.constant dense<0.000000e+00> : vector<8x16xf32>
    %198 = tpu.matmul %136, %197, %cst_152 {dimension_numbers = #tpu.dot_dimension_numbers<[1], [0], [0], [1], [0, 0, 1, 1], [], []>} : vector<8x32xbf16>, vector<32x16xbf16>, vector<8x16xf32> -> vector<8x16xf32>
    %c0_153 = arith.constant 0 : index
    %c5_154 = arith.constant 5 : index
    %c0_155 = arith.constant 0 : index
    %c0_156 = arith.constant 0 : index
    %199 = vector.load %arg12[%c0_153, %c5_154, %c0_155, %c0_156] : memref<1x6x1x16xf32, #tpu.memory_space<vmem>>, vector<1x1x1x16xf32>
    %200 = vector.shape_cast %199 : vector<1x1x1x16xf32> to vector<1x16xf32>
    %201 = vector.broadcast %200 : vector<1x16xf32> to vector<8x16xf32>
    %202 = arith.addf %198, %201 : vector<8x16xf32>
    %cst_157 = arith.constant 2.500000e-01 : f32
    %203 = vector.broadcast %cst_157 : f32 to vector<8x16xf32>
    %204 = arith.mulf %188, %203 : vector<8x16xf32>
    %205 = arith.truncf %204 : vector<8x16xf32> to vector<8x16xbf16>
    %206 = arith.truncf %195 : vector<8x16xf32> to vector<8x16xbf16>
    %cst_158 = arith.constant dense<0.000000e+00> : vector<8x8xf32>
    %207 = tpu.matmul %205, %206, %cst_158 {dimension_numbers = #tpu.dot_dimension_numbers<[1], [1], [0], [0], [0, 0, 1, 0], [], []>} : vector<8x16xbf16>, vector<8x16xbf16>, vector<8x8xf32> -> vector<8x8xf32>
    %208 = vector.broadcast %134 : vector<1x8xf32> to vector<8x8xf32>
    %209 = arith.addf %207, %208 : vector<8x8xf32>
    %cst_159 = arith.constant dense<0xFF800000> : vector<8xf32>
    %210 = vector.multi_reduction <maximumf>, %209, %cst_159 [1] : vector<8x8xf32> to vector<8xf32>
    %211 = vector.shape_cast %210 : vector<8xf32> to vector<8x1xf32>
    %212 = vector.broadcast %211 : vector<8x1xf32> to vector<8x8xf32>
    %213 = arith.subf %209, %212 : vector<8x8xf32>
    %214 = math.exp %213 : vector<8x8xf32>
    %cst_160 = arith.constant dense<0.000000e+00> : vector<8xf32>
    %215 = vector.multi_reduction <add>, %214, %cst_160 [1] : vector<8x8xf32> to vector<8xf32>
    %216 = vector.shape_cast %215 : vector<8xf32> to vector<8x1xf32>
    %217 = tpu.reciprocal %216 {approx = true} : vector<8x1xf32> -> vector<8x1xf32>
    %218 = vector.broadcast %217 : vector<8x1xf32> to vector<8x8xf32>
    %219 = arith.mulf %214, %218 : vector<8x8xf32>
    %220 = arith.truncf %219 : vector<8x8xf32> to vector<8x8xbf16>
    %221 = arith.truncf %202 : vector<8x16xf32> to vector<8x16xbf16>
    %cst_161 = arith.constant dense<0.000000e+00> : vector<8x16xf32>
    %222 = tpu.matmul %220, %221, %cst_161 {dimension_numbers = #tpu.dot_dimension_numbers<[1], [0], [0], [1], [0, 0, 1, 1], [], []>} : vector<8x8xbf16>, vector<8x16xbf16>, vector<8x16xf32> -> vector<8x16xf32>
    %223 = arith.truncf %222 : vector<8x16xf32> to vector<8x16xbf16>
    %c0_162 = arith.constant 0 : index
    %c1_163 = arith.constant 1 : index
    %c0_164 = arith.constant 0 : index
    %c0_165 = arith.constant 0 : index
    %224 = vector.load %arg13[%c0_162, %c1_163, %c0_164, %c0_165] : memref<1x2x16x32xbf16, #tpu.memory_space<vmem>>, vector<1x1x16x32xbf16>
    %225 = vector.shape_cast %224 : vector<1x1x16x32xbf16> to vector<16x32xbf16>
    %cst_166 = arith.constant dense<0.000000e+00> : vector<8x32xf32>
    %226 = tpu.matmul %223, %225, %cst_166 {dimension_numbers = #tpu.dot_dimension_numbers<[1], [0], [0], [1], [0, 0, 1, 1], [], []>} : vector<8x16xbf16>, vector<16x32xbf16>, vector<8x32xf32> -> vector<8x32xf32>
    %227 = arith.addf %181, %226 : vector<8x32xf32>
    %c0_167 = arith.constant 0 : index
    %c0_168 = arith.constant 0 : index
    %c0_169 = arith.constant 0 : index
    %228 = vector.load %arg14[%c0_167, %c0_168, %c0_169] : memref<1x1x32xf32, #tpu.memory_space<vmem>>, vector<1x1x32xf32>
    %229 = vector.shape_cast %228 : vector<1x1x32xf32> to vector<1x32xf32>
    %230 = vector.broadcast %229 : vector<1x32xf32> to vector<8x32xf32>
    %231 = arith.addf %227, %230 : vector<8x32xf32>
    %232 = arith.addf %132, %231 : vector<8x32xf32>
    %c0_170 = arith.constant 0 : index
    %c0_171 = arith.constant 0 : index
    %c0_172 = arith.constant 0 : index
    %233 = vector.load %arg15[%c0_170, %c0_171, %c0_172] : memref<1x1x32xf32, #tpu.memory_space<vmem>>, vector<1x1x32xf32>
    %234 = vector.shape_cast %233 : vector<1x1x32xf32> to vector<1x32xf32>
    %c0_173 = arith.constant 0 : index
    %c0_174 = arith.constant 0 : index
    %c0_175 = arith.constant 0 : index
    %235 = vector.load %arg16[%c0_173, %c0_174, %c0_175] : memref<1x1x32xf32, #tpu.memory_space<vmem>>, vector<1x1x32xf32>
    %236 = vector.shape_cast %235 : vector<1x1x32xf32> to vector<1x32xf32>
    %cst_176 = arith.constant dense<0.000000e+00> : vector<8xf32>
    %237 = vector.multi_reduction <add>, %232, %cst_176 [1] : vector<8x32xf32> to vector<8xf32>
    %238 = vector.shape_cast %237 : vector<8xf32> to vector<8x1xf32>
    %cst_177 = arith.constant 3.200000e+01 : f32
    %239 = vector.broadcast %cst_177 : f32 to vector<8x1xf32>
    %240 = arith.divf %238, %239 : vector<8x1xf32>
    %241 = vector.broadcast %240 : vector<8x1xf32> to vector<8x32xf32>
    %242 = arith.subf %232, %241 : vector<8x32xf32>
    %243 = arith.mulf %242, %242 : vector<8x32xf32>
    %cst_178 = arith.constant dense<0.000000e+00> : vector<8xf32>
    %244 = vector.multi_reduction <add>, %243, %cst_178 [1] : vector<8x32xf32> to vector<8xf32>
    %245 = vector.shape_cast %244 : vector<8xf32> to vector<8x1xf32>
    %cst_179 = arith.constant 3.200000e+01 : f32
    %246 = vector.broadcast %cst_179 : f32 to vector<8x1xf32>
    %247 = arith.divf %245, %246 : vector<8x1xf32>
    %cst_180 = arith.constant 9.99999974E-6 : f32
    %248 = vector.broadcast %cst_180 : f32 to vector<8x1xf32>
    %249 = arith.addf %247, %248 : vector<8x1xf32>
    %250 = math.rsqrt %249 : vector<8x1xf32>
    %251 = vector.broadcast %250 : vector<8x1xf32> to vector<8x32xf32>
    %252 = arith.mulf %242, %251 : vector<8x32xf32>
    %253 = vector.broadcast %234 : vector<1x32xf32> to vector<8x32xf32>
    %254 = arith.mulf %252, %253 : vector<8x32xf32>
    %255 = vector.broadcast %236 : vector<1x32xf32> to vector<8x32xf32>
    %256 = arith.addf %254, %255 : vector<8x32xf32>
    %257 = arith.truncf %256 : vector<8x32xf32> to vector<8x32xbf16>
    %c0_181 = arith.constant 0 : index
    %c0_182 = arith.constant 0 : index
    %c0_183 = arith.constant 0 : index
    %258 = vector.load %arg17[%c0_181, %c0_182, %c0_183] : memref<1x32x64xbf16, #tpu.memory_space<vmem>>, vector<1x32x64xbf16>
    %259 = vector.shape_cast %258 : vector<1x32x64xbf16> to vector<32x64xbf16>
    %cst_184 = arith.constant dense<0.000000e+00> : vector<8x64xf32>
    %260 = tpu.matmul %257, %259, %cst_184 {dimension_numbers = #tpu.dot_dimension_numbers<[1], [0], [0], [1], [0, 0, 1, 1], [], []>} : vector<8x32xbf16>, vector<32x64xbf16>, vector<8x64xf32> -> vector<8x64xf32>
    %c0_185 = arith.constant 0 : index
    %c0_186 = arith.constant 0 : index
    %c0_187 = arith.constant 0 : index
    %261 = vector.load %arg18[%c0_185, %c0_186, %c0_187] : memref<1x1x64xf32, #tpu.memory_space<vmem>>, vector<1x1x64xf32>
    %262 = vector.shape_cast %261 : vector<1x1x64xf32> to vector<1x64xf32>
    %263 = vector.broadcast %262 : vector<1x64xf32> to vector<8x64xf32>
    %264 = arith.addf %260, %263 : vector<8x64xf32>
    %cst_188 = arith.constant 0.000000e+00 : f32
    %265 = vector.broadcast %cst_188 : f32 to vector<8x64xf32>
    %266 = arith.maximumf %264, %265 : vector<8x64xf32>
    %267 = arith.truncf %266 : vector<8x64xf32> to vector<8x64xbf16>
    %c0_189 = arith.constant 0 : index
    %c0_190 = arith.constant 0 : index
    %c0_191 = arith.constant 0 : index
    %268 = vector.load %arg19[%c0_189, %c0_190, %c0_191] : memref<1x64x32xbf16, #tpu.memory_space<vmem>>, vector<1x64x32xbf16>
    %269 = vector.shape_cast %268 : vector<1x64x32xbf16> to vector<64x32xbf16>
    %cst_192 = arith.constant dense<0.000000e+00> : vector<8x32xf32>
    %270 = tpu.matmul %267, %269, %cst_192 {dimension_numbers = #tpu.dot_dimension_numbers<[1], [0], [0], [1], [0, 0, 1, 1], [], []>} : vector<8x64xbf16>, vector<64x32xbf16>, vector<8x32xf32> -> vector<8x32xf32>
    %c0_193 = arith.constant 0 : index
    %c0_194 = arith.constant 0 : index
    %c0_195 = arith.constant 0 : index
    %271 = vector.load %arg20[%c0_193, %c0_194, %c0_195] : memref<1x1x32xf32, #tpu.memory_space<vmem>>, vector<1x1x32xf32>
    %272 = vector.shape_cast %271 : vector<1x1x32xf32> to vector<1x32xf32>
    %273 = vector.broadcast %272 : vector<1x32xf32> to vector<8x32xf32>
    %274 = arith.addf %270, %273 : vector<8x32xf32>
    %275 = arith.addf %256, %274 : vector<8x32xf32>
    %c0_196 = arith.constant 0 : index
    %c0_197 = arith.constant 0 : index
    %c0_198 = arith.constant 0 : index
    %276 = vector.load %arg21[%c0_196, %c0_197, %c0_198] : memref<1x1x32xf32, #tpu.memory_space<vmem>>, vector<1x1x32xf32>
    %277 = vector.shape_cast %276 : vector<1x1x32xf32> to vector<1x32xf32>
    %c0_199 = arith.constant 0 : index
    %c0_200 = arith.constant 0 : index
    %c0_201 = arith.constant 0 : index
    %278 = vector.load %arg22[%c0_199, %c0_200, %c0_201] : memref<1x1x32xf32, #tpu.memory_space<vmem>>, vector<1x1x32xf32>
    %279 = vector.shape_cast %278 : vector<1x1x32xf32> to vector<1x32xf32>
    %cst_202 = arith.constant dense<0.000000e+00> : vector<8xf32>
    %280 = vector.multi_reduction <add>, %275, %cst_202 [1] : vector<8x32xf32> to vector<8xf32>
    %281 = vector.shape_cast %280 : vector<8xf32> to vector<8x1xf32>
    %cst_203 = arith.constant 3.200000e+01 : f32
    %282 = vector.broadcast %cst_203 : f32 to vector<8x1xf32>
    %283 = arith.divf %281, %282 : vector<8x1xf32>
    %284 = vector.broadcast %283 : vector<8x1xf32> to vector<8x32xf32>
    %285 = arith.subf %275, %284 : vector<8x32xf32>
    %286 = arith.mulf %285, %285 : vector<8x32xf32>
    %cst_204 = arith.constant dense<0.000000e+00> : vector<8xf32>
    %287 = vector.multi_reduction <add>, %286, %cst_204 [1] : vector<8x32xf32> to vector<8xf32>
    %288 = vector.shape_cast %287 : vector<8xf32> to vector<8x1xf32>
    %cst_205 = arith.constant 3.200000e+01 : f32
    %289 = vector.broadcast %cst_205 : f32 to vector<8x1xf32>
    %290 = arith.divf %288, %289 : vector<8x1xf32>
    %cst_206 = arith.constant 9.99999974E-6 : f32
    %291 = vector.broadcast %cst_206 : f32 to vector<8x1xf32>
    %292 = arith.addf %290, %291 : vector<8x1xf32>
    %293 = math.rsqrt %292 : vector<8x1xf32>
    %294 = vector.broadcast %293 : vector<8x1xf32> to vector<8x32xf32>
    %295 = arith.mulf %285, %294 : vector<8x32xf32>
    %296 = vector.broadcast %277 : vector<1x32xf32> to vector<8x32xf32>
    %297 = arith.mulf %295, %296 : vector<8x32xf32>
    %298 = vector.broadcast %279 : vector<1x32xf32> to vector<8x32xf32>
    %299 = arith.addf %297, %298 : vector<8x32xf32>
    %c0_207 = arith.constant 0 : index
    %c0_208 = arith.constant 0 : index
    %c0_209 = arith.constant 0 : index
    %300 = vector.load %arg23[%c0_207, %c0_208, %c0_209] : memref<1x8x32xf32, #tpu.memory_space<vmem>>, vector<1x8x32xf32>
    %301 = vector.shape_cast %300 : vector<1x8x32xf32> to vector<8x32xf32>
    %302 = vector.shape_cast %299 : vector<8x32xf32> to vector<1x8x32xf32>
    tpu.vector_store %arg23[%c0_207, %c0_208, %c0_209], %302 {strides = array<i32>} : memref<1x8x32xf32, #tpu.memory_space<vmem>>, vector<1x8x32xf32>,
    return
  }
  func.func @transform_0(%arg0: i32, %arg1: i32) -> (i32, i32, i32) {
    %c0_i32 = arith.constant 0 : i32
    %c0_i32_0 = arith.constant 0 : i32
    %c0_i32_1 = arith.constant 0 : i32
    return %arg0, %c0_i32, %c0_i32_0 : i32, i32, i32
  }
  func.func @transform_1(%arg0: i32, %arg1: i32) -> (i32, i32, i32) {
    %c0_i32 = arith.constant 0 : i32
    %c0_i32_0 = arith.constant 0 : i32
    %c0_i32_1 = arith.constant 0 : i32
    return %arg0, %c0_i32, %c0_i32_0 : i32, i32, i32
  }
  func.func @transform_2(%arg0: i32, %arg1: i32) -> (i32, i32, i32) {
    %c0_i32 = arith.constant 0 : i32
    %c0_i32_0 = arith.constant 0 : i32
    %c0_i32_1 = arith.constant 0 : i32
    return %arg0, %c0_i32, %c0_i32_0 : i32, i32, i32
  }
  func.func @transform_3(%arg0: i32, %arg1: i32) -> (i32, i32, i32, i32) {
    %c0_i32 = arith.constant 0 : i32
    %c0_i32_0 = arith.constant 0 : i32
    %c0_i32_1 = arith.constant 0 : i32
    %c0_i32_2 = arith.constant 0 : i32
    return %arg1, %c0_i32, %c0_i32_0, %c0_i32_1 : i32, i32, i32, i32
  }
  func.func @transform_4(%arg0: i32, %arg1: i32) -> (i32, i32, i32, i32) {
    %c0_i32 = arith.constant 0 : i32
    %c0_i32_0 = arith.constant 0 : i32
    %c0_i32_1 = arith.constant 0 : i32
    %c0_i32_2 = arith.constant 0 : i32
    return %arg1, %c0_i32, %c0_i32_0, %c0_i32_1 : i32, i32, i32, i32
  }
  func.func @transform_5(%arg0: i32, %arg1: i32) -> (i32, i32, i32, i32) {
    %c0_i32 = arith.constant 0 : i32
    %c0_i32_0 = arith.constant 0 : i32
    %c0_i32_1 = arith.constant 0 : i32
    %c0_i32_2 = arith.constant 0 : i32
    return %arg1, %c0_i32, %c0_i32_0, %c0_i32_1 : i32, i32, i32, i32
  }
  func.func @transform_6(%arg0: i32, %arg1: i32) -> (i32, i32, i32) {
    %c0_i32 = arith.constant 0 : i32
    %c0_i32_0 = arith.constant 0 : i32
    %c0_i32_1 = arith.constant 0 : i32
    return %arg1, %c0_i32, %c0_i32_0 : i32, i32, i32
  }
  func.func @transform_7(%arg0: i32, %arg1: i32) -> (i32, i32, i32) {
    %c0_i32 = arith.constant 0 : i32
    %c0_i32_0 = arith.constant 0 : i32
    %c0_i32_1 = arith.constant 0 : i32
    return %arg1, %c0_i32, %c0_i32_0 : i32, i32, i32
  }
  func.func @transform_8(%arg0: i32, %arg1: i32) -> (i32, i32, i32) {
    %c0_i32 = arith.constant 0 : i32
    %c0_i32_0 = arith.constant 0 : i32
    %c0_i32_1 = arith.constant 0 : i32
    return %arg1, %c0_i32, %c0_i32_0 : i32, i32, i32
  }
  func.func @transform_9(%arg0: i32, %arg1: i32) -> (i32, i32, i32, i32) {
    %c0_i32 = arith.constant 0 : i32
    %c0_i32_0 = arith.constant 0 : i32
    %c0_i32_1 = arith.constant 0 : i32
    %c0_i32_2 = arith.constant 0 : i32
    return %arg1, %c0_i32, %c0_i32_0, %c0_i32_1 : i32, i32, i32, i32
  }
  func.func @transform_10(%arg0: i32, %arg1: i32) -> (i32, i32, i32, i32) {
    %c0_i32 = arith.constant 0 : i32
    %c0_i32_0 = arith.constant 0 : i32
    %c0_i32_1 = arith.constant 0 : i32
    %c0_i32_2 = arith.constant 0 : i32
    return %arg1, %c0_i32, %c0_i32_0, %c0_i32_1 : i32, i32, i32, i32
  }
  func.func @transform_11(%arg0: i32, %arg1: i32) -> (i32, i32, i32, i32) {
    %c0_i32 = arith.constant 0 : i32
    %c0_i32_0 = arith.constant 0 : i32
    %c0_i32_1 = arith.constant 0 : i32
    %c0_i32_2 = arith.constant 0 : i32
    return %arg1, %c0_i32, %c0_i32_0, %c0_i32_1 : i32, i32, i32, i32
  }
  func.func @transform_12(%arg0: i32, %arg1: i32) -> (i32, i32, i32) {
    %c0_i32 = arith.constant 0 : i32
    %c0_i32_0 = arith.constant 0 : i32
    %c0_i32_1 = arith.constant 0 : i32
    return %arg1, %c0_i32, %c0_i32_0 : i32, i32, i32
  }
  func.func @transform_13(%arg0: i32, %arg1: i32) -> (i32, i32, i32) {
    %c0_i32 = arith.constant 0 : i32
    %c0_i32_0 = arith.constant 0 : i32
    %c0_i32_1 = arith.constant 0 : i32
    return %arg1, %c0_i32, %c0_i32_0 : i32, i32, i32
  }
  func.func @transform_14(%arg0: i32, %arg1: i32) -> (i32, i32, i32) {
    %c0_i32 = arith.constant 0 : i32
    %c0_i32_0 = arith.constant 0 : i32
    %c0_i32_1 = arith.constant 0 : i32
    return %arg1, %c0_i32, %c0_i32_0 : i32, i32, i32
  }
  func.func @transform_15(%arg0: i32, %arg1: i32) -> (i32, i32, i32) {
    %c0_i32 = arith.constant 0 : i32
    %c0_i32_0 = arith.constant 0 : i32
    %c0_i32_1 = arith.constant 0 : i32
    return %arg1, %c0_i32, %c0_i32_0 : i32, i32, i32
  }
  func.func @transform_16(%arg0: i32, %arg1: i32) -> (i32, i32, i32) {
    %c0_i32 = arith.constant 0 : i32
    %c0_i32_0 = arith.constant 0 : i32
    %c0_i32_1 = arith.constant 0 : i32
    return %arg1, %c0_i32, %c0_i32_0 : i32, i32, i32
  }
  func.func @transform_17(%arg0: i32, %arg1: i32) -> (i32, i32, i32) {
    %c0_i32 = arith.constant 0 : i32
    %c0_i32_0 = arith.constant 0 : i32
    %c0_i32_1 = arith.constant 0 : i32
    return %arg1, %c0_i32, %c0_i32_0 : i32, i32, i32
  }
  func.func @transform_18(%arg0: i32, %arg1: i32) -> (i32, i32, i32) {
    %c0_i32 = arith.constant 0 : i32
    %c0_i32_0 = arith.constant 0 : i32
    %c0_i32_1 = arith.constant 0 : i32
    return %arg1, %c0_i32, %c0_i32_0 : i32, i32, i32
  }
  func.func @transform_19(%arg0: i32, %arg1: i32) -> (i32, i32, i32) {
    %c0_i32 = arith.constant 0 : i32
    %c0_i32_0 = arith.constant 0 : i32
    %c0_i32_1 = arith.constant 0 : i32
    return %arg1, %c0_i32, %c0_i32_0 : i32, i32, i32
  }
  func.func @transform_20(%arg0: i32, %arg1: i32) -> (i32, i32, i32) {
    %c0_i32 = arith.constant 0 : i32
    %c0_i32_0 = arith.constant 0 : i32
    %c0_i32_1 = arith.constant 0 : i32
    return %arg1, %c0_i32, %c0_i32_0 : i32, i32, i32
  }
  func.func @transform_21(%arg0: i32, %arg1: i32) -> (i32, i32, i32) {
    %c0_i32 = arith.constant 0 : i32
    %c0_i32_0 = arith.constant 0 : i32
    %c0_i32_1 = arith.constant 0 : i32
    return %arg0, %c0_i32, %c0_i32_0 : i32, i32, i32
  }
}

</mosaic_0001>

<bundles_post_ra>
// kernel: fwd.5
= control target key start
LH: loop header
LB: loop body
LE: loop exit
PB: predicated region body
PF: predicated region fallthrough
CT: control target
= control target key end

     0   :  { %v187_v3 = vmov 0   ;;  %s260_s0 = inlined_call_operand.vmem [shape: f32[16,32], index: 0, kind: input, shape index: {}]   ;;  %s261_s1 = inlined_call_operand.vmem [shape: bf16[32,32], index: 1, kind: input, shape index: {}]   ;;  %s262_s2 = inlined_call_operand.vmem [shape: f32[1,32], index: 2, kind: input, shape index: {}]   ;;  %s263_s3 = inlined_call_operand.vmem [shape: s32[16,1], index: 3, kind: input, shape index: {}]   ;;  %s264_s4 = inlined_call_operand.hbm [shape: f32[16,32], index: 4, kind: output, shape index: {0}]   ;;  %s265_s5 = inlined_call_operand.vmem [shape: f32[16,1], index: 5, kind: output, shape index: {1}]  }
   0x1   :  { %v145_v0 = vld [vmem:[%s261_s1 + $0x8] sm:$0xff]  ;;  %v144_v1 = vld [vmem:[%s261_s1] sm:$0xff]  ;;  %150 = vset.pattern.permute.xlu1 %v187_v3  ;;  %151 = vset.pattern.permute.xlu0 %v187_v3 }
   0x2   :  { %v21_v2 = vld [vmem:[%s260_s0] sm:$0xff]  ;;  %54 = vmatpush.bf16.msra.mxu0 %v145_v0  ;;  %v22_v5 = vld [vmem:[%s260_s0 + $0x8] sm:$0xff] }
   0x3   :  { %v90_v4 = vld [vmem:[%s263_s3] sm:$0xff] }
   0x4   :  { %93 = vperm.xlu1 %150, %v90_v4  }
   0x5   :  { %11 = vsyncpa [#allocation3], 0  ;;  %v23_v6 = vpack.c.bf16 %v22_v5, %v21_v2  ;;  %vm44_vm0 = vcmask 261120   ;;  %v91_v7 = vld [vmem:[%s263_s3 + $0x8] sm:$0xff]  ;;  %v152_v9 = vld [vmem:[%s262_s2] ss:$0 sm:$0xff]  ;;  %v88_v12 = vlaneseq }
   0x6   :  { %55 = vmatpush.bf16.msra.mxu0 %v144_v1  ;;  %s188_s0 = smov [#allocation2]   ;;  %s119_s7 = sshll.u32 %s264_s4, 4  ;;  %vm110_vm3 = vcmask 7168   ;;  %s120_s7 = int_to_ptr.hbm [resolvable:$true] %s119_s7 }
   0x7   :  { %v89_v15 = vand.u32 127, %v88_v12  ;;  %s117_s2 = sshll.u32 %s188_s0, 4  ;;  %s189_s8 = smov 128   ;;  %s118_s2 = int_to_ptr.vmem [resolvable:$true] %s117_s2 }
   0x8   :  { %s190_s9 = smov 8  }
   0x9   :  { %143 = vmatmul.msk.bf16.vlgmr.msra.gmra.mxu0 %vm44_vm0, %v23_v6 }
   0xc   :  { %96 = vperm.xlu1 %150, %v91_v7  }
  0x76   :  { %v94_v8 = vpop.permute.xlu1 %93 }
  0x77   :  { %vm98_vm2 = vcmp.eq.s32.totalorder %v89_v15, %v94_v8 }
  0x7e   :  { %v97_v14 = vpop.permute.xlu1 %96 }
  0x7f   :  { %vm99_vm1 = vcmp.eq.s32.totalorder %v89_v15, %v97_v14 }
  0x86   :  { %v57_v10 = vpop.f32.mrf.mxu0 }
  0x87   :  { %v58_v11 = vadd.f32 %v152_v9, %v57_v10 }
  0x89   :  { %62 = vst.msk [vmem:[#allocation2] sm:$0xff] %vm44_vm0, %v58_v11  ;;  %v64_v13 = vsel %vm44_vm0, %v58_v11, -inf  ;;  %v100_v21 = vsel %vm98_vm2, %v58_v11, 0.0 }
  0x8a   :  { %65 = vmax.xlane.f32.xlu0 %v64_v13  ;;  %v102_v22 = vsel %vm44_vm0, %v100_v21, 0.0 }
  0x8e   :  { %v59_v16 = vpop.f32.mrf.mxu0 }
  0x8f   :  { %v60_v17 = vadd.f32 %v152_v9, %v59_v16 }
  0x91   :  { %63 = vst.msk [vmem:[#allocation2 + $0x8] sm:$0xff] %vm44_vm0, %v60_v17  ;;  %v67_v18 = vsel %vm44_vm0, %v60_v17, -inf  ;;  %v101_v19 = vsel %vm99_vm1, %v60_v17, 0.0 }
  0x92   :  { %68 = vmax.xlane.f32.xlu0 %v67_v18  ;;  %v105_v20 = vsel %vm44_vm0, %v101_v19, 0.0  ;;  %125 = dma.vmem_to_hbm [thread:$0]  %s118_s2, 256, %s120_s7, [#allocation3], %s189_s8, %s189_s8, %s190_s9  }
  0x93   :  { %106 = vadd.xlane.f32.xlu1 %v105_v20 }
  0x9a   :  { %103 = vadd.xlane.f32.xlu0 %v102_v22 }
  0xfd   :  { %v66_v23 = vpop.xlane.xlu0 %65 }
  0xfe   :  { %v70_v24 = vsub.f32 %v58_v11, %v66_v23 }
 0x100   :  { %v72_v25 = vmul.f32 1.442695, %v70_v24 }
 0x102   :  { %153 = vpow2.f32 %v72_v25 }
 0x105   :  { %v69_v26 = vpop.xlane.xlu0 %68 }
 0x106   :  { %v71_v27 = vsub.f32 %v60_v17, %v69_v26  ;;  %v107_v43 = vpop.xlane.xlu1 %106 }
 0x108   :  { %v154_v28 = vpop.eup %153  ;;  %v74_v29 = vmul.f32 1.442695, %v71_v27 }
 0x109   :  { %v76_v30 = vsel %vm44_vm0, %v154_v28, 0.0 }
 0x10a   :  { %155 = vpow2.f32 %v74_v29  ;;  %77 = vadd.xlane.f32.xlu2 %v76_v30 }
 0x10d   :  { %v104_v38 = vpop.xlane.xlu0 %103 }
 0x110   :  { %v156_v31 = vpop.eup %155 }
 0x111   :  { %v79_v32 = vsel %vm44_vm0, %v156_v31, 0.0 }
 0x112   :  { %80 = vadd.xlane.f32.xlu2 %v79_v32 }
 0x17d   :  { %v78_v33 = vpop.xlane.xlu2 %77 }
 0x17e   :  { %157 = vlog2.f32 %v78_v33 }
 0x184   :  { %v158_v34 = vpop.eup %157 }
 0x185   :  { %v83_v35 = vmul.f32 0.6931472, %v158_v34  ;;  %v81_v36 = vpop.xlane.xlu2 %80 }
 0x186   :  { %159 = vlog2.f32 %v81_v36 }
 0x187   :  { %v86_v37 = vadd.f32 %v83_v35, %v66_v23 }
 0x189   :  { %v108_v39 = vsub.f32 %v86_v37, %v104_v38 }
 0x18b   :  { %111 = vst.msk [vmem:[%s265_s5] sm:$0xff] %vm110_vm3, %v108_v39 }
 0x18c   :  { %v160_v40 = vpop.eup %159 }
 0x18d   :  { %v85_v41 = vmul.f32 0.6931472, %v160_v40 }
 0x18f   :  { %v87_v42 = vadd.f32 %v85_v41, %v69_v26 }
 0x191   :  { %v109_v44 = vsub.f32 %v87_v42, %v107_v43 }
 0x193   :  { %112 = vst.msk [vmem:[%s265_s5 + $0x8] sm:$0xff] %vm110_vm3, %v109_v44 }
 0x194   :  { %185 = dma.done.wait [#allocation3], 256  }
 0x195   :  { %186 = vsyncadd [#allocation3], 4294967040 }
 0x196   :  { %134 = vsyncpa [#allocation3], 1 }

// kernel: fwd.3
= control target key start
LH: loop header
LB: loop body
LE: loop exit
PB: predicated region body
PF: predicated region fallthrough
CT: control target
= control target key end

     0   :  { %s1832_s29 = smov 0   ;;  %s1834_s30 = smov 0   ;;  %s2074_s0 = inlined_call_operand.vmem [shape: f32[2,8,32], index: 0, kind: input, shape index: {}]   ;;  %s2075_s1 = inlined_call_operand.vmem [shape: f32[2,1,8], index: 1, kind: input, shape index: {}]   ;;  %s2076_s2 = inlined_call_operand.vmem [shape: bf16[2,6,32,16], index: 2, kind: input, shape index: {}]   ;;  %s2077_s3 = inlined_call_operand.vmem [shape: f32[2,6,1,16], index: 3, kind: input, shape index: {}]   ;;  %s2078_s4 = inlined_call_operand.vmem [shape: bf16[2,2,16,32], index: 4, kind: input, shape index: {}]   ;;  %s2079_s5 = inlined_call_operand.vmem [shape: f32[2,1,32], index: 5, kind: input, shape index: {}]   ;;  %s2080_s6 = inlined_call_operand.vmem [shape: f32[2,1,32], index: 6, kind: input, shape index: {}]   ;;  %s2081_s7 = inlined_call_operand.vmem [shape: f32[2,1,32], index: 7, kind: input, shape index: {}]   ;;  %s2082_s8 = inlined_call_operand.vmem [shape: bf16[2,32,64], index: 8, kind: input, shape index: {}]   ;;  %s2083_s9 = inlined_call_operand.vmem [shape: f32[2,1,64], index: 9, kind: input, shape index: {}]   ;;  %s2084_s10 = inlined_call_operand.vmem [shape: bf16[2,64,32], index: 10, kind: input, shape index: {}]   ;;  %s2085_s11 = inlined_call_operand.vmem [shape: f32[2,1,32], index: 11, kind: input, shape index: {}]   ;;  %s2086_s12 = inlined_call_operand.vmem [shape: f32[2,1,32], index: 12, kind: input, shape index: {}]   ;;  %s2087_s13 = inlined_call_operand.vmem [shape: f32[2,1,32], index: 13, kind: input, shape index: {}]   ;;  %s2088_s14 = inlined_call_operand.vmem [shape: f32[2,8,32], index: 14, kind: output, shape index: {}]  }
   0x1   :  { %2094 = sst [smem:[#allocation9_spill]] %s2074_s0  ;;  %s1836_s15 = smov 0  }
   0x2   :  { %2095 = sst [smem:[#allocation10_spill]] %s2075_s1  ;;  %s1838_s16 = smov 0  }
   0x3   :  { %2096 = sst [smem:[#allocation11_spill]] %s2076_s2  ;;  %s1840_s17 = smov 0  }
   0x4   :  { %2097 = sst [smem:[#allocation12_spill]] %s2077_s3 }
   0x5   :  { %2098 = sst [smem:[#allocation13_spill]] %s2078_s4 }
   0x6   :  { %2099 = sst [smem:[#allocation14_spill]] %s2082_s8 }
   0x7   :  { %2100 = sst [smem:[#allocation15_spill]] %s2083_s9 }
   0x8   :  { %2101 = sst [smem:[#allocation16_spill]] %s2087_s13 }
   0x9   :  { %2102 = sst [smem:[#allocation17_spill]] %s2088_s14 }
   0xa LB: > { %2103 = sst [smem:[#allocation2_spill]] %s1738_s29  ;;  %s33_s18 = sadd.s32 1, %s1746_s15  ;;  %s1754_s17 = sphi %s1840_s17, %s24_s17   ;;  %s1750_s16 = sphi %s1838_s16, %s2133_s16   ;;  %s1746_s15 = sphi %s1836_s15, %s2132_s15   ;;  %s1742_s30 = sphi %s1834_s30, %s2131_s30   ;;  %s1738_s29 = sphi %s1832_s29, %s2130_s29  }
   0xb   : > { %2104 = sst [smem:[#allocation3_spill]] %s1746_s15  ;;  %s36_s19 = sadd.s32 1, %s1750_s16 }
   0xc   : > { %2105 = sst [smem:[#allocation4_spill]] %s1750_s16  ;;  %p34_p0 = scmp.ge.s32.totalorder %s33_s18, 2 }
   0xd   : > { %2106 = sst [smem:[#allocation5_spill]] %s1754_s17  ;;  %p1482_p1 = scmp.ge.s32.totalorder %s1754_s17, 1 }
   0xe   : > { %p536_p2 = scmp.lt.s32.totalorder %s1754_s17, 5  ;;  %s2135_s18 = smov (%p34_p0, %s33_s18), 0 }
   0xf   : > { %2107 = sst [smem:[#allocation6_spill]] %s2135_s18  ;;  %s2137_s19 = smov (!%p34_p0, %s36_s19), %s1750_s16 }
  0x10   : > { %p537_p3 = pnand %p1482_p1, %p536_p2  ;;  %p38_p4 = scmp.ge.s32.totalorder %s2137_s19, 2 }
  0x12   : > { %s2139_s19 = smov (%p38_p4, %s2137_s19), 0  ;;  %540 = sbr.rel (%p537_p3) target bundleno = 2106 (0x83a), region = 76 }
  0x13   : > { %2108 = sst [smem:[#allocation7_spill]] %s2139_s19 }
  0x17   : > { %p628_p5 = scmp.lt.s32.totalorder %s1742_s30, 1  ;;  %p635_p6 = scmp.lt.s32.totalorder %s1738_s29, 1 }
  0x18   : > { %s2111_s0 = sld [smem:[#allocation9_spill]] }
  0x19   : > { %s2141_s30 = smov (!%p628_p5, %s1742_s30), 1  ;;  %s2112_s2 = sld [smem:[#allocation11_spill]] }
  0x1a   : > { %2109 = sst [smem:[#allocation8_spill]] %s2141_s30  ;;  %s1483_s21 = sshll.u32 %s2141_s30, 3 }
  0x1b   : > { %s1868_s20 = scalar_select %p635_p6, %s1738_s29, 1 }
  0x1c   : > { %s2113_s4 = sld [smem:[#allocation13_spill]] }
  0x1d   : > { %s1641_s28 = smul.u32 96, %s1868_s20  ;;  %s1618_s18 = sshll.u32 %s1868_s20, 4 }
  0x1e   : > { %s631_s27 = scalar_lea.vmem %s2111_s0, %s1483_s21  ;;  %s1642_s19 = smul.u32 6, %s1868_s20 }
  0x1f   : > { %s1884_s17 = scalar_lea.vmem %s2112_s2, %s1641_s28  ;;  %s2114_s3 = sld [smem:[#allocation12_spill]] }
  0x20   : > { %s2115_s8 = sld [smem:[#allocation14_spill]]  ;;  %s673_s0 = scalar_lea.vmem %s2085_s11, %s1868_s20 }
  0x21   : > { %s676_s14 = scalar_lea.vmem %s2086_s12, %s1868_s20  ;;  %s2117_s2 = sld [smem:[#allocation16_spill]] }
  0x22   : > { %s1889_s13 = scalar_lea.vmem %s2113_s4, %s1618_s18  ;;  %s2118_s23 = sld [smem:[#allocation17_spill]] }
  0x23   : > { %s2119_s24 = sld [smem:[#allocation2_spill]] }
  0x25   : > { %s1894_s25 = scalar_lea.vmem %s2114_s3, %s1642_s19  ;;  %s1620_s3 = sshll.u32 %s1868_s20, 5 }
  0x26   : > { %s1911_s4 = scalar_lea.vmem %s2115_s8, %s1618_s18  ;;  %s1925_s15 = scalar_lea.vmem %s2084_s10, %s1620_s3 }
  0x27   : > { %s679_s8 = scalar_lea.vmem %s2117_s2, %s1868_s20 }
  0x28   : > { %s1938_s9 = scalar_lea.vmem %s2118_s23, %s1483_s21 }
  0x29   : > { %p1492_p7 = scmp.ne.s32.totalorder %s2119_s24, 0 }
  0x2b   : > { %688 = sbr.rel (%p1492_p7) target bundleno = 50 (0x32), region = 80 }
  0x30   : > { %v689_v0 = vld [vmem:[%s631_s27] sm:$0xff]  ;;  %vm690_vm0 = vcmask 261120  }
  0x31   : > { %691 = vst.msk [vmem:[%s1938_s9] sm:$0xff] %vm690_vm0, %v689_v0 }
  0x32 PF: > { %v1622_v1 = vld [vmem:[%s1884_s17 + $0x8] sm:$0xff]  ;;  %v1621_v3 = vld [vmem:[%s1884_s17] sm:$0xff]  ;;  %vm715_vm1 = vcmask 261120   ;;  %vm808_vm2 = vcmask 130048   ;;  %s2120_s2 = sld [smem:[#allocation8_spill]]  ;;  %v1631_v21 = vld [vmem:[%s1884_s17 + $0x38] sm:$0xff]  ;;  %s2123_s26 = scalar_lea.vmem %s2079_s5, %s1868_s20 }
  0x33   : > { %v1624_v2 = vld [vmem:[%s1884_s17 + $0x28] sm:$0xff]  ;;  %v1623_v4 = vld [vmem:[%s1884_s17 + $0x20] sm:$0xff]  ;;  %725 = vmatpush.bf16.msra.mxu0 %v1622_v1  ;;  %v1630_v22 = vld [vmem:[%s1884_s17 + $0x30] sm:$0xff]  ;;  %s2121_s27 = sld [smem:[#allocation10_spill]]  ;;  %vm828_vm3 = vcmask 64512   ;;  %vm845_vm4 = vcmask 1043456   ;;  %s2125_s28 = scalar_lea.vmem %s2081_s7, %s1868_s20 }
  0x34   : > { %760 = vmatpush.bf16.msra.mxu1 %v1624_v2  ;;  %v1684_v7 = vld [vmem:[%s1894_s25] ss:$0 sm:$0xff]  ;;  %v1685_v8 = vld [vmem:[%s1894_s25 + $0x2] ss:$0 sm:$0xff]  ;;  %v1626_v19 = vld [vmem:[%s1884_s17 + $0x48] sm:$0xff]  ;;  %s2126_s22 = sld [smem:[#allocation15_spill]] }
  0x35   : > { %795 = vmatpush.bf16.msra.mxu2 %v1626_v19  ;;  %v1625_v20 = vld [vmem:[%s1884_s17 + $0x40] sm:$0xff]  ;;  %v1629_v28 = vld [vmem:[%s1884_s17 + $0x18] sm:$0xff]  ;;  %v1628_v29 = vld [vmem:[%s1884_s17 + $0x10] sm:$0xff]  ;;  %vm1231_vm14 = vcmask 523264  }
  0x36   : > { %v1687_v30 = vld [vmem:[%s1894_s25 + $0x4] ss:$0 sm:$0xff]  ;;  %v1688_v39 = vld [vmem:[%s1894_s25 + $0x3] ss:$0 sm:$0xff]  ;;  %v1633_v49 = vld [vmem:[%s1884_s17 + $0x58] sm:$0xff] }
  0x37   : > { %726 = vmatpush.bf16.msra.mxu0 %v1621_v3  ;;  %v1632_v50 = vld [vmem:[%s1884_s17 + $0x50] sm:$0xff]  ;;  %v1689_v55 = vld [vmem:[%s1894_s25 + $0x1] ss:$0 sm:$0xff]  ;;  %v1690_v60 = vld [vmem:[%s1894_s25 + $0x5] ss:$0 sm:$0xff] }
  0x38   : > { %v1947_v5 = vld [vmem:[%s1938_s9] sm:$0xff]  ;;  %761 = vmatpush.bf16.msra.mxu1 %v1623_v4 }
  0x39   : > { %v1951_v6 = vpack.c.bf16 %v1947_v5, %v1947_v5  ;;  %796 = vmatpush.bf16.msra.mxu2 %v1625_v20  ;;  %s2122_s23 = scalar_lea.vmem %s2121_s27, %s2120_s2  ;;  %v1627_v59 = vld [vmem:[%s1889_s13] sm:$0xff] }
  0x3a   : > { %v1972_v23 = vld [vmem:[%s2122_s23] ss:$0 sm:$0xff]  ;;  %s2127_s19 = scalar_lea.vmem %s2126_s22, %s1868_s20 }
  0x3b   : > { %1501 = vmatmul.msk.bf16.vlgmr.msra.gmra.mxu0 %vm715_vm1, %v1951_v6  ;;  %1515 = vmatmul.msk.bf16.vlgmr.msra.gmra.mxu1 %vm715_vm1, %v1951_v6 }
  0x3c   : > { %1529 = vmatmul.msk.bf16.vlgmr.msra.gmra.mxu2 %vm715_vm1, %v1951_v6  ;;  %893 = vmatpush.bf16.msrb.mxu1 %v1629_v28 }
  0x3d   : > { %928 = vmatpush.bf16.msrb.mxu2 %v1631_v21 }
  0x40   : > { %894 = vmatpush.bf16.msrb.mxu1 %v1628_v29 }
  0x41   : > { %929 = vmatpush.bf16.msrb.mxu2 %v1630_v22 }
  0x4b   : > { %1545 = vmatmul.msk.bf16.vlgmr.msrb.gmra.mxu1 %vm715_vm1, %v1951_v6 }
  0x4c   : > { %1559 = vmatmul.msk.bf16.vlgmr.msrb.gmra.mxu2 %vm715_vm1, %v1951_v6 }
  0xb8   : > { %v728_v9 = vpop.f32.mrf.mxu0  ;;  %v763_v10 = vpop.f32.mrf.mxu1 }
  0xb9   : > { %v729_v11 = vadd.f32 %v1684_v7, %v728_v9  ;;  %v764_v12 = vadd.f32 %v1685_v8, %v763_v10 }
  0xbb   : > { %v804_v13 = vpack.c.bf16 %v764_v12, %v764_v12  ;;  %v802_v14 = vmul.f32 0.25, %v729_v11 }
  0xbd   : > { %v813_v15 = vsel %vm808_vm2, %v804_v13, 0  ;;  %v803_v18 = vpack.c.bf16 %v802_v14, %v802_v14 }
  0xbe   : > { %822 = vmatpush.bf16.xpose.msra.mxu3 %v813_v15 }
  0xbf   : > { %v798_v31 = vpop.f32.mrf.mxu2 }
  0xc0   : > { %v730_v16 = vpop.f32.mrf.mxu0  ;;  %v765_v17 = vpop.f32.mrf.mxu1  ;;  %v799_v32 = vadd.f32 %v1687_v30, %v798_v31 }
  0xc1   : > { %v1634_v17 = vld [vmem:[%s1889_s13 + $0x8] sm:$0xff] }
  0xc2   : > { %v841_v34 = vpack.c.bf16 %v799_v32, %v799_v32  ;;  %1044 = vmatpush.bf16.msra.mxu2 %v1634_v17  ;;  %v1756_v32 = vmov 32.0  }
  0xc4   : > { %v847_v36 = vsel %vm845_vm4, %v841_v34, 0 }
  0xc5   : > { %1530 = vmatmul.msk.bf16.vlgmr.msra.gmra.mxu3 %vm808_vm2, %v803_v18  ;;  %856 = vmatpush.bf16.msrb.mxu0 %v847_v36 }
  0xc6   : > { %963 = vmatpush.bf16.msrb.mxu3 %v1633_v49 }
  0xc7   : > { %v800_v38 = vpop.f32.mrf.mxu2 }
  0xc8   : > { %v896_v47 = vpop.f32.mrf.mxu1 }
  0xc9   : > { %v897_v56 = vadd.f32 %v1689_v55, %v896_v47 }
  0xca   : > { %964 = vmatpush.bf16.msrb.mxu3 %v1632_v50 }
  0xcb   : > { %v970_v57 = vmul.f32 0.25, %v897_v56  ;;  %v1693_v56 = vld [vmem:[%s2125_s28] ss:$0 sm:$0xff] }
  0xcd   : > { %v971_v58 = vpack.c.bf16 %v970_v57, %v970_v57 }
  0xce   : > { %1066 = vmatpush.bf16.msra.mxu3 %v1627_v59 }
  0xcf   : > { %v931_v42 = vpop.f32.mrf.mxu2 }
  0xd0   : > { %v932_v43 = vadd.f32 %v1688_v39, %v931_v42  ;;  %v898_v48 = vpop.f32.mrf.mxu1 }
  0xd2   : > { %v972_v44 = vpack.c.bf16 %v932_v43, %v932_v43  ;;  %v1636_v43 = vld [vmem:[%s1911_s4 + $0x8] sm:$0xff] }
  0xd4   : > { %v977_v45 = vsel %vm808_vm2, %v972_v44, 0  ;;  %v1635_v44 = vld [vmem:[%s1911_s4] sm:$0xff]  ;;  %s2124_s4 = scalar_lea.vmem %s2080_s6, %s1868_s20 }
  0xd5   : > { %986 = vmatpush.bf16.xpose.msra.mxu0 %v977_v45  ;;  %1573 = vmatmul.msk.bf16.vlgmr.msrb.gmra.mxu3 %vm715_vm1, %v1951_v6 }
  0xd7   : > { %v933_v46 = vpop.f32.mrf.mxu2 }
 0x148   : > { %v824_v24 = vpop.f32.mrf.mxu3 }
 0x149   : > { %v825_v25 = vadd.f32 %v1972_v23, %v824_v24 }
 0x14b   : > { %v829_v26 = vsel %vm828_vm3, %v825_v25, -inf }
 0x14c   : > { %830 = vmax.xlane.f32.xlu0 %v829_v26 }
 0x150   : > { %v826_v27 = vpop.f32.mrf.mxu3 }
 0x158   : > { %v966_v61 = vpop.f32.mrf.mxu3 }
 0x159   : > { %v967_v63 = vadd.f32 %v1690_v60, %v966_v61  ;;  %v1694_v61 = vld [vmem:[%s2127_s19] ss:$0 sm:$0xff] }
 0x15b   : > { %v1004_v1 = vpack.c.bf16 %v967_v63, %v967_v63 }
 0x15d   : > { %v1009_v2 = vsel %vm845_vm4, %v1004_v1, 0 }
 0x15e   : > { %1018 = vmatpush.bf16.msra.mxu1 %v1009_v2 }
 0x160   : > { %v968_v3 = vpop.f32.mrf.mxu3 }
 0x1bf   : > { %v831_v33 = vpop.xlane.xlu0 %830 }
 0x1c0   : > { %v832_v35 = vsub.f32 %v825_v25, %v831_v33  ;;  %v1691_v25 = vld [vmem:[%s2123_s26] ss:$0 sm:$0xff] }
 0x1c2   : > { %v833_v37 = vmul.f32 1.442695, %v832_v35 }
 0x1c4   : > { %1698 = vpow2.f32 %v833_v37 }
 0x1ca   : > { %v1699_v40 = vpop.eup %1698 }
 0x1cb   : > { %v835_v41 = vsel %vm828_vm3, %v1699_v40, 0.0 }
 0x1cc   : > { %836 = vadd.xlane.f32.xlu0 %v835_v41 }
 0x23f   : > { %v837_v51 = vpop.xlane.xlu0 %836 }
 0x240   : > { %1700 = vrcp.f32 %v837_v51 }
 0x246   : > { %v1701_v52 = vpop.eup %1700 }
 0x247   : > { %v839_v53 = vmul.f32 %v1701_v52, %v1699_v40 }
 0x249   : > { %v840_v54 = vpack.c.bf16 %v839_v53, %v839_v53 }
 0x24b   : > { %1531 = vmatmul.msk.bf16.vlgmr.msrb.gmra.mxu0 %vm828_vm3, %v840_v54  ;;  %v1692_v54 = vld [vmem:[%s2124_s4] ss:$0 sm:$0xff] }
 0x24c   : > { %1147 = vmatpush.bf16.msrb.mxu0 %v1636_v43 }
 0x250   : > { %1148 = vmatpush.bf16.msrb.mxu0 %v1635_v44 }
 0x25b   : > { %1574 = vmatmul.msk.bf16.vlgmr.msra.gmra.mxu0 %vm808_vm2, %v971_v58 }
 0x2c8   : > { %v858_v62 = vpop.f32.mrf.mxu0 }
 0x2c9   : > { %v862_v0 = vpack.c.bf16 %v858_v62, %v858_v62 }
 0x2cb   : > { %1587 = vmatmul.msk.bf16.vlgmr.msra.gmra.mxu3 %vm808_vm2, %v862_v0 }
 0x2d0   : > { %v860_v4 = vpop.f32.mrf.mxu0 }
 0x2d8   : > { %v988_v6 = vpop.f32.mrf.mxu0 }
 0x2d9   : > { %v989_v7 = vadd.f32 %v1972_v23, %v988_v6  ;;  %v1640_v6 = vld [vmem:[%s1925_s15 + $0x18] sm:$0xff] }
 0x2da   : > { %1239 = vmatpush.bf16.msrb.mxu1 %v1640_v6 }
 0x2db   : > { %v992_v8 = vsel %vm828_vm3, %v989_v7, -inf }
 0x2dc   : > { %993 = vmax.xlane.f32.xlu1 %v992_v8 }
 0x2e0   : > { %v990_v9 = vpop.f32.mrf.mxu0 }
 0x34e   : > { %v1068_v10 = vpop.f32.mrf.mxu3 }
 0x34f   : > { %v994_v11 = vpop.xlane.xlu1 %993 }
 0x350   : > { %v995_v12 = vsub.f32 %v989_v7, %v994_v11  ;;  %v1639_v7 = vld [vmem:[%s1925_s15 + $0x10] sm:$0xff] }
 0x351   : > { %1240 = vmatpush.bf16.msrb.mxu1 %v1639_v7 }
 0x352   : > { %v996_v13 = vmul.f32 1.442695, %v995_v12 }
 0x354   : > { %1702 = vpow2.f32 %v996_v13 }
 0x356   : > { %v1070_v14 = vpop.f32.mrf.mxu3 }
 0x35a   : > { %v1703_v15 = vpop.eup %1702 }
 0x35b   : > { %v998_v16 = vsel %vm828_vm3, %v1703_v15, 0.0 }
 0x35c   : > { %999 = vadd.xlane.f32.xlu1 %v998_v16 }
 0x3cf   : > { %v1000_v18 = vpop.xlane.xlu1 %999 }
 0x3d0   : > { %1704 = vrcp.f32 %v1000_v18 }
 0x3d1   : > { %1706 = vrcp.f32 %v1756_v32 }
 0x3d6   : > { %v1705_v19 = vpop.eup %1704 }
 0x3d7   : > { %v1002_v20 = vmul.f32 %v1705_v19, %v1703_v15  ;;  %v1707_v33 = vpop.eup %1706  ;;  %v1637_v15 = vld [vmem:[%s1925_s15] sm:$0xff] }
 0x3d8   : > { %v1084_v34 = vmul.f32 32.0, %v1707_v33  ;;  %vm1088_vm5 = vweird.f32 %v1707_v33 }
 0x3d9   : > { %v1003_v21 = vpack.c.bf16 %v1002_v20, %v1002_v20 }
 0x3da   : > { %v1085_v35 = vsub.f32 1.0, %v1084_v34 }
 0x3db   : > { %1575 = vmatmul.msk.bf16.vlgmr.msra.gmra.mxu1 %vm828_vm3, %v1003_v21 }
 0x3dc   : > { %v1086_v36 = vmul.f32 %v1707_v33, %v1085_v35 }
 0x3de   : > { %v1087_v37 = vadd.f32 %v1707_v33, %v1086_v36 }
 0x3e0   : > { %v2011_v38 = vsel %vm1088_vm5, %v1707_v33, %v1087_v37 }
 0x458   : > { %v1020_v22 = vpop.f32.mrf.mxu1 }
 0x459   : > { %v1024_v23 = vpack.c.bf16 %v1020_v22, %v1020_v22 }
 0x45b   : > { %1582 = vmatmul.msk.bf16.vlgmr.msra.gmra.mxu2 %vm808_vm2, %v1024_v23 }
 0x460   : > { %v1022_v24 = vpop.f32.mrf.mxu1 }
 0x4de   : > { %v1046_v26 = vpop.f32.mrf.mxu2 }
 0x4df   : > { %v1069_v27 = vadd.f32 %v1068_v10, %v1046_v26  ;;  %v1638_v10 = vld [vmem:[%s1925_s15 + $0x8] sm:$0xff] }
 0x4e0   : > { %1241 = vmatpush.bf16.msrb.mxu1 %v1638_v10 }
 0x4e1   : > { %v1076_v28 = vadd.f32 %v1691_v25, %v1069_v27 }
 0x4e3   : > { %v1077_v29 = vadd.f32 %v1076_v28, %v1947_v5 }
 0x4e4   : > { %1242 = vmatpush.bf16.msrb.mxu1 %v1637_v15 }
 0x4e5   : > { %v1080_v30 = vsel %vm715_vm1, %v1077_v29, 0.0 }
 0x4e6   : > { %1081 = vadd.xlane.f32.xlu2 %v1080_v30  ;;  %v1048_v31 = vpop.f32.mrf.mxu2 }
 0x559   : > { %v1082_v39 = vpop.xlane.xlu2 %1081 }
 0x55a   : > { %v1090_v40 = vmul.f32 %v2011_v38, %v1082_v39 }
 0x55c   : > { %v1091_v5 = vsub.f32 %v1077_v29, %v1090_v40 }
 0x55e   : > { %v1092_v41 = vmul.f32 %v1091_v5, %v1091_v5 }
 0x560   : > { %v1093_v42 = vsel %vm715_vm1, %v1092_v41, 0.0  ;;  %v1695_v41 = vld [vmem:[%s673_s0] ss:$0 sm:$0xff] }
 0x561   : > { %1094 = vadd.xlane.f32.xlu2 %v1093_v42 }
 0x5d4   : > { %v1095_v45 = vpop.xlane.xlu2 %1094 }
 0x5d5   : > { %v1096_v46 = vmul.f32 %v1095_v45, %v2011_v38 }
 0x5d7   : > { %v1097_v47 = vadd.f32 1e-05, %v1096_v46 }
 0x5d9   : > { %1708 = vrsqrt.f32 %v1097_v47  ;;  %vm1104_vm7 = vweird.f32 %v1097_v47 }
 0x5df   : > { %v1709_v48 = vpop.eup %1708 }
 0x5e0   : > { %v1099_v49 = vmul.f32 %v1709_v48, %v1097_v47  ;;  %vm1105_vm6 = vweird.f32 %v1709_v48 }
 0x5e1   : > { %vm1106_vm8 = vmor %vm1104_vm7, %vm1105_vm6 }
 0x5e2   : > { %v1100_v50 = vmul.f32 %v1709_v48, %v1099_v49 }
 0x5e4   : > { %v1101_v51 = vmul.f32 0.5, %v1100_v50 }
 0x5e6   : > { %v1102_v52 = vsub.f32 1.5, %v1101_v51 }
 0x5e8   : > { %v1103_v53 = vmul.f32 %v1709_v48, %v1102_v52 }
 0x5ea   : > { %v1107_v55 = vsel %vm1106_vm8, %v1709_v48, %v1103_v53 }
 0x5eb   : > { %v1108_v57 = vmul.f32 %v1107_v55, %v1091_v5 }
 0x5ed   : > { %v1112_v58 = vmul.f32 %v1692_v54, %v1108_v57 }
 0x5ef   : > { %v1116_v59 = vadd.f32 %v1693_v56, %v1112_v58 }
 0x5f1   : > { %v1117_v60 = vpack.c.bf16 %v1116_v59, %v1116_v59 }
 0x5f3   : > { %1596 = vmatmul.msk.bf16.vlgmr.msrb.gmra.mxu0 %vm715_vm1, %v1117_v60 }
 0x670   : > { %v1150_v62 = vpop.f32.mrf.mxu0 }
 0x671   : > { %v1151_v63 = vadd.f32 %v1694_v61, %v1150_v62  ;;  %v1696_v61 = vld [vmem:[%s676_s14] ss:$0 sm:$0xff] }
 0x673   : > { %v1154_v0 = vmul.f32 0.70710677, %v1151_v63  ;;  %v1191_v37 = vmul.f32 0.5, %v1151_v63 }
 0x675   : > { %v1155_v1 = vand.u32 2147483647, %v1154_v0  ;;  %vm1188_vm13 = vcmp.ge.f32.partialorder %v1154_v0, 0.0 }
 0x677   : > { %v1156_v2 = vmul.f32 0.3275911, %v1155_v1  ;;  %v1182_v20 = vsub.f32 0.0, %v1155_v1 }
 0x678   : > { %v1152_v3 = vpop.f32.mrf.mxu0 }
 0x679   : > { %v1157_v4 = vadd.f32 1.0, %v1156_v2  ;;  %v1183_v23 = vmul.f32 %v1182_v20, %v1155_v1 }
 0x67b   : > { %1710 = vrcp.f32 %v1157_v4  ;;  %v1169_v12 = vand.u32 2147483648, %v1157_v4  ;;  %v1167_v14 = vand.u32 2147483647, %v1157_v4  ;;  %vm1163_vm10 = vweird.f32 %v1157_v4 }
 0x67c   : > { %v1184_v26 = vmul.f32 1.442695, %v1183_v23 }
 0x67d   : > { %v1170_v17 = vor.u32 1.1754944e-38, %v1169_v12  ;;  %vm1168_vm12 = vcmp.eq.f32.partialorder %v1167_v14, 8.507059e+37 }
 0x67e   : > { %1712 = vpow2.f32 %v1184_v26 }
 0x681   : > { %v1711_v8 = vpop.eup %1710 }
 0x682   : > { %v1159_v9 = vmul.f32 %v1711_v8, %v1157_v4  ;;  %vm1164_vm9 = vweird.f32 %v1711_v8 }
 0x683   : > { %vm1165_vm11 = vmor %vm1163_vm10, %vm1164_vm9 }
 0x684   : > { %v1160_v11 = vsub.f32 1.0, %v1159_v9  ;;  %v1713_v32 = vpop.eup %1712 }
 0x686   : > { %v1161_v13 = vmul.f32 %v1711_v8, %v1160_v11 }
 0x688   : > { %v1162_v16 = vadd.f32 %v1711_v8, %v1161_v13 }
 0x68a   : > { %v1166_v18 = vsel %vm1165_vm11, %v1711_v8, %v1162_v16 }
 0x68b   : > { %v1171_v19 = vsel %vm1168_vm12, %v1170_v17, %v1166_v18 }
 0x68c   : > { %v1173_v21 = vmul.f32 1.0614054, %v1171_v19 }
 0x68e   : > { %v1597_v22 = vadd.f32 -1.4531521, %v1173_v21 }
 0x690   : > { %v1175_v24 = vmul.f32 %v1597_v22, %v1171_v19 }
 0x692   : > { %v1176_v25 = vadd.f32 1.4214138, %v1175_v24 }
 0x694   : > { %v1177_v27 = vmul.f32 %v1176_v25, %v1171_v19 }
 0x696   : > { %v1598_v28 = vadd.f32 -0.28449672, %v1177_v27 }
 0x698   : > { %v1179_v29 = vmul.f32 %v1598_v28, %v1171_v19 }
 0x69a   : > { %v1180_v30 = vadd.f32 0.2548296, %v1179_v29 }
 0x69c   : > { %v1181_v31 = vmul.f32 %v1180_v30, %v1171_v19 }
 0x69e   : > { %v1186_v33 = vmul.f32 %v1713_v32, %v1181_v31 }
 0x6a0   : > { %v1187_v34 = vsub.f32 1.0, %v1186_v33 }
 0x6a2   : > { %v1189_v35 = vsub.f32 0.0, %v1187_v34 }
 0x6a4   : > { %v1190_v36 = vsel %vm1188_vm13, %v1187_v34, %v1189_v35 }
 0x6a5   : > { %v1192_v39 = vadd.f32 1.0, %v1190_v36 }
 0x6a7   : > { %v1193_v40 = vmul.f32 %v1192_v39, %v1191_v37 }
 0x6a9   : > { %v1194_v5 = vpack.c.bf16 %v1193_v40, %v1193_v40 }
 0x6ab   : > { %1615 = vmatmul.msk.bf16.vlgmr.msrb.gmra.mxu1 %vm1231_vm14, %v1194_v5 }
 0x728   : > { %v1244_v42 = vpop.f32.mrf.mxu1 }
 0x729   : > { %v1245_v43 = vadd.f32 %v1695_v41, %v1244_v42 }
 0x72b   : > { %v1248_v44 = vadd.f32 %v1245_v43, %v1116_v59 }
 0x72d   : > { %v1251_v45 = vsel %vm715_vm1, %v1248_v44, 0.0 }
 0x72e   : > { %1252 = vadd.xlane.f32.xlu0 %v1251_v45 }
 0x730   : > { %v1246_v46 = vpop.f32.mrf.mxu1 }
 0x7a1   : > { %v1253_v47 = vpop.xlane.xlu0 %1252 }
 0x7a2   : > { %v1254_v48 = vmul.f32 %v1253_v47, %v2011_v38 }
 0x7a4   : > { %v1255_v49 = vsub.f32 %v1248_v44, %v1254_v48 }
 0x7a6   : > { %v1256_v50 = vmul.f32 %v1255_v49, %v1255_v49 }
 0x7a8   : > { %v1257_v51 = vsel %vm715_vm1, %v1256_v50, 0.0 }
 0x7a9   : > { %1258 = vadd.xlane.f32.xlu1 %v1257_v51 }
 0x81c   : > { %v1259_v52 = vpop.xlane.xlu1 %1258 }
 0x81d   : > { %v1260_v53 = vmul.f32 %v1259_v52, %v2011_v38  ;;  %v1697_v38 = vld [vmem:[%s679_s8] ss:$0 sm:$0xff] }
 0x81f   : > { %v1261_v54 = vadd.f32 1e-05, %v1260_v53 }
 0x821   : > { %1714 = vrsqrt.f32 %v1261_v54  ;;  %vm1268_vm0 = vweird.f32 %v1261_v54 }
 0x827   : > { %v1715_v55 = vpop.eup %1714 }
 0x828   : > { %v1263_v56 = vmul.f32 %v1715_v55, %v1261_v54  ;;  %vm1269_vm15 = vweird.f32 %v1715_v55 }
 0x829   : > { %vm1270_vm2 = vmor %vm1268_vm0, %vm1269_vm15 }
 0x82a   : > { %v1264_v57 = vmul.f32 %v1715_v55, %v1263_v56 }
 0x82c   : > { %v1265_v58 = vmul.f32 0.5, %v1264_v57 }
 0x82e   : > { %v1266_v59 = vsub.f32 1.5, %v1265_v58 }
 0x830   : > { %v1267_v60 = vmul.f32 %v1715_v55, %v1266_v59 }
 0x832   : > { %v1271_v62 = vsel %vm1270_vm2, %v1715_v55, %v1267_v60 }
 0x833   : > { %v1272_v63 = vmul.f32 %v1271_v62, %v1255_v49 }
 0x835   : > { %v1276_v0 = vmul.f32 %v1696_v61, %v1272_v63 }
 0x837   : > { %v1280_v1 = vadd.f32 %v1697_v38, %v1276_v0 }
 0x839   : > { %1281 = vst.msk [vmem:[%s1938_s9] sm:$0xff] %vm715_vm1, %v1280_v1 }
 0x83a PF: > { %s2129_s23 = sld [smem:[#allocation5_spill]] }
 0x83b   : > { %s2130_s29 = sld [smem:[#allocation3_spill]] }
 0x83c   : > { %s2131_s30 = sld [smem:[#allocation4_spill]] }
 0x83d   : > { %s2132_s15 = sld [smem:[#allocation6_spill]] }
 0x83e   : > { %s2133_s16 = sld [smem:[#allocation7_spill]] }
 0x840   : > { %s24_s17 = sadd.s32 1, %s2129_s23  }
 0x841   : > { %p21_p8 = scmp.ge.s32.totalorder %s24_s17, 6  }
 0x843   :  { %23 = sbr.rel (!%p21_p8) target bundleno = 10 (0xa), region = 160 }

// kernel: fwd.4
= control target key start
LH: loop header
LB: loop body
LE: loop exit
PB: predicated region body
PF: predicated region fallthrough
CT: control target
= control target key end

     0   :  { %s2759_s25 = smov 0   ;;  %s2761_s26 = smov 0   ;;  %s3109_s0 = inlined_call_operand.vmem [shape: f32[2,8,32], index: 0, kind: input, shape index: {}]   ;;  %s3110_s1 = inlined_call_operand.vmem [shape: f32[2,8,32], index: 1, kind: input, shape index: {}]   ;;  %s3111_s2 = inlined_call_operand.vmem [shape: f32[2,1,8], index: 2, kind: input, shape index: {}]   ;;  %s3112_s3 = inlined_call_operand.vmem [shape: bf16[2,6,32,16], index: 3, kind: input, shape index: {}]   ;;  %s3113_s4 = inlined_call_operand.vmem [shape: f32[2,6,1,16], index: 4, kind: input, shape index: {}]   ;;  %s3114_s5 = inlined_call_operand.vmem [shape: bf16[2,2,16,32], index: 5, kind: input, shape index: {}]   ;;  %s3115_s6 = inlined_call_operand.vmem [shape: f32[2,1,32], index: 6, kind: input, shape index: {}]   ;;  %s3116_s7 = inlined_call_operand.vmem [shape: f32[2,1,32], index: 7, kind: input, shape index: {}]   ;;  %s3117_s8 = inlined_call_operand.vmem [shape: f32[2,1,32], index: 8, kind: input, shape index: {}]   ;;  %s3118_s9 = inlined_call_operand.vmem [shape: bf16[2,6,32,16], index: 9, kind: input, shape index: {}]   ;;  %s3119_s10 = inlined_call_operand.vmem [shape: f32[2,6,1,16], index: 10, kind: input, shape index: {}]   ;;  %s3120_s11 = inlined_call_operand.vmem [shape: bf16[2,2,16,32], index: 11, kind: input, shape index: {}]   ;;  %s3121_s12 = inlined_call_operand.vmem [shape: f32[2,1,32], index: 12, kind: input, shape index: {}]   ;;  %s3122_s13 = inlined_call_operand.vmem [shape: f32[2,1,32], index: 13, kind: input, shape index: {}]   ;;  %s3123_s14 = inlined_call_operand.vmem [shape: f32[2,1,32], index: 14, kind: input, shape index: {}]   ;;  %s3124_s15 = inlined_call_operand.vmem [shape: bf16[2,32,64], index: 15, kind: input, shape index: {}]   ;;  %s3125_s16 = inlined_call_operand.vmem [shape: f32[2,1,64], index: 16, kind: input, shape index: {}]   ;;  %s3126_s17 = inlined_call_operand.vmem [shape: bf16[2,64,32], index: 17, kind: input, shape index: {}]   ;;  %s3127_s18 = inlined_call_operand.vmem [shape: f32[2,1,32], index: 18, kind: input, shape index: {}]   ;;  %s3128_s19 = inlined_call_operand.vmem [shape: f32[2,1,32], index: 19, kind: input, shape index: {}]   ;;  %s3129_s20 = inlined_call_operand.vmem [shape: f32[2,1,32], index: 20, kind: input, shape index: {}]   ;;  %s3130_s21 = inlined_call_operand.vmem [shape: f32[2,8,32], index: 21, kind: output, shape index: {}]  }
   0x1   :  { %3139 = sst [smem:[#allocation12_spill]] %s3109_s0  ;;  %s2763_s27 = smov 0  }
   0x2   :  { %3140 = sst [smem:[#allocation13_spill]] %s3110_s1 }
   0x3   :  { %3141 = sst [smem:[#allocation14_spill]] %s3111_s2  ;;  %s2757_s2 = smov 0  }
   0x4   :  { %3142 = sst [smem:[#allocation15_spill]] %s3112_s3  ;;  %s2765_s3 = smov 0  }
   0x5   :  { %3143 = sst [smem:[#allocation16_spill]] %s3113_s4 }
   0x6   :  { %3144 = sst [smem:[#allocation17_spill]] %s3114_s5 }
   0x7   :  { %3145 = sst [smem:[#allocation18_spill]] %s3118_s9 }
   0x8   :  { %3146 = sst [smem:[#allocation19_spill]] %s3119_s10 }
   0x9   :  { %3147 = sst [smem:[#allocation20_spill]] %s3120_s11 }
   0xa   :  { %3148 = sst [smem:[#allocation21_spill]] %s3121_s12 }
   0xb   :  { %3149 = sst [smem:[#allocation22_spill]] %s3122_s13 }
   0xc   :  { %3150 = sst [smem:[#allocation23_spill]] %s3123_s14 }
   0xd   :  { %3151 = sst [smem:[#allocation24_spill]] %s3124_s15 }
   0xe   :  { %3152 = sst [smem:[#allocation25_spill]] %s3125_s16 }
   0xf   :  { %3153 = sst [smem:[#allocation26_spill]] %s3126_s17 }
  0x10   :  { %3154 = sst [smem:[#allocation27_spill]] %s3127_s18 }
  0x11   :  { %3155 = sst [smem:[#allocation28_spill]] %s3128_s19 }
  0x12   :  { %3156 = sst [smem:[#allocation29_spill]] %s3129_s20 }
  0x13   :  { %3157 = sst [smem:[#allocation30_spill]] %s3130_s21 }
  0x14 LB: > { %3158 = sst [smem:[#allocation2_spill]] %s2627_s2  ;;  %s40_s28 = sadd.s32 1, %s2635_s26  ;;  %s2643_s3 = sphi %s2765_s3, %s31_s3   ;;  %s2639_s27 = sphi %s2763_s27, %s3214_s27   ;;  %s2635_s26 = sphi %s2761_s26, %s3213_s26   ;;  %s2631_s25 = sphi %s2759_s25, %s3212_s25   ;;  %s2627_s2 = sphi %s2757_s2, %s3211_s2  }
  0x15   : > { %3159 = sst [smem:[#allocation3_spill]] %s2635_s26  ;;  %s43_s29 = sadd.s32 1, %s2639_s27 }
  0x16   : > { %3160 = sst [smem:[#allocation4_spill]] %s2639_s27  ;;  %p41_p0 = scmp.ge.s32.totalorder %s40_s28, 2 }
  0x17   : > { %3161 = sst [smem:[#allocation5_spill]] %s2643_s3  ;;  %p2243_p1 = scmp.ge.s32.totalorder %s2643_s3, 1 }
  0x18   : > { %p773_p2 = scmp.lt.s32.totalorder %s2643_s3, 5  ;;  %s3216_s28 = smov (%p41_p0, %s40_s28), 0 }
  0x19   : > { %3162 = sst [smem:[#allocation6_spill]] %s3216_s28  ;;  %s3218_s29 = smov (!%p41_p0, %s43_s29), %s2639_s27 }
  0x1a   : > { %p774_p3 = pnand %p2243_p1, %p773_p2  ;;  %p45_p4 = scmp.ge.s32.totalorder %s3218_s29, 2 }
  0x1c   : > { %s3220_s29 = smov (%p45_p4, %s3218_s29), 0  ;;  %777 = sbr.rel (%p774_p3) target bundleno = 3535 (0xdcf), region = 104 }
  0x1d   : > { %3163 = sst [smem:[#allocation7_spill]] %s3220_s29 }
  0x21   : > { %p906_p5 = scmp.lt.s32.totalorder %s2631_s25, 1  ;;  %p917_p6 = scmp.lt.s32.totalorder %s2627_s2, 1 }
  0x22   : > { %s3166_s29 = sld [smem:[#allocation12_spill]] }
  0x23   : > { %s3222_s25 = smov (!%p906_p5, %s2631_s25), 1  ;;  %s3168_s18 = sld [smem:[#allocation17_spill]] }
  0x24   : > { %3164 = sst [smem:[#allocation8_spill]] %s3222_s25  ;;  %s2796_s4 = sshll.u32 %s3222_s25, 3 }
  0x25   : > { %s2793_s0 = scalar_select %p917_p6, %s2627_s2, 1 }
  0x26   : > { %s3170_s1 = sld [smem:[#allocation15_spill]] }
  0x27   : > { %s2514_s21 = smul.u32 96, %s2793_s0  ;;  %s2476_s20 = sshll.u32 %s2793_s0, 4 }
  0x28   : > { %s909_s28 = scalar_lea.vmem %s3166_s29, %s2796_s4  ;;  %s2515_s19 = smul.u32 6, %s2793_s0 }
  0x29   : > { %s2816_s17 = scalar_lea.vmem %s3168_s18, %s2476_s20  ;;  %s3172_s25 = sld [smem:[#allocation16_spill]] }
  0x2a   : > { %3169 = sst [smem:[#allocation9_spill]] %s2816_s17 }
  0x2b   : > { %s3173_s9 = sld [smem:[#allocation18_spill]] }
  0x2c   : > { %s2821_s29 = scalar_lea.vmem %s3170_s1, %s2514_s21  ;;  %s3174_s10 = sld [smem:[#allocation19_spill]] }
  0x2d   : > { %3171 = sst [smem:[#allocation10_spill]] %s2821_s29 }
  0x2e   : > { %s3175_s11 = sld [smem:[#allocation20_spill]] }
  0x2f   : > { %s2830_s16 = scalar_lea.vmem %s3172_s25, %s2515_s19  ;;  %s3180_s15 = sld [smem:[#allocation24_spill]] }
  0x30   : > { %s3182_s23 = sld [smem:[#allocation26_spill]] }
  0x31   : > { %s2843_s24 = scalar_lea.vmem %s3173_s9, %s2514_s21  ;;  %s3183_s17 = sld [smem:[#allocation27_spill]] }
  0x32   : > { %s2848_s2 = scalar_lea.vmem %s3174_s10, %s2515_s19  ;;  %s3184_s14 = sld [smem:[#allocation28_spill]] }
  0x33   : > { %s3186_s3 = sld [smem:[#allocation30_spill]] }
  0x34   : > { %s2853_s30 = scalar_lea.vmem %s3175_s11, %s2476_s20  ;;  %s3187_s5 = sld [smem:[#allocation2_spill]] }
  0x35   : > { %3176 = sst [smem:[#allocation11_spill]] %s2853_s30  ;;  %s2870_s26 = scalar_lea.vmem %s3180_s15, %s2476_s20 }
  0x36   : > { %s2479_s30 = sshll.u32 %s2793_s0, 5  ;;  %s3185_s15 = sld [smem:[#allocation29_spill]] }
  0x37   : > { %s2880_s12 = scalar_lea.vmem %s3182_s23, %s2479_s30  ;;  %s978_s21 = scalar_lea.vmem %s3183_s17, %s2793_s0 }
  0x38   : > { %s981_s27 = scalar_lea.vmem %s3184_s14, %s2793_s0 }
  0x39   : > { %s2898_s11 = scalar_lea.vmem %s3186_s3, %s2796_s4 }
  0x3a   : > { %p2257_p7 = scmp.ne.s32.totalorder %s3187_s5, 0 }
  0x3c   : > { %s984_s13 = scalar_lea.vmem %s3185_s15, %s2793_s0  ;;  %993 = sbr.rel (%p2257_p7) target bundleno = 67 (0x43), region = 108 }
  0x41   : > { %v994_v0 = vld [vmem:[%s909_s28] sm:$0xff]  ;;  %vm995_vm0 = vcmask 261120  }
  0x42   : > { %996 = vst.msk [vmem:[%s2898_s11] sm:$0xff] %vm995_vm0, %v994_v0 }
  0x43 PF: > { %s3188_s30 = sld [smem:[#allocation10_spill]]  ;;  %vm1026_vm1 = vcmask 261120   ;;  %v2558_v7 = vld [vmem:[%s2830_s16] ss:$0 sm:$0xff]  ;;  %v2559_v8 = vld [vmem:[%s2830_s16 + $0x2] ss:$0 sm:$0xff]  ;;  %v999_v23 = vlaneseq  ;;  %s3193_s22 = scalar_lea.vmem %s3116_s7, %s2793_s0 }
  0x44   : > { %vm1116_vm2 = vcmask 130048   ;;  %v2645_v26 = vmov 0.0   ;;  %vm1136_vm4 = vcmask 64512   ;;  %v2560_v34 = vld [vmem:[%s2830_s16 + $0x4] ss:$0 sm:$0xff]  ;;  %vm1153_vm5 = vcmask 1043456   ;;  %s3194_s19 = scalar_lea.vmem %s3117_s8, %s2793_s0 }
  0x45   : > { %v1000_v24 = vshrl.u32 %v999_v23, 7  ;;  %v1002_v25 = vand.u32 127, %v999_v23  ;;  %v2561_v43 = vld [vmem:[%s2830_s16 + $0x3] ss:$0 sm:$0xff]  ;;  %s3189_s9 = sld [smem:[#allocation9_spill]]  ;;  %vm1917_vm13 = vcmask 523264  }
  0x46   : > { %v2562_v59 = vld [vmem:[%s2830_s16 + $0x1] ss:$0 sm:$0xff]  ;;  %v2563_v0 = vld [vmem:[%s2830_s16 + $0x5] ss:$0 sm:$0xff]  ;;  %s3190_s16 = scalar_lea.vmem %s3115_s6, %s2793_s0  ;;  %s3191_s17 = sld [smem:[#allocation13_spill]] }
  0x47   : > { %vm1003_vm3 = vcmp.gt.s32.totalorder %v1002_v25, %v1000_v24  ;;  %s3195_s25 = sld [smem:[#allocation8_spill]] }
  0x48   : > { %v2927_v27 = vsel %vm1003_vm3, -1e+30, %v2645_v26  ;;  %s3196_s5 = sld [smem:[#allocation14_spill]] }
  0x49   : > { %v2481_v1 = vld [vmem:[%s3188_s30 + $0x8] sm:$0xff]  ;;  %v2480_v3 = vld [vmem:[%s3188_s30] sm:$0xff]  ;;  %v2490_v21 = vld [vmem:[%s3188_s30 + $0x38] sm:$0xff]  ;;  %s3199_s14 = sld [smem:[#allocation21_spill]] }
  0x4a   : > { %v2483_v2 = vld [vmem:[%s3188_s30 + $0x28] sm:$0xff]  ;;  %v2482_v4 = vld [vmem:[%s3188_s30 + $0x20] sm:$0xff]  ;;  %1036 = vmatpush.bf16.msra.mxu0 %v2481_v1  ;;  %v2489_v22 = vld [vmem:[%s3188_s30 + $0x30] sm:$0xff]  ;;  %s3201_s28 = sld [smem:[#allocation22_spill]] }
  0x4b   : > { %1071 = vmatpush.bf16.msra.mxu1 %v2483_v2  ;;  %v2907_v5 = vld [vmem:[%s2898_s11] sm:$0xff]  ;;  %v2485_v19 = vld [vmem:[%s3188_s30 + $0x48] sm:$0xff]  ;;  %v2488_v32 = vld [vmem:[%s3188_s30 + $0x18] sm:$0xff]  ;;  %s3205_s20 = sld [smem:[#allocation25_spill]] }
  0x4c   : > { %v2911_v6 = vpack.c.bf16 %v2907_v5, %v2907_v5  ;;  %1106 = vmatpush.bf16.msra.mxu2 %v2485_v19  ;;  %v2484_v20 = vld [vmem:[%s3188_s30 + $0x40] sm:$0xff]  ;;  %v2487_v33 = vld [vmem:[%s3188_s30 + $0x10] sm:$0xff]  ;;  %v2492_v53 = vld [vmem:[%s3188_s30 + $0x58] sm:$0xff]  ;;  %s3192_s18 = scalar_lea.vmem %s3191_s17, %s2796_s4  ;;  %s3203_s4 = sld [smem:[#allocation23_spill]] }
  0x4d   : > { %v2491_v54 = vld [vmem:[%s3188_s30 + $0x50] sm:$0xff]  ;;  %v2486_v63 = vld [vmem:[%s3189_s9] sm:$0xff] }
  0x4e   : > { %1037 = vmatpush.bf16.msra.mxu0 %v2480_v3  ;;  %s3197_s30 = scalar_lea.vmem %s3196_s5, %s3195_s25 }
  0x4f   : > { %1072 = vmatpush.bf16.msra.mxu1 %v2482_v4  ;;  %s3200_s15 = scalar_lea.vmem %s3199_s14, %s2793_s0 }
  0x50   : > { %1107 = vmatpush.bf16.msra.mxu2 %v2484_v20  ;;  %s3202_s23 = scalar_lea.vmem %s3201_s28, %s2793_s0 }
  0x51   : > { %2266 = vmatmul.msk.bf16.vlgmr.msra.gmra.mxu0 %vm1026_vm1, %v2911_v6 }
  0x52   : > { %2280 = vmatmul.msk.bf16.vlgmr.msra.gmra.mxu1 %vm1026_vm1, %v2911_v6  ;;  %s3204_s1 = scalar_lea.vmem %s3203_s4, %s2793_s0 }
  0x53   : > { %2294 = vmatmul.msk.bf16.vlgmr.msra.gmra.mxu2 %vm1026_vm1, %v2911_v6  ;;  %1201 = vmatpush.bf16.msrb.mxu1 %v2488_v32 }
  0x54   : > { %1236 = vmatpush.bf16.msrb.mxu2 %v2490_v21  ;;  %v2493_v21 = vld [vmem:[%s3189_s9 + $0x8] sm:$0xff]  ;;  %s3198_s9 = sld [smem:[#allocation11_spill]] }
  0x57   : > { %1202 = vmatpush.bf16.msrb.mxu1 %v2487_v33 }
  0x58   : > { %1237 = vmatpush.bf16.msrb.mxu2 %v2489_v22 }
  0x5c   : > { %1352 = vmatpush.bf16.msra.mxu2 %v2493_v21 }
  0x62   : > { %2310 = vmatmul.msk.bf16.vlgmr.msrb.gmra.mxu1 %vm1026_vm1, %v2911_v6 }
  0x63   : > { %2324 = vmatmul.msk.bf16.vlgmr.msrb.gmra.mxu2 %vm1026_vm1, %v2911_v6 }
  0xce   : > { %v1039_v9 = vpop.f32.mrf.mxu0 }
  0xcf   : > { %v1074_v10 = vpop.f32.mrf.mxu1  ;;  %v1040_v11 = vadd.f32 %v2558_v7, %v1039_v9 }
  0xd0   : > { %v1075_v12 = vadd.f32 %v2559_v8, %v1074_v10 }
  0xd1   : > { %v1113_v14 = vmul.f32 0.25, %v1040_v11 }
  0xd2   : > { %v1115_v13 = vpack.c.bf16 %v1075_v12, %v1075_v12 }
  0xd3   : > { %v1114_v18 = vpack.c.bf16 %v1113_v14, %v1113_v14 }
  0xd4   : > { %v1121_v15 = vsel %vm1116_vm2, %v1115_v13, 0 }
  0xd5   : > { %1130 = vmatpush.bf16.xpose.msra.mxu3 %v1121_v15 }
  0xd6   : > { %v1041_v16 = vpop.f32.mrf.mxu0  ;;  %v1109_v35 = vpop.f32.mrf.mxu2 }
  0xd7   : > { %v1076_v17 = vpop.f32.mrf.mxu1  ;;  %v1110_v36 = vadd.f32 %v2560_v34, %v1109_v35 }
  0xd9   : > { %v1149_v38 = vpack.c.bf16 %v1110_v36, %v1110_v36  ;;  %v2646_v36 = vmov 32.0  }
  0xdb   : > { %v1155_v40 = vsel %vm1153_vm5, %v1149_v38, 0 }
  0xdc   : > { %2295 = vmatmul.msk.bf16.vlgmr.msra.gmra.mxu3 %vm1116_vm2, %v1114_v18  ;;  %1164 = vmatpush.bf16.msrb.mxu0 %v1155_v40 }
  0xdd   : > { %1271 = vmatpush.bf16.msrb.mxu3 %v2492_v53  ;;  %v2494_v53 = vld [vmem:[%s2843_s24] sm:$0xff] }
  0xde   : > { %v1111_v42 = vpop.f32.mrf.mxu2 }
  0xdf   : > { %v1204_v51 = vpop.f32.mrf.mxu1 }
  0xe0   : > { %v1205_v60 = vadd.f32 %v2562_v59, %v1204_v51  ;;  %v2495_v51 = vld [vmem:[%s2843_s24 + $0x8] sm:$0xff] }
  0xe1   : > { %1272 = vmatpush.bf16.msrb.mxu3 %v2491_v54  ;;  %v2501_v54 = vld [vmem:[%s2843_s24 + $0x10] sm:$0xff] }
  0xe2   : > { %v1278_v61 = vmul.f32 0.25, %v1205_v60 }
  0xe4   : > { %v1279_v62 = vpack.c.bf16 %v1278_v61, %v1278_v61 }
  0xe5   : > { %1374 = vmatpush.bf16.msra.mxu3 %v2486_v63 }
  0xe6   : > { %v1239_v46 = vpop.f32.mrf.mxu2 }
  0xe7   : > { %v1240_v47 = vadd.f32 %v2561_v43, %v1239_v46  ;;  %v1206_v52 = vpop.f32.mrf.mxu1 }
  0xe8   : > { %v2502_v52 = vld [vmem:[%s2843_s24 + $0x18] sm:$0xff] }
  0xe9   : > { %v1280_v48 = vpack.c.bf16 %v1240_v47, %v1240_v47  ;;  %v2497_v47 = vld [vmem:[%s2843_s24 + $0x28] sm:$0xff] }
  0xeb   : > { %v1285_v49 = vsel %vm1116_vm2, %v1280_v48, 0  ;;  %v2496_v48 = vld [vmem:[%s2843_s24 + $0x20] sm:$0xff] }
  0xec   : > { %1294 = vmatpush.bf16.xpose.msra.mxu0 %v1285_v49  ;;  %2338 = vmatmul.msk.bf16.vlgmr.msrb.gmra.mxu3 %vm1026_vm1, %v2911_v6  ;;  %v998_v49 = vld [vmem:[%s3192_s18] sm:$0xff] }
  0xee   : > { %v1241_v50 = vpop.f32.mrf.mxu2 }
  0xef   : > { %v2977_v50 = vpack.c.bf16 %v998_v49, %v998_v49  ;;  %v2505_v49 = vld [vmem:[%s2843_s24 + $0x50] sm:$0xff] }
 0x15f   : > { %v1132_v28 = vpop.f32.mrf.mxu3 }
 0x160   : > { %v1133_v29 = vadd.f32 %v1132_v28, %v2927_v27 }
 0x162   : > { %v1137_v30 = vsel %vm1136_vm4, %v1133_v29, -inf }
 0x163   : > { %1138 = vmax.xlane.f32.xlu0 %v1137_v30 }
 0x167   : > { %v1134_v31 = vpop.f32.mrf.mxu3 }
 0x16f   : > { %v1274_v1 = vpop.f32.mrf.mxu3 }
 0x170   : > { %v1275_v3 = vadd.f32 %v2563_v0, %v1274_v1  ;;  %v2565_v0 = vld [vmem:[%s3193_s22] ss:$0 sm:$0xff] }
 0x172   : > { %v1312_v7 = vpack.c.bf16 %v1275_v3, %v1275_v3 }
 0x174   : > { %v1317_v6 = vsel %vm1153_vm5, %v1312_v7, 0 }
 0x175   : > { %1326 = vmatpush.bf16.msra.mxu1 %v1317_v6 }
 0x177   : > { %v1276_v8 = vpop.f32.mrf.mxu3 }
 0x178   : > { %v2567_v8 = vld [vmem:[%s2848_s2 + $0x2] ss:$0 sm:$0xff] }
 0x179   : > { %1495 = vmatpush.bf16.msrb.mxu1 %v2497_v47 }
 0x17d   : > { %1496 = vmatpush.bf16.msrb.mxu1 %v2496_v48  ;;  %v2506_v48 = vld [vmem:[%s2843_s24 + $0x58] sm:$0xff] }
 0x1d6   : > { %v1139_v37 = vpop.xlane.xlu0 %1138 }
 0x1d7   : > { %v1140_v39 = vsub.f32 %v1133_v29, %v1139_v37  ;;  %v2564_v29 = vld [vmem:[%s3190_s16] ss:$0 sm:$0xff] }
 0x1d9   : > { %v1141_v41 = vmul.f32 1.442695, %v1140_v39 }
 0x1db   : > { %2581 = vpow2.f32 %v1141_v41 }
 0x1e1   : > { %v2582_v44 = vpop.eup %2581 }
 0x1e2   : > { %v1143_v45 = vsel %vm1136_vm4, %v2582_v44, 0.0 }
 0x1e3   : > { %1144 = vadd.xlane.f32.xlu0 %v1143_v45 }
 0x256   : > { %v1145_v55 = vpop.xlane.xlu0 %1144 }
 0x257   : > { %2583 = vrcp.f32 %v1145_v55 }
 0x25d   : > { %v2584_v56 = vpop.eup %2583 }
 0x25e   : > { %v1147_v57 = vmul.f32 %v2584_v56, %v2582_v44 }
 0x260   : > { %v1148_v58 = vpack.c.bf16 %v1147_v57, %v1147_v57 }
 0x262   : > { %2296 = vmatmul.msk.bf16.vlgmr.msrb.gmra.mxu0 %vm1136_vm4, %v1148_v58 }
 0x263   : > { %1457 = vmatpush.bf16.msrb.mxu0 %v2495_v51 }
 0x267   : > { %1458 = vmatpush.bf16.msrb.mxu0 %v2494_v53 }
 0x272   : > { %2339 = vmatmul.msk.bf16.vlgmr.msra.gmra.mxu0 %vm1116_vm2, %v1279_v62 }
 0x2df   : > { %v1166_v2 = vpop.f32.mrf.mxu0 }
 0x2e0   : > { %v1170_v4 = vpack.c.bf16 %v1166_v2, %v1166_v2  ;;  %v2566_v2 = vld [vmem:[%s3194_s19] ss:$0 sm:$0xff]  ;;  %s3206_s19 = scalar_lea.vmem %s3205_s20, %s2793_s0 }
 0x2e2   : > { %2352 = vmatmul.msk.bf16.vlgmr.msra.gmra.mxu3 %vm1116_vm2, %v1170_v4 }
 0x2e7   : > { %v1168_v9 = vpop.f32.mrf.mxu0 }
 0x2ef   : > { %v1296_v10 = vpop.f32.mrf.mxu0 }
 0x2f0   : > { %v1297_v11 = vadd.f32 %v1296_v10, %v2927_v27 }
 0x2f2   : > { %v1300_v12 = vsel %vm1136_vm4, %v1297_v11, -inf }
 0x2f3   : > { %1301 = vmax.xlane.f32.xlu1 %v1300_v12 }
 0x2f7   : > { %v1298_v13 = vpop.f32.mrf.mxu0 }
 0x365   : > { %v1376_v14 = vpop.f32.mrf.mxu3 }
 0x366   : > { %v1302_v15 = vpop.xlane.xlu1 %1301 }
 0x367   : > { %v1303_v16 = vsub.f32 %v1297_v11, %v1302_v15 }
 0x369   : > { %v1304_v17 = vmul.f32 1.442695, %v1303_v16 }
 0x36b   : > { %2585 = vpow2.f32 %v1304_v17 }
 0x36d   : > { %v1378_v18 = vpop.f32.mrf.mxu3 }
 0x371   : > { %v2586_v19 = vpop.eup %2585 }
 0x372   : > { %v1306_v20 = vsel %vm1136_vm4, %v2586_v19, 0.0 }
 0x373   : > { %1307 = vadd.xlane.f32.xlu1 %v1306_v20 }
 0x3e6   : > { %v1308_v22 = vpop.xlane.xlu1 %1307 }
 0x3e7   : > { %2587 = vrcp.f32 %v1308_v22  ;;  %v2499_v22 = vld [vmem:[%s2843_s24 + $0x48] sm:$0xff] }
 0x3e8   : > { %2589 = vrcp.f32 %v2646_v36  ;;  %1530 = vmatpush.bf16.msrb.mxu2 %v2499_v22 }
 0x3ed   : > { %v2588_v23 = vpop.eup %2587 }
 0x3ee   : > { %v1310_v24 = vmul.f32 %v2588_v23, %v2586_v19  ;;  %v2590_v37 = vpop.eup %2589  ;;  %v2498_v23 = vld [vmem:[%s2843_s24 + $0x40] sm:$0xff] }
 0x3ef   : > { %v1392_v38 = vmul.f32 32.0, %v2590_v37  ;;  %vm1396_vm6 = vweird.f32 %v2590_v37  ;;  %1531 = vmatpush.bf16.msrb.mxu2 %v2498_v23 }
 0x3f0   : > { %v1311_v25 = vpack.c.bf16 %v1310_v24, %v1310_v24  ;;  %v2504_v24 = vld [vmem:[%s2843_s24 + $0x38] sm:$0xff] }
 0x3f1   : > { %v1393_v39 = vsub.f32 1.0, %v1392_v38 }
 0x3f2   : > { %2340 = vmatmul.msk.bf16.vlgmr.msra.gmra.mxu1 %vm1136_vm4, %v1311_v25  ;;  %v2503_v25 = vld [vmem:[%s2843_s24 + $0x30] sm:$0xff] }
 0x3f3   : > { %v1394_v40 = vmul.f32 %v2590_v37, %v1393_v39  ;;  %1625 = vmatpush.bf16.msra.mxu1 %v2502_v52 }
 0x3f5   : > { %v1395_v41 = vadd.f32 %v2590_v37, %v1394_v40  ;;  %v2572_v40 = vld [vmem:[%s2848_s2 + $0x3] ss:$0 sm:$0xff] }
 0x3f7   : > { %v2966_v42 = vsel %vm1396_vm6, %v2590_v37, %v1395_v41  ;;  %1626 = vmatpush.bf16.msra.mxu1 %v2501_v54 }
 0x402   : > { %2375 = vmatmul.msk.bf16.vlgmr.msrb.gmra.mxu1 %vm1026_vm1, %v2977_v50 }
 0x46f   : > { %v1328_v26 = vpop.f32.mrf.mxu1 }
 0x470   : > { %v1332_v27 = vpack.c.bf16 %v1328_v26, %v1328_v26  ;;  %v2570_v26 = vld [vmem:[%s3197_s30] ss:$0 sm:$0xff] }
 0x472   : > { %2347 = vmatmul.msk.bf16.vlgmr.msra.gmra.mxu2 %vm1116_vm2, %v1332_v27 }
 0x473   : > { %1660 = vmatpush.bf16.msra.mxu2 %v2504_v24 }
 0x477   : > { %v1330_v28 = vpop.f32.mrf.mxu1  ;;  %1661 = vmatpush.bf16.msra.mxu2 %v2503_v25  ;;  %v2574_v25 = vld [vmem:[%s3200_s15] ss:$0 sm:$0xff] }
 0x47f   : > { %v1498_v9 = vpop.f32.mrf.mxu1 }
 0x480   : > { %v1499_v10 = vadd.f32 %v2567_v8, %v1498_v9 }
 0x482   : > { %v1539_v11 = vpack.c.bf16 %v1499_v10, %v1499_v10  ;;  %2389 = vmatmul.msk.bf16.vlgmr.msrb.gmra.mxu2 %vm1026_vm1, %v2977_v50 }
 0x484   : > { %v1547_v12 = vsel %vm1116_vm2, %v1539_v11, 0 }
 0x485   : > { %1556 = vmatpush.bf16.xpose.msrb.mxu3 %v1547_v12 }
 0x487   : > { %v1500_v13 = vpop.f32.mrf.mxu1 }
 0x48d   : > { %1695 = vmatpush.bf16.msra.mxu3 %v2506_v48 }
 0x491   : > { %1696 = vmatpush.bf16.msra.mxu3 %v2505_v49 }
 0x492   : > { %2419 = vmatmul.msk.bf16.vlgmr.msra.gmra.mxu2 %vm1026_vm1, %v2977_v50 }
 0x4f5   : > { %v1354_v30 = vpop.f32.mrf.mxu2 }
 0x4f6   : > { %v1377_v31 = vadd.f32 %v1376_v14, %v1354_v30  ;;  %v2568_v14 = vld [vmem:[%s2848_s2] ss:$0 sm:$0xff] }
 0x4f8   : > { %v1384_v32 = vadd.f32 %v2564_v29, %v1377_v31  ;;  %v2571_v31 = vld [vmem:[%s2848_s2 + $0x4] ss:$0 sm:$0xff] }
 0x4fa   : > { %v1385_v33 = vadd.f32 %v1384_v32, %v2907_v5 }
 0x4fc   : > { %v1388_v34 = vsel %vm1026_vm1, %v1385_v33, 0.0 }
 0x4fd   : > { %1389 = vadd.xlane.f32.xlu2 %v1388_v34  ;;  %v1356_v35 = vpop.f32.mrf.mxu2 }
 0x505   : > { %v1533_v32 = vpop.f32.mrf.mxu2 }
 0x50d   : > { %v1535_v39 = vpop.f32.mrf.mxu2 }
 0x50e   : > { %v2513_v39 = vld [vmem:[%s2880_s12 + $0x18] sm:$0xff] }
 0x570   : > { %v1390_v5 = vpop.xlane.xlu2 %1389 }
 0x571   : > { %v1398_v43 = vmul.f32 %v2966_v42, %v1390_v5 }
 0x573   : > { %v1399_v44 = vsub.f32 %v1385_v33, %v1398_v43  ;;  %v1534_v33 = vadd.f32 %v2571_v31, %v1533_v32  ;;  %v1663_v43 = vpop.f32.mrf.mxu2 }
 0x575   : > { %v1400_v45 = vmul.f32 %v1399_v44, %v1399_v44  ;;  %v1574_v35 = vpack.c.bf16 %v1534_v33, %v1534_v33 }
 0x577   : > { %v1401_v46 = vsel %vm1026_vm1, %v1400_v45, 0.0  ;;  %v1579_v37 = vsel %vm1153_vm5, %v1574_v35, 0 }
 0x578   : > { %1402 = vadd.xlane.f32.xlu2 %v1401_v46  ;;  %1588 = vmatpush.bf16.msra.mxu0 %v1579_v37  ;;  %v2509_v37 = vld [vmem:[%s2870_s26 + $0x8] sm:$0xff] }
 0x57b   : > { %v1665_v47 = vpop.f32.mrf.mxu2 }
 0x5eb   : > { %v1403_v55 = vpop.xlane.xlu2 %1402 }
 0x5ec   : > { %v1404_v56 = vmul.f32 %v1403_v55, %v2966_v42  ;;  %v2569_v55 = vld [vmem:[%s2848_s2 + $0x1] ss:$0 sm:$0xff] }
 0x5ee   : > { %v1405_v57 = vadd.f32 1e-05, %v1404_v56 }
 0x5f0   : > { %2591 = vrsqrt.f32 %v1405_v57  ;;  %vm1412_vm8 = vweird.f32 %v1405_v57 }
 0x5f6   : > { %v2592_v58 = vpop.eup %2591 }
 0x5f7   : > { %v1407_v59 = vmul.f32 %v2592_v58, %v1405_v57  ;;  %vm1413_vm7 = vweird.f32 %v2592_v58 }
 0x5f8   : > { %vm1414_vm9 = vmor %vm1412_vm8, %vm1413_vm7 }
 0x5f9   : > { %v1408_v60 = vmul.f32 %v2592_v58, %v1407_v59  ;;  %v2500_v59 = vld [vmem:[%s3198_s9] sm:$0xff] }
 0x5fb   : > { %v1409_v61 = vmul.f32 0.5, %v1408_v60  ;;  %v2573_v60 = vld [vmem:[%s2848_s2 + $0x5] ss:$0 sm:$0xff] }
 0x5fd   : > { %v1410_v62 = vsub.f32 1.5, %v1409_v61 }
 0x5ff   : > { %v1411_v63 = vmul.f32 %v2592_v58, %v1410_v62 }
 0x601   : > { %v1415_v1 = vsel %vm1414_vm9, %v2592_v58, %v1411_v63 }
 0x602   : > { %v1416_v3 = vmul.f32 %v1415_v1, %v1399_v44  ;;  %v1664_v44 = vadd.f32 %v2572_v40, %v1663_v43  ;;  %v2511_v43 = vld [vmem:[%s2880_s12 + $0x8] sm:$0xff] }
 0x604   : > { %v1420_v4 = vmul.f32 %v2565_v0, %v1416_v3  ;;  %v1704_v45 = vpack.c.bf16 %v1664_v44, %v1664_v44 }
 0x606   : > { %v2996_v7 = vadd.f32 %v2566_v2, %v1420_v4  ;;  %v1709_v46 = vsel %vm1116_vm2, %v1704_v45, 0 }
 0x608   : > { %v1426_v6 = vpack.c.bf16 %v2996_v7, %v2996_v7 }
 0x60a   : > { %2361 = vmatmul.msk.bf16.vlgmr.msrb.gmra.mxu0 %vm1026_vm1, %v1426_v6  ;;  %2405 = vmatmul.msk.bf16.vlgmr.msra.gmra.mxu1 %vm1026_vm1, %v1426_v6 }
 0x60b   : > { %1718 = vmatpush.bf16.xpose.msrb.mxu0 %v1709_v46 }
 0x687   : > { %v1460_v15 = vpop.f32.mrf.mxu0  ;;  %v1628_v16 = vpop.f32.mrf.mxu1 }
 0x688   : > { %v1461_v17 = vadd.f32 %v2568_v14, %v1460_v15  ;;  %v1629_v56 = vadd.f32 %v2569_v55, %v1628_v16 }
 0x68a   : > { %v1537_v18 = vmul.f32 0.25, %v1461_v17  ;;  %v1702_v57 = vmul.f32 0.25, %v1629_v56  ;;  %v2507_v17 = vld [vmem:[%s3198_s9 + $0x8] sm:$0xff] }
 0x68b   : > { %1776 = vmatpush.bf16.msrb.mxu2 %v2507_v17 }
 0x68c   : > { %v1538_v19 = vpack.c.bf16 %v1537_v18, %v1537_v18  ;;  %v1703_v58 = vpack.c.bf16 %v1702_v57, %v1702_v57 }
 0x68e   : > { %2390 = vmatmul.msk.bf16.vlgmr.msrb.gmra.mxu3 %vm1116_vm2, %v1538_v19 }
 0x68f   : > { %v1462_v20 = vpop.f32.mrf.mxu0  ;;  %v1630_v21 = vpop.f32.mrf.mxu1  ;;  %1798 = vmatpush.bf16.msrb.mxu3 %v2500_v59  ;;  %v2577_v59 = vld [vmem:[%s3206_s19] ss:$0 sm:$0xff] }
 0x69e   : > { %2433 = vmatmul.msk.bf16.vlgmr.msra.gmra.mxu3 %vm1026_vm1, %v2977_v50 }
 0x711   : > { %v1558_v27 = vpop.f32.mrf.mxu3 }
 0x712   : > { %v1559_v28 = vadd.f32 %v2570_v26, %v1558_v27 }
 0x714   : > { %v1562_v29 = vsel %vm1136_vm4, %v1559_v28, -inf }
 0x715   : > { %1563 = vmax.xlane.f32.xlu0 %v1562_v29 }
 0x719   : > { %v1560_v30 = vpop.f32.mrf.mxu3 }
 0x721   : > { %v1698_v61 = vpop.f32.mrf.mxu3 }
 0x722   : > { %v1699_v63 = vadd.f32 %v2573_v60, %v1698_v61 }
 0x724   : > { %v1736_v1 = vpack.c.bf16 %v1699_v63, %v1699_v63 }
 0x726   : > { %v1741_v50 = vsel %vm1153_vm5, %v1736_v1, 0  ;;  %v2578_v1 = vld [vmem:[%s978_s21] ss:$0 sm:$0xff] }
 0x727   : > { %1750 = vmatpush.bf16.msrb.mxu1 %v1741_v50 }
 0x729   : > { %v1700_v2 = vpop.f32.mrf.mxu3 }
 0x72b   : > { %1925 = vmatpush.bf16.msra.mxu1 %v2513_v39 }
 0x788   : > { %v1564_v34 = vpop.xlane.xlu0 %1563 }
 0x789   : > { %v1565_v36 = vsub.f32 %v1559_v28, %v1564_v34 }
 0x78b   : > { %v1566_v38 = vmul.f32 1.442695, %v1565_v36 }
 0x78d   : > { %2593 = vpow2.f32 %v1566_v38  ;;  %v2508_v38 = vld [vmem:[%s2870_s26] sm:$0xff] }
 0x793   : > { %v2594_v41 = vpop.eup %2593 }
 0x794   : > { %v1568_v5 = vsel %vm1136_vm4, %v2594_v41, 0.0 }
 0x795   : > { %1569 = vadd.xlane.f32.xlu1 %v1568_v5 }
 0x808   : > { %v1570_v51 = vpop.xlane.xlu1 %1569 }
 0x809   : > { %2595 = vrcp.f32 %v1570_v51  ;;  %v2575_v51 = vld [vmem:[%s3202_s23] ss:$0 sm:$0xff] }
 0x80f   : > { %v2596_v52 = vpop.eup %2595 }
 0x810   : > { %v1572_v53 = vmul.f32 %v2596_v52, %v2594_v41  ;;  %v2512_v41 = vld [vmem:[%s2880_s12 + $0x10] sm:$0xff] }
 0x811   : > { %1926 = vmatpush.bf16.msra.mxu1 %v2512_v41 }
 0x812   : > { %v1573_v54 = vpack.c.bf16 %v1572_v53, %v1572_v53  ;;  %v2576_v53 = vld [vmem:[%s3204_s1] ss:$0 sm:$0xff] }
 0x814   : > { %2391 = vmatmul.msk.bf16.vlgmr.msra.gmra.mxu0 %vm1136_vm4, %v1573_v54 }
 0x815   : > { %1872 = vmatpush.bf16.msra.mxu0 %v2509_v37  ;;  %1927 = vmatpush.bf16.msra.mxu1 %v2511_v43 }
 0x819   : > { %1873 = vmatpush.bf16.msra.mxu0 %v2508_v38 }
 0x824   : > { %2434 = vmatmul.msk.bf16.vlgmr.msrb.gmra.mxu0 %vm1116_vm2, %v1703_v58  ;;  %v2510_v58 = vld [vmem:[%s2880_s12] sm:$0xff] }
 0x825   : > { %1928 = vmatpush.bf16.msra.mxu1 %v2510_v58 }
 0x891   : > { %v1590_v62 = vpop.f32.mrf.mxu0 }
 0x892   : > { %v1594_v0 = vpack.c.bf16 %v1590_v62, %v1590_v62 }
 0x894   : > { %2447 = vmatmul.msk.bf16.vlgmr.msrb.gmra.mxu3 %vm1116_vm2, %v1594_v0 }
 0x899   : > { %v1592_v3 = vpop.f32.mrf.mxu0 }
 0x8a1   : > { %v1720_v4 = vpop.f32.mrf.mxu0 }
 0x8a2   : > { %v1721_v6 = vadd.f32 %v2570_v26, %v1720_v4 }
 0x8a4   : > { %v1724_v8 = vsel %vm1136_vm4, %v1721_v6, -inf }
 0x8a5   : > { %1725 = vmax.xlane.f32.xlu2 %v1724_v8 }
 0x8a9   : > { %v1722_v9 = vpop.f32.mrf.mxu0 }
 0x917   : > { %v1800_v10 = vpop.f32.mrf.mxu3 }
 0x918   : > { %v1726_v11 = vpop.xlane.xlu2 %1725 }
 0x919   : > { %v1727_v12 = vsub.f32 %v1721_v6, %v1726_v11 }
 0x91b   : > { %v1728_v13 = vmul.f32 1.442695, %v1727_v12 }
 0x91d   : > { %2597 = vpow2.f32 %v1728_v13 }
 0x91f   : > { %v1802_v14 = vpop.f32.mrf.mxu3 }
 0x923   : > { %v2598_v15 = vpop.eup %2597 }
 0x924   : > { %v1730_v16 = vsel %vm1136_vm4, %v2598_v15, 0.0 }
 0x925   : > { %1731 = vadd.xlane.f32.xlu0 %v1730_v16 }
 0x998   : > { %v1732_v18 = vpop.xlane.xlu0 %1731 }
 0x999   : > { %2599 = vrcp.f32 %v1732_v18 }
 0x99f   : > { %v2600_v19 = vpop.eup %2599 }
 0x9a0   : > { %v1734_v20 = vmul.f32 %v2600_v19, %v2598_v15 }
 0x9a2   : > { %v1735_v21 = vpack.c.bf16 %v1734_v20, %v1734_v20 }
 0x9a4   : > { %2435 = vmatmul.msk.bf16.vlgmr.msrb.gmra.mxu1 %vm1136_vm4, %v1735_v21 }
 0xa21   : > { %v1752_v22 = vpop.f32.mrf.mxu1 }
 0xa22   : > { %v1756_v23 = vpack.c.bf16 %v1752_v22, %v1752_v22  ;;  %v2579_v22 = vld [vmem:[%s981_s27] ss:$0 sm:$0xff] }
 0xa24   : > { %2442 = vmatmul.msk.bf16.vlgmr.msrb.gmra.mxu2 %vm1116_vm2, %v1756_v23 }
 0xa29   : > { %v1754_v24 = vpop.f32.mrf.mxu1 }
 0xaa7   : > { %v1778_v26 = vpop.f32.mrf.mxu2 }
 0xaa8   : > { %v1801_v27 = vadd.f32 %v1800_v10, %v1778_v26 }
 0xaaa   : > { %v1808_v28 = vadd.f32 %v2574_v25, %v1801_v27 }
 0xaac   : > { %v1809_v29 = vadd.f32 %v1808_v28, %v2996_v7 }
 0xaae   : > { %v1812_v30 = vsel %vm1026_vm1, %v1809_v29, 0.0 }
 0xaaf   : > { %1813 = vadd.xlane.f32.xlu1 %v1812_v30  ;;  %v1780_v31 = vpop.f32.mrf.mxu2 }
 0xb22   : > { %v1814_v32 = vpop.xlane.xlu1 %1813 }
 0xb23   : > { %v1815_v33 = vmul.f32 %v1814_v32, %v2966_v42 }
 0xb25   : > { %v1816_v34 = vsub.f32 %v1809_v29, %v1815_v33 }
 0xb27   : > { %v1817_v35 = vmul.f32 %v1816_v34, %v1816_v34 }
 0xb29   : > { %v1818_v36 = vsel %vm1026_vm1, %v1817_v35, 0.0 }
 0xb2a   : > { %1819 = vadd.xlane.f32.xlu2 %v1818_v36 }
 0xb9d   : > { %v1820_v7 = vpop.xlane.xlu2 %1819 }
 0xb9e   : > { %v1821_v40 = vmul.f32 %v1820_v7, %v2966_v42 }
 0xba0   : > { %v1822_v5 = vadd.f32 1e-05, %v1821_v40 }
 0xba2   : > { %2601 = vrsqrt.f32 %v1822_v5  ;;  %vm1829_vm11 = vweird.f32 %v1822_v5 }
 0xba8   : > { %v2602_v44 = vpop.eup %2601 }
 0xba9   : > { %v1824_v45 = vmul.f32 %v2602_v44, %v1822_v5  ;;  %vm1830_vm10 = vweird.f32 %v2602_v44 }
 0xbaa   : > { %vm1831_vm12 = vmor %vm1829_vm11, %vm1830_vm10 }
 0xbab   : > { %v1825_v46 = vmul.f32 %v2602_v44, %v1824_v45 }
 0xbad   : > { %v1826_v47 = vmul.f32 0.5, %v1825_v46 }
 0xbaf   : > { %v1827_v48 = vsub.f32 1.5, %v1826_v47 }
 0xbb1   : > { %v1828_v49 = vmul.f32 %v2602_v44, %v1827_v48 }
 0xbb3   : > { %v1832_v52 = vsel %vm1831_vm12, %v2602_v44, %v1828_v49 }
 0xbb4   : > { %v1833_v54 = vmul.f32 %v1832_v52, %v1816_v34 }
 0xbb6   : > { %v1837_v55 = vmul.f32 %v2575_v51, %v1833_v54 }
 0xbb8   : > { %v1841_v56 = vadd.f32 %v2576_v53, %v1837_v55 }
 0xbba   : > { %v1842_v57 = vpack.c.bf16 %v1841_v56, %v1841_v56 }
 0xbbc   : > { %2456 = vmatmul.msk.bf16.vlgmr.msra.gmra.mxu0 %vm1026_vm1, %v1842_v57 }
 0xc39   : > { %v1875_v60 = vpop.f32.mrf.mxu0 }
 0xc3a   : > { %v1876_v61 = vadd.f32 %v2577_v59, %v1875_v60 }
 0xc3c   : > { %v1879_v62 = vmax.f32 %v1876_v61, 0.0 }
 0xc3e   : > { %v1880_v63 = vpack.c.bf16 %v1879_v62, %v1879_v62 }
 0xc40   : > { %2473 = vmatmul.msk.bf16.vlgmr.msra.gmra.mxu1 %vm1917_vm13, %v1880_v63 }
 0xc41   : > { %v1877_v0 = vpop.f32.mrf.mxu0 }
 0xcbd   : > { %v1930_v50 = vpop.f32.mrf.mxu1 }
 0xcbe   : > { %v1931_v2 = vadd.f32 %v2578_v1, %v1930_v50 }
 0xcc0   : > { %v1934_v3 = vadd.f32 %v1931_v2, %v1841_v56 }
 0xcc2   : > { %v1937_v4 = vsel %vm1026_vm1, %v1934_v3, 0.0 }
 0xcc3   : > { %1938 = vadd.xlane.f32.xlu0 %v1937_v4 }
 0xcc5   : > { %v1932_v6 = vpop.f32.mrf.mxu1 }
 0xd36   : > { %v1939_v8 = vpop.xlane.xlu0 %1938 }
 0xd37   : > { %v1940_v9 = vmul.f32 %v1939_v8, %v2966_v42 }
 0xd39   : > { %v1941_v10 = vsub.f32 %v1934_v3, %v1940_v9 }
 0xd3b   : > { %v1942_v11 = vmul.f32 %v1941_v10, %v1941_v10 }
 0xd3d   : > { %v1943_v12 = vsel %vm1026_vm1, %v1942_v11, 0.0 }
 0xd3e   : > { %1944 = vadd.xlane.f32.xlu1 %v1943_v12 }
 0xdb1   : > { %v1945_v13 = vpop.xlane.xlu1 %1944 }
 0xdb2   : > { %v1946_v14 = vmul.f32 %v1945_v13, %v2966_v42  ;;  %v2580_v42 = vld [vmem:[%s984_s13] ss:$0 sm:$0xff] }
 0xdb4   : > { %v1947_v15 = vadd.f32 1e-05, %v1946_v14 }
 0xdb6   : > { %2603 = vrsqrt.f32 %v1947_v15  ;;  %vm1954_vm15 = vweird.f32 %v1947_v15 }
 0xdbc   : > { %v2604_v16 = vpop.eup %2603 }
 0xdbd   : > { %v1949_v17 = vmul.f32 %v2604_v16, %v1947_v15  ;;  %vm1955_vm14 = vweird.f32 %v2604_v16 }
 0xdbe   : > { %vm1956_vm0 = vmor %vm1954_vm15, %vm1955_vm14 }
 0xdbf   : > { %v1950_v18 = vmul.f32 %v2604_v16, %v1949_v17 }
 0xdc1   : > { %v1951_v19 = vmul.f32 0.5, %v1950_v18 }
 0xdc3   : > { %v1952_v20 = vsub.f32 1.5, %v1951_v19 }
 0xdc5   : > { %v1953_v21 = vmul.f32 %v2604_v16, %v1952_v20 }
 0xdc7   : > { %v1957_v23 = vsel %vm1956_vm0, %v2604_v16, %v1953_v21 }
 0xdc8   : > { %v1958_v24 = vmul.f32 %v1957_v23, %v1941_v10 }
 0xdca   : > { %v1962_v25 = vmul.f32 %v2579_v22, %v1958_v24 }
 0xdcc   : > { %v1966_v26 = vadd.f32 %v2580_v42, %v1962_v25 }
 0xdce   : > { %1967 = vst.msk [vmem:[%s2898_s11] sm:$0xff] %vm1026_vm1, %v1966_v26 }
 0xdcf PF: > { %s3210_s2 = sld [smem:[#allocation5_spill]] }
 0xdd0   : > { %s3212_s25 = sld [smem:[#allocation4_spill]] }
 0xdd1   : > { %s3213_s26 = sld [smem:[#allocation6_spill]] }
 0xdd2   : > { %s3214_s27 = sld [smem:[#allocation7_spill]] }
 0xdd5   : > { %s31_s3 = sadd.s32 1, %s3210_s2   ;;  %s3211_s2 = sld [smem:[#allocation3_spill]] }
 0xdd6   : > { %p28_p8 = scmp.ge.s32.totalorder %s31_s3, 6  }
 0xdd8   :  { %30 = sbr.rel (!%p28_p8) target bundleno = 20 (0x14), region = 220 }

</bundles_post_ra>
